<compile_context>
chip_gen: v5e
topology: v5e:2x2
jax: 0.10.0
libtpu: 0.0.40
codegen_flags: <defaults>
</compile_context>

<pallas_src>
import jax
import jax.numpy as jnp
from jax.experimental import pallas as pl
from jax.experimental.pallas import tpu as pltpu

K_IN = 28 * 28        # 784
H1, H2 = 512, 128
OUT = 10
OUT_PAD = 128         # lane-dense output width (pad 10 -> 128, unmasked vst)
TILE_B = 1024         # batch tile (multiple of 256 to match the 256x256 MXU M dim)


def _mlp_kernel(x_ref, w1_ref, b1_ref, w2_ref, b2_ref, w3_ref, b3_ref, o_ref):
    # x is read once from HBM as f32; cast to bf16 in VMEM right before layer 1.
    x = x_ref[...].astype(jnp.bfloat16)
    # Layer 1: [tb, 784](bf16) @ [784, 512](bf16) -> f32 acc; bias + ReLU in f32,
    # down-cast fused into the activation to shorten the f32 temp's live range.
    h1 = jnp.dot(x, w1_ref[...], preferred_element_type=jnp.float32)
    h1 = jnp.maximum(h1 + b1_ref[...], 0.0).astype(jnp.bfloat16)
    # Layer 2: [tb, 512] @ [512, 128] -> f32 acc
    h2 = jnp.dot(h1, w2_ref[...], preferred_element_type=jnp.float32)
    h2 = jnp.maximum(h2 + b2_ref[...], 0.0).astype(jnp.bfloat16)
    # Layer 3: [tb, 128] @ [128, 128] -> f32 acc (output columns >= 10 are zero)
    out = jnp.dot(h2, w3_ref[...], preferred_element_type=jnp.float32)
    o_ref[...] = (out + b3_ref[...]).astype(o_ref.dtype)


def _round_up(x, m):
    return (x + m - 1) // m * m


def prepare_params(params):
    """One-time weight prep (hoisted out of the forward pass): bf16 weights,
    f32 biases, output width padded 10 -> 128. Weights are stored [in, out]."""
    w1, b1, w2, b2, w3, b3 = params
    w1_p = w1.astype(jnp.bfloat16)                                          # [784, 512]
    w2_p = w2.astype(jnp.bfloat16)                                          # [512, 128]
    w3_p = jnp.pad(w3, ((0, 0), (0, OUT_PAD - OUT))).astype(jnp.bfloat16)   # [128, 128]
    b1_p = b1.reshape(1, H1).astype(jnp.float32)
    b2_p = b2.reshape(1, H2).astype(jnp.float32)
    b3_p = jnp.pad(b3.reshape(1, OUT), ((0, 0), (0, OUT_PAD - OUT))).astype(jnp.float32)
    return (w1_p, b1_p, w2_p, b2_p, w3_p, b3_p)


def _build_call(tb, n_tiles, B, single_buffer_weights):
    if single_buffer_weights:
        def resident(shape):
            # Constant block index -> stays VMEM-resident; single buffer saves VMEM.
            return pl.BlockSpec(shape, lambda i: (0, 0),
                                pipeline_mode=pl.Buffered(1))
    else:
        def resident(shape):
            return pl.BlockSpec(shape, lambda i: (0, 0))

    flops = 2 * B * (K_IN * H1 + H1 * H2 + H2 * OUT_PAD)
    bytes_accessed = (
        B * K_IN * 4                                     # x (f32, read once)
        + (K_IN * H1 + H1 * H2 + H2 * OUT_PAD) * 2       # bf16 weights
        + (H1 + H2 + OUT_PAD) * 4                        # f32 biases
        + B * OUT_PAD * 4                                # f32 output
    )

    return pl.pallas_call(
        _mlp_kernel,
        out_shape=jax.ShapeDtypeStruct((B, OUT_PAD), jnp.float32),
        grid=(n_tiles,),
        in_specs=[
            pl.BlockSpec((tb, K_IN), lambda i: (i, 0)),       # x tile (pipelined)
            resident((K_IN, H1)), resident((1, H1)),          # w1, b1
            resident((H1, H2)), resident((1, H2)),            # w2, b2
            resident((H2, OUT_PAD)), resident((1, OUT_PAD)),  # w3, b3 (padded)
        ],
        out_specs=pl.BlockSpec((tb, OUT_PAD), lambda i: (i, 0)),
        compiler_params=pltpu.CompilerParams(
            dimension_semantics=("parallel",),
            vmem_limit_bytes=32 * 1024 * 1024,
        ),
        cost_estimate=pl.CostEstimate(
            flops=flops, transcendentals=0, bytes_accessed=bytes_accessed),
    )


def model_linear_forward(x, prepared_params):
    """x: [B, 1, 28, 28] or [B, 784] float32. Returns f32 logits [B, 10].

    prepared_params: output of prepare_params() (bf16 weights, padded layer 3).
    """
    x2d = x.reshape(-1, K_IN).astype(jnp.float32)
    B = x2d.shape[0]

    # Batch tile: large enough to amortize the ~0.35 us per-grid-step overhead,
    # clamped (a) to a multiple of 8 and (b) so that mid/large batches produce
    # >= 2 grid steps for v7x's two TensorCores.
    tb = min(TILE_B, _round_up(pl.cdiv(B, 2), 8))
    n_tiles = pl.cdiv(B, tb)

    try:
        out_pad = jax.block_until_ready(
            _build_call(tb, n_tiles, B, True)(x2d, *prepared_params))
    except Exception:
        # Fallback: default double-buffered resident weights if pl.Buffered(1)
        # is not supported by the installed JAX/Mosaic version.
        out_pad = jax.block_until_ready(
            _build_call(tb, n_tiles, B, False)(x2d, *prepared_params))

    return out_pad[:, :OUT]


def init_params(key):
    """Deterministic f32 params. Weights stored as [in, out] (transposed vs torch)."""
    ks = jax.random.split(key, 6)

    def linear(kw, kb, fan_in, fan_out):
        # mimic torch.nn.Linear's U(-1/sqrt(fan_in), 1/sqrt(fan_in)) init
        bound = 1.0 / jnp.sqrt(jnp.float32(fan_in))
        w = jax.random.uniform(kw, (fan_in, fan_out), jnp.float32, -bound, bound)
        b = jax.random.uniform(kb, (1, fan_out), jnp.float32, -bound, bound)
        return w, b

    w1, b1 = linear(ks[0], ks[1], K_IN, H1)
    w2, b2 = linear(ks[2], ks[3], H1, H2)
    w3, b3 = linear(ks[4], ks[5], H2, OUT)
    return (w1, b1, w2, b2, w3, b3)


if __name__ == "__main__":
    key = jax.random.PRNGKey(0)
    k_param, k_x = jax.random.split(key)
    params = init_params(k_param)
    prepared = jax.block_until_ready(prepare_params(params))  # one-time weight prep

    # Small NCHW input consistent with the module's view(-1, 28*28): [2, 1, 28, 28]
    x = jax.random.normal(k_x, (2, 1, 28, 28), jnp.float32)

    out = model_linear_forward(x, prepared)
    out = jax.block_until_ready(out)

    # Pure-JAX f32 reference (tolerance loosened for bf16 weights/activations)
    w1, b1, w2, b2, w3, b3 = params
    x2d = x.reshape(-1, K_IN)
    ref = jnp.maximum(x2d @ w1 + b1, 0.0)
    ref = jnp.maximum(ref @ w2 + b2, 0.0)
    ref = ref @ w3 + b3

    assert out.shape == (2, 10)
    assert jnp.allclose(out, ref, atol=3e-2, rtol=3e-2), (
        f"max abs err {jnp.max(jnp.abs(out - ref))}")

    print("KERNEL_OK")
</pallas_src>

<mosaic_0001>
module attributes {stable_mosaic.version = 11 : i64} {
  func.func @_mlp_kernel(%arg0: i32, %arg1: memref<8x784xf32, #tpu.memory_space<vmem>>, %arg2: memref<784x512xbf16, #tpu.memory_space<vmem>>, %arg3: memref<1x512xf32, #tpu.memory_space<vmem>>, %arg4: memref<512x128xbf16, #tpu.memory_space<vmem>>, %arg5: memref<1x128xf32, #tpu.memory_space<vmem>>, %arg6: memref<128x128xbf16, #tpu.memory_space<vmem>>, %arg7: memref<1x128xf32, #tpu.memory_space<vmem>>, %arg8: memref<8x128xf32, #tpu.memory_space<vmem>>) attributes {dimension_semantics = [#tpu.dimension_semantics<parallel>], iteration_bounds = array<i64: 1>, scalar_prefetch = 0 : i64, scratch_operands = 0 : i64, tpu.core_type = #tpu.core_type<tc>, window_params = [{transform_indices = @transform_0, window_bounds = array<i64: 8, 784>}, {pipeline_mode = #tpu.pipeline_mode<synchronous>, transform_indices = @transform_1, window_bounds = array<i64: 784, 512>}, {pipeline_mode = #tpu.pipeline_mode<synchronous>, transform_indices = @transform_2, window_bounds = array<i64: 1, 512>}, {pipeline_mode = #tpu.pipeline_mode<synchronous>, transform_indices = @transform_3, window_bounds = array<i64: 512, 128>}, {pipeline_mode = #tpu.pipeline_mode<synchronous>, transform_indices = @transform_4, window_bounds = array<i64: 1, 128>}, {pipeline_mode = #tpu.pipeline_mode<synchronous>, transform_indices = @transform_5, window_bounds = array<i64: 128, 128>}, {pipeline_mode = #tpu.pipeline_mode<synchronous>, transform_indices = @transform_6, window_bounds = array<i64: 1, 128>}, {transform_indices = @transform_7, window_bounds = array<i64: 8, 128>}]} {
    %c0 = arith.constant 0 : index
    %c0_0 = arith.constant 0 : index
    %0 = vector.load %arg1[%c0, %c0_0] : memref<8x784xf32, #tpu.memory_space<vmem>>, vector<8x784xf32>
    %1 = arith.truncf %0 : vector<8x784xf32> to vector<8x784xbf16>
    %c0_1 = arith.constant 0 : index
    %c0_2 = arith.constant 0 : index
    %2 = vector.load %arg2[%c0_1, %c0_2] : memref<784x512xbf16, #tpu.memory_space<vmem>>, vector<784x512xbf16>
    %cst = arith.constant dense<0.000000e+00> : vector<8x512xf32>
    %3 = tpu.matmul %1, %2, %cst {dimension_numbers = #tpu.dot_dimension_numbers<[1], [0], [0], [1], [0, 0, 1, 1], [], []>} : vector<8x784xbf16>, vector<784x512xbf16>, vector<8x512xf32> -> vector<8x512xf32>
    %c0_3 = arith.constant 0 : index
    %c0_4 = arith.constant 0 : index
    %4 = vector.load %arg3[%c0_3, %c0_4] : memref<1x512xf32, #tpu.memory_space<vmem>>, vector<1x512xf32>
    %5 = vector.broadcast %4 : vector<1x512xf32> to vector<8x512xf32>
    %6 = arith.addf %3, %5 : vector<8x512xf32>
    %cst_5 = arith.constant 0.000000e+00 : f32
    %7 = vector.broadcast %cst_5 : f32 to vector<8x512xf32>
    %8 = arith.maximumf %6, %7 : vector<8x512xf32>
    %9 = arith.truncf %8 : vector<8x512xf32> to vector<8x512xbf16>
    %c0_6 = arith.constant 0 : index
    %c0_7 = arith.constant 0 : index
    %10 = vector.load %arg4[%c0_6, %c0_7] : memref<512x128xbf16, #tpu.memory_space<vmem>>, vector<512x128xbf16>
    %cst_8 = arith.constant dense<0.000000e+00> : vector<8x128xf32>
    %11 = tpu.matmul %9, %10, %cst_8 {dimension_numbers = #tpu.dot_dimension_numbers<[1], [0], [0], [1], [0, 0, 1, 1], [], []>} : vector<8x512xbf16>, vector<512x128xbf16>, vector<8x128xf32> -> vector<8x128xf32>
    %c0_9 = arith.constant 0 : index
    %c0_10 = arith.constant 0 : index
    %12 = vector.load %arg5[%c0_9, %c0_10] : memref<1x128xf32, #tpu.memory_space<vmem>>, vector<1x128xf32>
    %13 = vector.broadcast %12 : vector<1x128xf32> to vector<8x128xf32>
    %14 = arith.addf %11, %13 : vector<8x128xf32>
    %cst_11 = arith.constant 0.000000e+00 : f32
    %15 = vector.broadcast %cst_11 : f32 to vector<8x128xf32>
    %16 = arith.maximumf %14, %15 : vector<8x128xf32>
    %17 = arith.truncf %16 : vector<8x128xf32> to vector<8x128xbf16>
    %c0_12 = arith.constant 0 : index
    %c0_13 = arith.constant 0 : index
    %18 = vector.load %arg6[%c0_12, %c0_13] : memref<128x128xbf16, #tpu.memory_space<vmem>>, vector<128x128xbf16>
    %cst_14 = arith.constant dense<0.000000e+00> : vector<8x128xf32>
    %19 = tpu.matmul %17, %18, %cst_14 {dimension_numbers = #tpu.dot_dimension_numbers<[1], [0], [0], [1], [0, 0, 1, 1], [], []>} : vector<8x128xbf16>, vector<128x128xbf16>, vector<8x128xf32> -> vector<8x128xf32>
    %c0_15 = arith.constant 0 : index
    %c0_16 = arith.constant 0 : index
    %20 = vector.load %arg7[%c0_15, %c0_16] : memref<1x128xf32, #tpu.memory_space<vmem>>, vector<1x128xf32>
    %21 = vector.broadcast %20 : vector<1x128xf32> to vector<8x128xf32>
    %22 = arith.addf %19, %21 : vector<8x128xf32>
    %c0_17 = arith.constant 0 : index
    %c0_18 = arith.constant 0 : index
    %23 = vector.load %arg8[%c0_17, %c0_18] : memref<8x128xf32, #tpu.memory_space<vmem>>, vector<8x128xf32>
    tpu.vector_store %arg8[%c0_17, %c0_18], %22 {strides = array<i32>} : memref<8x128xf32, #tpu.memory_space<vmem>>, vector<8x128xf32>,
    return
  }
  func.func @transform_0(%arg0: i32) -> (i32, i32) {
    %c0_i32 = arith.constant 0 : i32
    %c0_i32_0 = arith.constant 0 : i32
    return %arg0, %c0_i32 : i32, i32
  }
  func.func @transform_1(%arg0: i32) -> (i32, i32) {
    %c0_i32 = arith.constant 0 : i32
    %c0_i32_0 = arith.constant 0 : i32
    %c0_i32_1 = arith.constant 0 : i32
    return %c0_i32, %c0_i32_0 : i32, i32
  }
  func.func @transform_2(%arg0: i32) -> (i32, i32) {
    %c0_i32 = arith.constant 0 : i32
    %c0_i32_0 = arith.constant 0 : i32
    %c0_i32_1 = arith.constant 0 : i32
    return %c0_i32, %c0_i32_0 : i32, i32
  }
  func.func @transform_3(%arg0: i32) -> (i32, i32) {
    %c0_i32 = arith.constant 0 : i32
    %c0_i32_0 = arith.constant 0 : i32
    %c0_i32_1 = arith.constant 0 : i32
    return %c0_i32, %c0_i32_0 : i32, i32
  }
  func.func @transform_4(%arg0: i32) -> (i32, i32) {
    %c0_i32 = arith.constant 0 : i32
    %c0_i32_0 = arith.constant 0 : i32
    %c0_i32_1 = arith.constant 0 : i32
    return %c0_i32, %c0_i32_0 : i32, i32
  }
  func.func @transform_5(%arg0: i32) -> (i32, i32) {
    %c0_i32 = arith.constant 0 : i32
    %c0_i32_0 = arith.constant 0 : i32
    %c0_i32_1 = arith.constant 0 : i32
    return %c0_i32, %c0_i32_0 : i32, i32
  }
  func.func @transform_6(%arg0: i32) -> (i32, i32) {
    %c0_i32 = arith.constant 0 : i32
    %c0_i32_0 = arith.constant 0 : i32
    %c0_i32_1 = arith.constant 0 : i32
    return %c0_i32, %c0_i32_0 : i32, i32
  }
  func.func @transform_7(%arg0: i32) -> (i32, i32) {
    %c0_i32 = arith.constant 0 : i32
    %c0_i32_0 = arith.constant 0 : i32
    return %arg0, %c0_i32 : i32, i32
  }
}

module attributes {stable_mosaic.version = 11 : i64} {
  func.func @_mlp_kernel(%arg0: i32, %arg1: memref<8x784xf32, #tpu.memory_space<vmem>>, %arg2: memref<784x512xbf16, #tpu.memory_space<vmem>>, %arg3: memref<1x512xf32, #tpu.memory_space<vmem>>, %arg4: memref<512x128xbf16, #tpu.memory_space<vmem>>, %arg5: memref<1x128xf32, #tpu.memory_space<vmem>>, %arg6: memref<128x128xbf16, #tpu.memory_space<vmem>>, %arg7: memref<1x128xf32, #tpu.memory_space<vmem>>, %arg8: memref<8x128xf32, #tpu.memory_space<vmem>>) attributes {dimension_semantics = [#tpu.dimension_semantics<parallel>], iteration_bounds = array<i64: 1>, scalar_prefetch = 0 : i64, scratch_operands = 0 : i64, tpu.core_type = #tpu.core_type<tc>, window_params = [{transform_indices = @transform_0, window_bounds = array<i64: 8, 784>}, {pipeline_mode = #tpu.pipeline_mode<synchronous>, transform_indices = @transform_1, window_bounds = array<i64: 784, 512>}, {pipeline_mode = #tpu.pipeline_mode<synchronous>, transform_indices = @transform_2, window_bounds = array<i64: 1, 512>}, {pipeline_mode = #tpu.pipeline_mode<synchronous>, transform_indices = @transform_3, window_bounds = array<i64: 512, 128>}, {pipeline_mode = #tpu.pipeline_mode<synchronous>, transform_indices = @transform_4, window_bounds = array<i64: 1, 128>}, {pipeline_mode = #tpu.pipeline_mode<synchronous>, transform_indices = @transform_5, window_bounds = array<i64: 128, 128>}, {pipeline_mode = #tpu.pipeline_mode<synchronous>, transform_indices = @transform_6, window_bounds = array<i64: 1, 128>}, {transform_indices = @transform_7, window_bounds = array<i64: 8, 128>}]} {
    %c0 = arith.constant 0 : index
    %c0_0 = arith.constant 0 : index
    %0 = vector.load %arg1[%c0, %c0_0] : memref<8x784xf32, #tpu.memory_space<vmem>>, vector<8x784xf32>
    %1 = arith.truncf %0 : vector<8x784xf32> to vector<8x784xbf16>
    %c0_1 = arith.constant 0 : index
    %c0_2 = arith.constant 0 : index
    %2 = vector.load %arg2[%c0_1, %c0_2] : memref<784x512xbf16, #tpu.memory_space<vmem>>, vector<784x512xbf16>
    %cst = arith.constant dense<0.000000e+00> : vector<8x512xf32>
    %3 = tpu.matmul %1, %2, %cst {dimension_numbers = #tpu.dot_dimension_numbers<[1], [0], [0], [1], [0, 0, 1, 1], [], []>} : vector<8x784xbf16>, vector<784x512xbf16>, vector<8x512xf32> -> vector<8x512xf32>
    %c0_3 = arith.constant 0 : index
    %c0_4 = arith.constant 0 : index
    %4 = vector.load %arg3[%c0_3, %c0_4] : memref<1x512xf32, #tpu.memory_space<vmem>>, vector<1x512xf32>
    %5 = vector.broadcast %4 : vector<1x512xf32> to vector<8x512xf32>
    %6 = arith.addf %3, %5 : vector<8x512xf32>
    %cst_5 = arith.constant 0.000000e+00 : f32
    %7 = vector.broadcast %cst_5 : f32 to vector<8x512xf32>
    %8 = arith.maximumf %6, %7 : vector<8x512xf32>
    %9 = arith.truncf %8 : vector<8x512xf32> to vector<8x512xbf16>
    %c0_6 = arith.constant 0 : index
    %c0_7 = arith.constant 0 : index
    %10 = vector.load %arg4[%c0_6, %c0_7] : memref<512x128xbf16, #tpu.memory_space<vmem>>, vector<512x128xbf16>
    %cst_8 = arith.constant dense<0.000000e+00> : vector<8x128xf32>
    %11 = tpu.matmul %9, %10, %cst_8 {dimension_numbers = #tpu.dot_dimension_numbers<[1], [0], [0], [1], [0, 0, 1, 1], [], []>} : vector<8x512xbf16>, vector<512x128xbf16>, vector<8x128xf32> -> vector<8x128xf32>
    %c0_9 = arith.constant 0 : index
    %c0_10 = arith.constant 0 : index
    %12 = vector.load %arg5[%c0_9, %c0_10] : memref<1x128xf32, #tpu.memory_space<vmem>>, vector<1x128xf32>
    %13 = vector.broadcast %12 : vector<1x128xf32> to vector<8x128xf32>
    %14 = arith.addf %11, %13 : vector<8x128xf32>
    %cst_11 = arith.constant 0.000000e+00 : f32
    %15 = vector.broadcast %cst_11 : f32 to vector<8x128xf32>
    %16 = arith.maximumf %14, %15 : vector<8x128xf32>
    %17 = arith.truncf %16 : vector<8x128xf32> to vector<8x128xbf16>
    %c0_12 = arith.constant 0 : index
    %c0_13 = arith.constant 0 : index
    %18 = vector.load %arg6[%c0_12, %c0_13] : memref<128x128xbf16, #tpu.memory_space<vmem>>, vector<128x128xbf16>
    %cst_14 = arith.constant dense<0.000000e+00> : vector<8x128xf32>
    %19 = tpu.matmul %17, %18, %cst_14 {dimension_numbers = #tpu.dot_dimension_numbers<[1], [0], [0], [1], [0, 0, 1, 1], [], []>} : vector<8x128xbf16>, vector<128x128xbf16>, vector<8x128xf32> -> vector<8x128xf32>
    %c0_15 = arith.constant 0 : index
    %c0_16 = arith.constant 0 : index
    %20 = vector.load %arg7[%c0_15, %c0_16] : memref<1x128xf32, #tpu.memory_space<vmem>>, vector<1x128xf32>
    %21 = vector.broadcast %20 : vector<1x128xf32> to vector<8x128xf32>
    %22 = arith.addf %19, %21 : vector<8x128xf32>
    %c0_17 = arith.constant 0 : index
    %c0_18 = arith.constant 0 : index
    %23 = vector.load %arg8[%c0_17, %c0_18] : memref<8x128xf32, #tpu.memory_space<vmem>>, vector<8x128xf32>
    tpu.vector_store %arg8[%c0_17, %c0_18], %22 {strides = array<i32>} : memref<8x128xf32, #tpu.memory_space<vmem>>, vector<8x128xf32>,
    return
  }
  func.func @transform_0(%arg0: i32) -> (i32, i32) {
    %c0_i32 = arith.constant 0 : i32
    %c0_i32_0 = arith.constant 0 : i32
    return %arg0, %c0_i32 : i32, i32
  }
  func.func @transform_1(%arg0: i32) -> (i32, i32) {
    %c0_i32 = arith.constant 0 : i32
    %c0_i32_0 = arith.constant 0 : i32
    %c0_i32_1 = arith.constant 0 : i32
    return %c0_i32, %c0_i32_0 : i32, i32
  }
  func.func @transform_2(%arg0: i32) -> (i32, i32) {
    %c0_i32 = arith.constant 0 : i32
    %c0_i32_0 = arith.constant 0 : i32
    %c0_i32_1 = arith.constant 0 : i32
    return %c0_i32, %c0_i32_0 : i32, i32
  }
  func.func @transform_3(%arg0: i32) -> (i32, i32) {
    %c0_i32 = arith.constant 0 : i32
    %c0_i32_0 = arith.constant 0 : i32
    %c0_i32_1 = arith.constant 0 : i32
    return %c0_i32, %c0_i32_0 : i32, i32
  }
  func.func @transform_4(%arg0: i32) -> (i32, i32) {
    %c0_i32 = arith.constant 0 : i32
    %c0_i32_0 = arith.constant 0 : i32
    %c0_i32_1 = arith.constant 0 : i32
    return %c0_i32, %c0_i32_0 : i32, i32
  }
  func.func @transform_5(%arg0: i32) -> (i32, i32) {
    %c0_i32 = arith.constant 0 : i32
    %c0_i32_0 = arith.constant 0 : i32
    %c0_i32_1 = arith.constant 0 : i32
    return %c0_i32, %c0_i32_0 : i32, i32
  }
  func.func @transform_6(%arg0: i32) -> (i32, i32) {
    %c0_i32 = arith.constant 0 : i32
    %c0_i32_0 = arith.constant 0 : i32
    %c0_i32_1 = arith.constant 0 : i32
    return %c0_i32, %c0_i32_0 : i32, i32
  }
  func.func @transform_7(%arg0: i32) -> (i32, i32) {
    %c0_i32 = arith.constant 0 : i32
    %c0_i32_0 = arith.constant 0 : i32
    return %arg0, %c0_i32 : i32, i32
  }
}

</mosaic_0001>

<bundles_post_ra>
// kernel: tpu_custom_call.1
= control target key start
LH: loop header
LB: loop body
LE: loop exit
PB: predicated region body
PF: predicated region fallthrough
CT: control target
= control target key end

     0   :  { %12 = vsyncpa [#allocation3], 0  ;;  %s3629_s0 = inlined_call_operand.hbm [shape: f32[2,784], index: 0, kind: input, shape index: {}]   ;;  %s3630_s1 = inlined_call_operand.hbm [shape: bf16[784,512], index: 1, kind: input, shape index: {}]   ;;  %s3631_s2 = inlined_call_operand.hbm [shape: f32[1,512], index: 2, kind: input, shape index: {}]   ;;  %s3632_s3 = inlined_call_operand.hbm [shape: bf16[512,128], index: 3, kind: input, shape index: {}]   ;;  %s3633_s4 = inlined_call_operand.vmem [shape: f32[1,128], index: 4, kind: input, shape index: {}]   ;;  %s3634_s5 = inlined_call_operand.hbm [shape: bf16[128,128], index: 5, kind: input, shape index: {}]   ;;  %s3635_s6 = inlined_call_operand.vmem [shape: f32[1,128], index: 6, kind: input, shape index: {}]   ;;  %s3636_s7 = inlined_call_operand.hbm [shape: f32[2,128], index: 7, kind: output, shape index: {}]  }
   0x1   :  { %13 = vsyncpa [#allocation6], 0 }
   0x2   :  { %14 = vsyncpa [#allocation9], 0 }
   0x3   :  { %15 = vsyncpa [#allocation4], 0  ;;  %s33_s26 = sshll.u32 %s3630_s1, 4  ;;  %s34_s26 = int_to_ptr.hbm [resolvable:$true] %s33_s26 }
   0x4   :  { %19 = vsyncadd [#allocation3], 672  ;;  %s3487_s27 = smov [#allocation5]   ;;  %s57_s8 = sshll.u32 %s3632_s3, 4  ;;  %s58_s8 = int_to_ptr.hbm [resolvable:$true] %s57_s8 }
   0x5   :  { %s35_s28 = sshll.u32 %s3487_s27, 4  ;;  %s3488_s9 = smov 256   ;;  %s36_s28 = int_to_ptr.vmem [resolvable:$true] %s35_s28 }
   0x6   :  { %s3489_s10 = smov 16   ;;  %s3490_s11 = smov [#allocation8]  }
   0x7   :  { %41 = dma.hbm_to_vmem [thread:$0]  %s34_s26, 25088, %s36_s28, [#allocation6], %s3488_s9, %s3488_s9, %s3489_s10  }
   0x8   :  { %s59_s12 = sshll.u32 %s3490_s11, 4  ;;  %s3491_s13 = smov 64   ;;  %s60_s12 = int_to_ptr.vmem [resolvable:$true] %s59_s12 }
   0x9   :  { %s3492_s14 = smov 4   ;;  %s20_s16 = sshll.u32 %s3629_s0, 4  ;;  %s21_s16 = int_to_ptr.hbm [resolvable:$true] %s20_s16 }
   0xa   :  { %65 = dma.hbm_to_vmem [thread:$0]  %s58_s8, 4096, %s60_s12, [#allocation9], %s3491_s13, %s3491_s13, %s3492_s14  }
   0xb   :  { %s3493_s17 = smov [#allocation2]   ;;  %s47_s20 = sshll.u32 %s3631_s2, 4  ;;  %s48_s20 = int_to_ptr.hbm [resolvable:$true] %s47_s20 }
   0xc   :  { %s22_s18 = sshll.u32 %s3493_s17, 4  ;;  %s3494_s21 = smov 224   ;;  %s23_s18 = int_to_ptr.vmem [resolvable:$true] %s22_s18 }
   0xd   :  { %s3495_s22 = smov 14   ;;  %s3496_s23 = smov [#allocation7]  }
   0xe   :  { %28 = dma.hbm_to_vmem [thread:$0]  %s21_s16, 224, %s23_s18, [#allocation3], %s3494_s21, %s3494_s21, %s3495_s22  }
   0xf   :  { %s49_s24 = sshll.u32 %s3496_s23, 4  ;;  %s72_s27 = sshll.u32 %s3634_s5, 4  ;;  %s50_s24 = int_to_ptr.vmem [resolvable:$true] %s49_s24  ;;  %s73_s27 = int_to_ptr.hbm [resolvable:$true] %s72_s27 }
  0x10   :  { %52 = dma.hbm_to_vmem [thread:$0]  %s48_s20, 64, %s50_s24, [#allocation6]  }
  0x11   :  { %s3497_s0 = smov [#allocation10]  }
  0x12   :  { %s74_s28 = sshll.u32 %s3497_s0, 4  ;;  %s75_s28 = int_to_ptr.vmem [resolvable:$true] %s74_s28 }
  0x13   :  { %80 = dma.hbm_to_vmem [thread:$0]  %s73_s27, 1024, %s75_s28, [#allocation9], %s3491_s13, %s3491_s13, %s3492_s14  }
  0x14   :  { %3479 = dma.done.wait [#allocation3], 896  }
  0x15   :  { %3480 = vsyncadd [#allocation3], 4294966400 }
  0x16   :  { %3481 = dma.done.wait [#allocation6], 25152  }
  0x17   :  { %3482 = vsyncadd [#allocation6], 4294942144 }
  0x18   :  { %3483 = dma.done.wait [#allocation9], 5120  }
  0x19   :  { %3484 = vsyncadd [#allocation9], 4294962176  ;;  %v2249_v0 = vld [vmem:[#allocation5 + $0xe0] sm:$0xf]  ;;  %v3113_v1 = vld [vmem:[#allocation5 + $0xec] sm:$0xf0] }
  0x1a   :  { %v2377_v2 = vld [vmem:[#allocation5 + $0x1e0] sm:$0xf]  ;;  %v2250_v3 = vor.u32 %v3113_v1, %v2249_v0  ;;  %v3145_v4 = vld [vmem:[#allocation5 + $0x1ec] sm:$0xf0]  ;;  %vm1342_vm0 = vcmask 130048  }
  0x1b   :  { %v2505_v5 = vld [vmem:[#allocation5 + $0x2e0] sm:$0xf]  ;;  %v3177_v6 = vld [vmem:[#allocation5 + $0x2ec] sm:$0xf0]  ;;  %v2378_v7 = vor.u32 %v3145_v4, %v2377_v2 }
  0x1c   :  { %v2506_v8 = vor.u32 %v3177_v6, %v2505_v5  ;;  %v2633_v9 = vld [vmem:[#allocation5 + $0x3e0] sm:$0xf]  ;;  %v3209_v10 = vld [vmem:[#allocation5 + $0x3ec] sm:$0xf0]  ;;  %1346 = vmatpush.bf16.msra.mxu0 %v2250_v3 }
  0x1d   :  { %v2233_v11 = vld [vmem:[#allocation5 + $0xc0] sm:$0xf]  ;;  %v2634_v12 = vor.u32 %v3209_v10, %v2633_v9  ;;  %v3109_v13 = vld [vmem:[#allocation5 + $0xcc] sm:$0xf0]  ;;  %1359 = vmatpush.bf16.msra.mxu1 %v2378_v7 }
  0x1e   :  { %v2361_v14 = vld [vmem:[#allocation5 + $0x1c0] sm:$0xf]  ;;  %v3141_v15 = vld [vmem:[#allocation5 + $0x1cc] sm:$0xf0]  ;;  %1372 = vmatpush.bf16.msra.mxu2 %v2506_v8  ;;  %v2234_v16 = vor.u32 %v3109_v13, %v2233_v11 }
  0x1f   :  { %v2362_v17 = vor.u32 %v3141_v15, %v2361_v14  ;;  %v2489_v18 = vld [vmem:[#allocation5 + $0x2c0] sm:$0xf]  ;;  %v3173_v19 = vld [vmem:[#allocation5 + $0x2cc] sm:$0xf0]  ;;  %1385 = vmatpush.bf16.msra.mxu3 %v2634_v12 }
  0x20   :  { %v2617_v20 = vld [vmem:[#allocation5 + $0x3c0] sm:$0xf]  ;;  %v2490_v21 = vor.u32 %v3173_v19, %v2489_v18  ;;  %v3205_v22 = vld [vmem:[#allocation5 + $0x3cc] sm:$0xf0]  ;;  %1347 = vmatpush.bf16.msra.mxu0 %v2234_v16 }
  0x21   :  { %v2217_v23 = vld [vmem:[#allocation5 + $0xa0] sm:$0xf]  ;;  %v3105_v24 = vld [vmem:[#allocation5 + $0xac] sm:$0xf0]  ;;  %v2618_v25 = vor.u32 %v3205_v22, %v2617_v20  ;;  %1360 = vmatpush.bf16.msra.mxu1 %v2362_v17 }
  0x22   :  { %v2345_v26 = vld [vmem:[#allocation5 + $0x1a0] sm:$0xf]  ;;  %v3137_v27 = vld [vmem:[#allocation5 + $0x1ac] sm:$0xf0]  ;;  %v2218_v29 = vor.u32 %v3105_v24, %v2217_v23  ;;  %1373 = vmatpush.bf16.msra.mxu2 %v2490_v21  ;;  %v104_v23 = vld [vmem:[#allocation2] sm:$0xff] }
  0x23   :  { %v2473_v28 = vld [vmem:[#allocation5 + $0x2a0] sm:$0xf]  ;;  %v3169_v30 = vld [vmem:[#allocation5 + $0x2ac] sm:$0xf0]  ;;  %v2346_v33 = vor.u32 %v3137_v27, %v2345_v26  ;;  %1386 = vmatpush.bf16.msra.mxu3 %v2618_v25  ;;  %v106_v24 = vld [vmem:[#allocation2 + $0xe] sm:$0xff] }
  0x24   :  { %v2601_v31 = vld [vmem:[#allocation5 + $0x3a0] sm:$0xf]  ;;  %v3201_v32 = vld [vmem:[#allocation5 + $0x3ac] sm:$0xf0]  ;;  %v2474_v34 = vor.u32 %v3169_v30, %v2473_v28  ;;  %1348 = vmatpush.bf16.msra.mxu0 %v2218_v29  ;;  %v108_v29 = vld [vmem:[#allocation2 + $0x1c] sm:$0xff] }
  0x25   :  { %v2201_v35 = vld [vmem:[#allocation5 + $0x80] sm:$0xf]  ;;  %v3101_v36 = vld [vmem:[#allocation5 + $0x8c] sm:$0xf0]  ;;  %v2602_v38 = vor.u32 %v3201_v32, %v2601_v31  ;;  %1361 = vmatpush.bf16.msra.mxu1 %v2346_v33  ;;  %120 = vst [vmem:[#allocation1] ss:$4 sm:$0xff] %v104_v23 }
  0x26   :  { %v2329_v37 = vld [vmem:[#allocation5 + $0x180] sm:$0xf]  ;;  %v3133_v39 = vld [vmem:[#allocation5 + $0x18c] sm:$0xf0]  ;;  %v2202_v44 = vor.u32 %v3101_v36, %v2201_v35  ;;  %1374 = vmatpush.bf16.msra.mxu2 %v2474_v34  ;;  %122 = vst [vmem:[#allocation1 + $0x1] ss:$4 sm:$0xff] %v106_v24 }
  0x27   :  { %v2457_v40 = vld [vmem:[#allocation5 + $0x280] sm:$0xf]  ;;  %v3165_v41 = vld [vmem:[#allocation5 + $0x28c] sm:$0xf0]  ;;  %v2330_v45 = vor.u32 %v3133_v39, %v2329_v37  ;;  %1387 = vmatpush.bf16.msra.mxu3 %v2602_v38  ;;  %124 = vst [vmem:[#allocation1 + $0x2] ss:$4 sm:$0xff] %v108_v29 }
  0x28   :  { %v2585_v42 = vld [vmem:[#allocation5 + $0x380] sm:$0xf]  ;;  %v3197_v43 = vld [vmem:[#allocation5 + $0x38c] sm:$0xf0]  ;;  %v2458_v46 = vor.u32 %v3165_v41, %v2457_v40  ;;  %1349 = vmatpush.bf16.msra.mxu0 %v2202_v44  ;;  %v3111_v37 = vld [vmem:[#allocation5 + $0xe4] sm:$0xf] }
  0x29   :  { %v2185_v47 = vld [vmem:[#allocation5 + $0x60] sm:$0xf]  ;;  %v3097_v48 = vld [vmem:[#allocation5 + $0x6c] sm:$0xf0]  ;;  %v2586_v50 = vor.u32 %v3197_v43, %v2585_v42  ;;  %1362 = vmatpush.bf16.msra.mxu1 %v2330_v45  ;;  %v2251_v38 = vld [vmem:[#allocation5 + $0xf0] sm:$0xf0] }
  0x2a   :  { %v2313_v49 = vld [vmem:[#allocation5 + $0x160] sm:$0xf]  ;;  %v3129_v51 = vld [vmem:[#allocation5 + $0x16c] sm:$0xf0]  ;;  %v2186_v56 = vor.u32 %v3097_v48, %v2185_v47  ;;  %1375 = vmatpush.bf16.msra.mxu2 %v2458_v46  ;;  %v2254_v46 = vor.u32 %v3111_v37, %v2251_v38  ;;  %v3143_v47 = vld [vmem:[#allocation5 + $0x1e4] sm:$0xf] }
  0x2b   :  { %v2441_v52 = vld [vmem:[#allocation5 + $0x260] sm:$0xf]  ;;  %v3161_v53 = vld [vmem:[#allocation5 + $0x26c] sm:$0xf0]  ;;  %v2314_v57 = vor.u32 %v3129_v51, %v2313_v49  ;;  %1388 = vmatpush.bf16.msra.mxu3 %v2586_v50  ;;  %v2379_v51 = vld [vmem:[#allocation5 + $0x1f0] sm:$0xf0] }
  0x2c   :  { %v2569_v54 = vld [vmem:[#allocation5 + $0x360] sm:$0xf]  ;;  %v3193_v55 = vld [vmem:[#allocation5 + $0x36c] sm:$0xf0]  ;;  %v2442_v58 = vor.u32 %v3161_v53, %v2441_v52  ;;  %1350 = vmatpush.bf16.msra.mxu0 %v2186_v56  ;;  %v2203_v23 = vld [vmem:[#allocation5 + $0x90] sm:$0xf0] }
  0x2d   :  { %v2169_v59 = vld [vmem:[#allocation5 + $0x40] sm:$0xf]  ;;  %v3093_v60 = vld [vmem:[#allocation5 + $0x4c] sm:$0xf0]  ;;  %v2570_v62 = vor.u32 %v3193_v55, %v2569_v54  ;;  %1363 = vmatpush.bf16.msra.mxu1 %v2314_v57  ;;  %v3107_v54 = vld [vmem:[#allocation5 + $0xc4] sm:$0xf] }
  0x2e   :  { %v2297_v61 = vld [vmem:[#allocation5 + $0x140] sm:$0xf]  ;;  %v3125_v63 = vld [vmem:[#allocation5 + $0x14c] sm:$0xf0]  ;;  %v2170_v4 = vor.u32 %v3093_v60, %v2169_v59  ;;  %1376 = vmatpush.bf16.msra.mxu2 %v2442_v58  ;;  %v2235_v55 = vld [vmem:[#allocation5 + $0xd0] sm:$0xf0] }
  0x2f   :  { %v2425_v0 = vld [vmem:[#allocation5 + $0x240] sm:$0xf]  ;;  %v3157_v1 = vld [vmem:[#allocation5 + $0x24c] sm:$0xf0]  ;;  %v2298_v6 = vor.u32 %v3125_v63, %v2297_v61  ;;  %1389 = vmatpush.bf16.msra.mxu3 %v2570_v62  ;;  %v3139_v58 = vld [vmem:[#allocation5 + $0x1c4] sm:$0xf] }
  0x30   :  { %v2553_v2 = vld [vmem:[#allocation5 + $0x340] sm:$0xf]  ;;  %v3189_v3 = vld [vmem:[#allocation5 + $0x34c] sm:$0xf0]  ;;  %v2426_v7 = vor.u32 %v3157_v1, %v2425_v0  ;;  %1351 = vmatpush.bf16.msra.mxu0 %v2170_v4  ;;  %v2363_v59 = vld [vmem:[#allocation5 + $0x1d0] sm:$0xf0]  ;;  %v2382_v0 = vor.u32 %v3143_v47, %v2379_v51  ;;  %v2238_v4 = vor.u32 %v3107_v54, %v2235_v55 }
  0x31   :  { %v2153_v5 = vld [vmem:[#allocation5 + $0x20] sm:$0xf]  ;;  %v3089_v8 = vld [vmem:[#allocation5 + $0x2c] sm:$0xf0]  ;;  %v2554_v11 = vor.u32 %v3189_v3, %v2553_v2  ;;  %1364 = vmatpush.bf16.msra.mxu1 %v2298_v6  ;;  %v2171_v51 = vld [vmem:[#allocation5 + $0x50] sm:$0xf0] }
  0x32   :  { %v2281_v9 = vld [vmem:[#allocation5 + $0x120] sm:$0xf]  ;;  %v3121_v10 = vld [vmem:[#allocation5 + $0x12c] sm:$0xf0]  ;;  %v2154_v18 = vor.u32 %v3089_v8, %v2153_v5  ;;  %1377 = vmatpush.bf16.msra.mxu2 %v2426_v7  ;;  %v3123_v55 = vld [vmem:[#allocation5 + $0x144] sm:$0xf] }
  0x33   :  { %v2409_v12 = vld [vmem:[#allocation5 + $0x220] sm:$0xf]  ;;  %v3153_v13 = vld [vmem:[#allocation5 + $0x22c] sm:$0xf0]  ;;  %v2282_v25 = vor.u32 %v3121_v10, %v2281_v9  ;;  %1390 = vmatpush.bf16.msra.mxu3 %v2554_v11  ;;  %v3103_v9 = vld [vmem:[#allocation5 + $0xa4] sm:$0xf] }
  0x34   :  { %v2537_v14 = vld [vmem:[#allocation5 + $0x320] sm:$0xf]  ;;  %v3185_v15 = vld [vmem:[#allocation5 + $0x32c] sm:$0xf0]  ;;  %v2410_v26 = vor.u32 %v3153_v13, %v2409_v12  ;;  %1352 = vmatpush.bf16.msra.mxu0 %v2154_v18  ;;  %v2219_v10 = vld [vmem:[#allocation5 + $0xb0] sm:$0xf0]  ;;  %v2366_v13 = vor.u32 %v3139_v58, %v2363_v59 }
  0x35   :  { %v2137_v16 = vld [vmem:[#allocation5] sm:$0xf]  ;;  %v3085_v17 = vld [vmem:[#allocation5 + $0xc] sm:$0xf0]  ;;  %v2538_v31 = vor.u32 %v3185_v15, %v2537_v14  ;;  %1365 = vmatpush.bf16.msra.mxu1 %v2282_v25  ;;  %v3135_v15 = vld [vmem:[#allocation5 + $0x1a4] sm:$0xf]  ;;  %v2222_v18 = vor.u32 %v3103_v9, %v2219_v10 }
  0x36   :  { %v2265_v19 = vld [vmem:[#allocation5 + $0x100] sm:$0xf]  ;;  %v3117_v20 = vld [vmem:[#allocation5 + $0x10c] sm:$0xf0]  ;;  %v2138_v36 = vor.u32 %v3085_v17, %v2137_v16  ;;  %1378 = vmatpush.bf16.msra.mxu2 %v2410_v26  ;;  %v3131_v25 = vld [vmem:[#allocation5 + $0x184] sm:$0xf] }
  0x37   :  { %v2393_v21 = vld [vmem:[#allocation5 + $0x200] sm:$0xf]  ;;  %v3149_v22 = vld [vmem:[#allocation5 + $0x20c] sm:$0xf0]  ;;  %v2266_v39 = vor.u32 %v3117_v20, %v2265_v19  ;;  %1391 = vmatpush.bf16.msra.mxu3 %v2538_v31  ;;  %v2347_v19 = vld [vmem:[#allocation5 + $0x1b0] sm:$0xf0] }
  0x38   :  { %v2521_v27 = vld [vmem:[#allocation5 + $0x300] sm:$0xf]  ;;  %v3181_v28 = vld [vmem:[#allocation5 + $0x30c] sm:$0xf0]  ;;  %v2394_v40 = vor.u32 %v3149_v22, %v2393_v21  ;;  %1353 = vmatpush.bf16.msra.mxu0 %v2138_v36  ;;  %v3099_v22 = vld [vmem:[#allocation5 + $0x84] sm:$0xf]  ;;  %v2350_v26 = vor.u32 %v3135_v15, %v2347_v19 }
  0x39   :  { %v110_v30 = vld [vmem:[#allocation2 + $0x2a] sm:$0xff]  ;;  %v2761_v32 = vld [vmem:[#allocation5 + $0x4e0] sm:$0xf]  ;;  %v2522_v43 = vor.u32 %v3181_v28, %v2521_v27  ;;  %1366 = vmatpush.bf16.msra.mxu1 %v2266_v39  ;;  %v2206_v31 = vor.u32 %v3099_v22, %v2203_v23  ;;  %v3127_v39 = vld [vmem:[#allocation5 + $0x164] sm:$0xf] }
  0x3a   :  { %v3241_v33 = vld [vmem:[#allocation5 + $0x4ec] sm:$0xf0]  ;;  %v2889_v34 = vld [vmem:[#allocation5 + $0x5e0] sm:$0xf]  ;;  %126 = vst [vmem:[#allocation1 + $0x3] ss:$4 sm:$0xff] %v110_v30  ;;  %1379 = vmatpush.bf16.msra.mxu2 %v2394_v40 }
  0x3b   :  { %v3273_v35 = vld [vmem:[#allocation5 + $0x5ec] sm:$0xf0]  ;;  %v2905_v41 = vld [vmem:[#allocation5 + $0x600] sm:$0xf]  ;;  %v2762_v44 = vor.u32 %v3241_v33, %v2761_v32  ;;  %1392 = vmatpush.bf16.msra.mxu3 %v2522_v43  ;;  %v2331_v28 = vld [vmem:[#allocation5 + $0x190] sm:$0xf0] }
  0x3c   :  { %v3277_v42 = vld [vmem:[#allocation5 + $0x60c] sm:$0xf0]  ;;  %v2890_v45 = vor.u32 %v3273_v35, %v2889_v34  ;;  %v2745_v48 = vld [vmem:[#allocation5 + $0x4c0] sm:$0xf]  ;;  %v3095_v34 = vld [vmem:[#allocation5 + $0x64] sm:$0xf]  ;;  %v2334_v43 = vor.u32 %v3131_v25, %v2331_v28 }
  0x3d   :  { %v3237_v49 = vld [vmem:[#allocation5 + $0x4cc] sm:$0xf0]  ;;  %v2906_v50 = vor.u32 %v3277_v42, %v2905_v41  ;;  %v2873_v52 = vld [vmem:[#allocation5 + $0x5c0] sm:$0xf]  ;;  %1398 = vmatpush.bf16.msrb.mxu0 %v2762_v44  ;;  %v2187_v35 = vld [vmem:[#allocation5 + $0x70] sm:$0xf0] }
  0x3e   :  { %v3269_v53 = vld [vmem:[#allocation5 + $0x5cc] sm:$0xf0]  ;;  %v2729_v56 = vld [vmem:[#allocation5 + $0x4a0] sm:$0xf]  ;;  %v2746_v57 = vor.u32 %v3237_v49, %v2745_v48  ;;  %1411 = vmatpush.bf16.msrb.mxu1 %v2890_v45  ;;  %v2315_v40 = vld [vmem:[#allocation5 + $0x170] sm:$0xf0]  ;;  %v2190_v47 = vor.u32 %v3095_v34, %v2187_v35 }
  0x3f   :  { %v3233_v60 = vld [vmem:[#allocation5 + $0x4ac] sm:$0xf0]  ;;  %v2857_v61 = vld [vmem:[#allocation5 + $0x5a0] sm:$0xf]  ;;  %1437 = vmatpush.bf16.msrb.mxu3 %v2254_v46  ;;  %v2874_v1 = vor.u32 %v3269_v53, %v2873_v52  ;;  %1431 = vmatpush.bf16.msrb.mxu2 %v2906_v50  ;;  %v111_v42 = vld [vmem:[#allocation2 + $0x32] sm:$0x3f]  ;;  %v2318_v53 = vor.u32 %v3127_v39, %v2315_v40 }
  0x40   :  { %v3265_v62 = vld [vmem:[#allocation5 + $0x5ac] sm:$0xf0]  ;;  %v2730_v12 = vor.u32 %v3233_v60, %v2729_v56  ;;  %v2713_v16 = vld [vmem:[#allocation5 + $0x480] sm:$0xf]  ;;  %v3091_v50 = vld [vmem:[#allocation5 + $0x44] sm:$0xf] }
  0x41   :  { %v137_v63 = vld.sshfl [vmem:[#allocation1 + $0x10] sm:$0xff pattern:$0x73625140]  ;;  %v135_v2 = vld.sshfl [vmem:[#allocation1] sm:$0xff pattern:$0x73625140]  ;;  %1399 = vmatpush.bf16.msrb.mxu0 %v2746_v57  ;;  %v2858_v14 = vor.u32 %v3265_v62, %v2857_v61  ;;  %v2174_v58 = vor.u32 %v3091_v50, %v2171_v51 }
  0x42   :  { %v3556_v3 = vpack.c.bf16 %v137_v63, %v137_v63  ;;  %v3558_v5 = vpack.c.bf16 %v135_v2, %v135_v2  ;;  %v138_v6 = vld.sshfl [vmem:[#allocation1 + $0x18] sm:$0xff pattern:$0x73625140]  ;;  %v136_v7 = vld.sshfl [vmem:[#allocation1 + $0x8] sm:$0xff pattern:$0x73625140]  ;;  %1412 = vmatpush.bf16.msrb.mxu1 %v2874_v1 }
  0x43   :  { %v3560_v8 = vpack.c.bf16 %v138_v6, %v138_v6  ;;  %v3562_v11 = vpack.c.bf16 %v136_v7, %v136_v7  ;;  %v3229_v17 = vld [vmem:[#allocation5 + $0x48c] sm:$0xf0]  ;;  %1438 = vmatpush.bf16.msrb.mxu3 %v2238_v4  ;;  %v2841_v20 = vld [vmem:[#allocation5 + $0x580] sm:$0xf]  ;;  %134 = vst [vmem:[#allocation1 + $0x23] ss:$4 sm:$0xff] %v111_v42 }
  0x44   :  { %1380 = vmatmul.bf16.vlgmr.msra.gmra.mxu2 %v3556_v3  ;;  %1354 = vmatmul.bf16.vlgmr.msra.gmra.mxu0 %v3558_v5  ;;  %v3261_v21 = vld [vmem:[#allocation5 + $0x58c] sm:$0xf0]  ;;  %v2714_v24 = vor.u32 %v3229_v17, %v2713_v16  ;;  %v2697_v29 = vld [vmem:[#allocation5 + $0x460] sm:$0xf]  ;;  %v2299_v59 = vld [vmem:[#allocation5 + $0x150] sm:$0xf0] }
  0x45   :  { %1450 = vmatpush.bf16.msra.mxu2 %v2382_v0  ;;  %1393 = vmatmul.bf16.vlgmr.msra.gmra.mxu3 %v3560_v8  ;;  %v2842_v27 = vor.u32 %v3261_v21, %v2841_v20  ;;  %v3225_v30 = vld [vmem:[#allocation5 + $0x46c] sm:$0xf0]  ;;  %v2825_v32 = vld [vmem:[#allocation5 + $0x560] sm:$0xf]  ;;  %v3087_v62 = vld [vmem:[#allocation5 + $0x24] sm:$0xf]  ;;  %v2302_v9 = vor.u32 %v3123_v55, %v2299_v59 }
  0x46   :  { %1367 = vmatmul.bf16.vlgmr.msra.gmra.mxu1 %v3562_v11  ;;  %1400 = vmatpush.bf16.msrb.mxu0 %v2730_v12  ;;  %v3257_v33 = vld [vmem:[#allocation5 + $0x56c] sm:$0xf0]  ;;  %v107_v37 = vld [vmem:[#allocation2 + $0x16] sm:$0x3f]  ;;  %v2698_v38 = vor.u32 %v3225_v30, %v2697_v29  ;;  %v2155_v63 = vld [vmem:[#allocation5 + $0x30] sm:$0xf0] }
  0x47   :  { %1413 = vmatpush.bf16.msrb.mxu1 %v2858_v14  ;;  %1439 = vmatpush.bf16.msrb.mxu3 %v2222_v18  ;;  %v105_v36 = vld [vmem:[#allocation2 + $0x8] sm:$0x3f]  ;;  %v2826_v44 = vor.u32 %v3257_v33, %v2825_v32  ;;  %v2681_v45 = vld [vmem:[#allocation5 + $0x440] sm:$0xf]  ;;  %130 = vst [vmem:[#allocation1 + $0x21] ss:$4 sm:$0xff] %v107_v37  ;;  %v2158_v15 = vor.u32 %v3087_v62, %v2155_v63 }
  0x48   :  { %v109_v41 = vld [vmem:[#allocation2 + $0x24] sm:$0x3f]  ;;  %128 = vst [vmem:[#allocation1 + $0x20] ss:$4 sm:$0xff] %v105_v36  ;;  %v2809_v48 = vld [vmem:[#allocation5 + $0x540] sm:$0xf] }
  0x49   :  { %1451 = vmatpush.bf16.msra.mxu2 %v2366_v13  ;;  %v3221_v46 = vld [vmem:[#allocation5 + $0x44c] sm:$0xf0]  ;;  %132 = vst [vmem:[#allocation1 + $0x22] ss:$4 sm:$0xff] %v109_v41  ;;  %v2665_v56 = vld [vmem:[#allocation5 + $0x420] sm:$0xf] }
  0x4a   :  { %1401 = vmatpush.bf16.msrb.mxu0 %v2714_v24  ;;  %v3253_v49 = vld [vmem:[#allocation5 + $0x54c] sm:$0xf0]  ;;  %v2682_v52 = vor.u32 %v3221_v46, %v2681_v45  ;;  %v2793_v60 = vld [vmem:[#allocation5 + $0x520] sm:$0xf]  ;;  %v3119_v1 = vld [vmem:[#allocation5 + $0x124] sm:$0xf] }
  0x4b   :  { %1414 = vmatpush.bf16.msrb.mxu1 %v2842_v27  ;;  %1440 = vmatpush.bf16.msrb.mxu3 %v2206_v31  ;;  %v2810_v54 = vor.u32 %v3253_v49, %v2809_v48  ;;  %v3217_v57 = vld [vmem:[#allocation5 + $0x42c] sm:$0xf0]  ;;  %v2283_v2 = vld [vmem:[#allocation5 + $0x130] sm:$0xf0]  ;;  %v2649_v4 = vld [vmem:[#allocation5 + $0x400] sm:$0xf] }
  0x4c   :  { %v3249_v61 = vld [vmem:[#allocation5 + $0x52c] sm:$0xf0]  ;;  %v2666_v0 = vor.u32 %v3217_v57, %v2665_v56  ;;  %v2777_v7 = vld [vmem:[#allocation5 + $0x500] sm:$0xf]  ;;  %v3083_v13 = vld [vmem:[#allocation5 + $0x4] sm:$0xf] }
  0x4d   :  { %1452 = vmatpush.bf16.msra.mxu2 %v2350_v26  ;;  %v3213_v6 = vld [vmem:[#allocation5 + $0x40c] sm:$0xf0]  ;;  %v2794_v10 = vor.u32 %v3249_v61, %v2793_v60  ;;  %v2139_v14 = vld [vmem:[#allocation5 + $0x10] sm:$0xf0]  ;;  %v3175_v17 = vld [vmem:[#allocation5 + $0x2e4] sm:$0xf]  ;;  %v2286_v26 = vor.u32 %v3119_v1, %v2283_v2 }
  0x4e   :  { %1402 = vmatpush.bf16.msrb.mxu0 %v2698_v38  ;;  %v3245_v12 = vld [vmem:[#allocation5 + $0x50c] sm:$0xf0]  ;;  %v2507_v19 = vld [vmem:[#allocation5 + $0x2f0] sm:$0xf0]  ;;  %v3207_v20 = vld [vmem:[#allocation5 + $0x3e4] sm:$0xf]  ;;  %v2650_v22 = vor.u32 %v3213_v6, %v2649_v4  ;;  %v2142_v30 = vor.u32 %v3083_v13, %v2139_v14 }
  0x4f   :  { %1415 = vmatpush.bf16.msrb.mxu1 %v2826_v44  ;;  %1441 = vmatpush.bf16.msrb.mxu3 %v2190_v47  ;;  %v2635_v21 = vld [vmem:[#allocation5 + $0x3f0] sm:$0xf0]  ;;  %v3239_v23 = vld [vmem:[#allocation5 + $0x4e4] sm:$0xf]  ;;  %v2778_v27 = vor.u32 %v3245_v12, %v2777_v7  ;;  %v2510_v31 = vor.u32 %v3175_v17, %v2507_v19 }
  0x50   :  { %v141_v16 = vld.sshfl [vmem:[#allocation1 + $0x30] sm:$0xff pattern:$0x73625140]  ;;  %v3115_v25 = vld [vmem:[#allocation5 + $0x104] sm:$0xf]  ;;  %v2638_v35 = vor.u32 %v3207_v20, %v2635_v21 }
  0x51   :  { %1453 = vmatpush.bf16.msra.mxu2 %v2334_v43  ;;  %v3568_v18 = vpack.c.bf16 %v141_v16, %v141_v16  ;;  %v2763_v24 = vld [vmem:[#allocation5 + $0x4f0] sm:$0xf0]  ;;  %v139_v28 = vld.sshfl [vmem:[#allocation1 + $0x20] sm:$0xff pattern:$0x73625140] }
  0x52   :  { %1403 = vmatpush.bf16.msrb.mxu0 %v2682_v52  ;;  %v140_v29 = vld.sshfl [vmem:[#allocation1 + $0x28] sm:$0xff pattern:$0x73625140]  ;;  %v2267_v32 = vld [vmem:[#allocation5 + $0x110] sm:$0xf0]  ;;  %v2766_v36 = vor.u32 %v3239_v23, %v2763_v24  ;;  %v3572_v40 = vpack.c.bf16 %v139_v28, %v139_v28 }
  0x53   :  { %1416 = vmatpush.bf16.msrb.mxu1 %v2810_v54  ;;  %1442 = vmatpush.bf16.msrb.mxu3 %v2174_v58  ;;  %v3271_v33 = vld [vmem:[#allocation5 + $0x5e4] sm:$0xf]  ;;  %v2891_v34 = vld [vmem:[#allocation5 + $0x5f0] sm:$0xf0]  ;;  %v3574_v41 = vpack.c.bf16 %v140_v29, %v140_v29  ;;  %v2270_v45 = vor.u32 %v3115_v25, %v2267_v32 }
  0x54   :  { %2919 = vmatmul.msk.bf16.vlgmr.msrb.gmra.mxu2 %vm1342_vm0, %v3568_v18  ;;  %v3171_v37 = vld [vmem:[#allocation5 + $0x2c4] sm:$0xf]  ;;  %v2491_v38 = vld [vmem:[#allocation5 + $0x2d0] sm:$0xf0]  ;;  %v2894_v46 = vor.u32 %v3271_v33, %v2891_v34 }
  0x55   :  { %1454 = vmatpush.bf16.msra.mxu2 %v2318_v53  ;;  %v3203_v39 = vld [vmem:[#allocation5 + $0x3c4] sm:$0xf]  ;;  %v2619_v42 = vld [vmem:[#allocation5 + $0x3d0] sm:$0xf0]  ;;  %v2494_v47 = vor.u32 %v3171_v37, %v2491_v38 }
  0x56   :  { %1404 = vmatpush.bf16.msrb.mxu0 %v2666_v0  ;;  %v3235_v43 = vld [vmem:[#allocation5 + $0x4c4] sm:$0xf]  ;;  %v2747_v44 = vld [vmem:[#allocation5 + $0x4d0] sm:$0xf0]  ;;  %v2622_v50 = vor.u32 %v3203_v39, %v2619_v42 }
  0x57   :  { %1417 = vmatpush.bf16.msrb.mxu1 %v2794_v10  ;;  %1443 = vmatpush.bf16.msrb.mxu3 %v2158_v15  ;;  %v3267_v48 = vld [vmem:[#allocation5 + $0x5c4] sm:$0xf]  ;;  %v2875_v49 = vld [vmem:[#allocation5 + $0x5d0] sm:$0xf0]  ;;  %v2750_v51 = vor.u32 %v3235_v43, %v2747_v44 }
  0x58   :  { %v3167_v52 = vld [vmem:[#allocation5 + $0x2a4] sm:$0xf]  ;;  %v2475_v53 = vld [vmem:[#allocation5 + $0x2b0] sm:$0xf0]  ;;  %v2878_v58 = vor.u32 %v3267_v48, %v2875_v49 }
  0x59   :  { %1455 = vmatpush.bf16.msra.mxu2 %v2302_v9  ;;  %v3199_v54 = vld [vmem:[#allocation5 + $0x3a4] sm:$0xf]  ;;  %v2603_v55 = vld [vmem:[#allocation5 + $0x3b0] sm:$0xf0]  ;;  %v2478_v59 = vor.u32 %v3167_v52, %v2475_v53 }
  0x5a   :  { %1405 = vmatpush.bf16.msrb.mxu0 %v2650_v22  ;;  %v3231_v56 = vld [vmem:[#allocation5 + $0x4a4] sm:$0xf]  ;;  %v2731_v57 = vld [vmem:[#allocation5 + $0x4b0] sm:$0xf0]  ;;  %v2606_v62 = vor.u32 %v3199_v54, %v2603_v55 }
  0x5b   :  { %1418 = vmatpush.bf16.msrb.mxu1 %v2778_v27  ;;  %1444 = vmatpush.bf16.msrb.mxu3 %v2142_v30  ;;  %v3263_v60 = vld [vmem:[#allocation5 + $0x5a4] sm:$0xf]  ;;  %v2859_v61 = vld [vmem:[#allocation5 + $0x5b0] sm:$0xf0]  ;;  %v2734_v63 = vor.u32 %v3231_v56, %v2731_v57 }
  0x5c   :  { %v3163_v0 = vld [vmem:[#allocation5 + $0x284] sm:$0xf]  ;;  %v2459_v1 = vld [vmem:[#allocation5 + $0x290] sm:$0xf0]  ;;  %v2862_v9 = vor.u32 %v3263_v60, %v2859_v61  ;;  %v2257_v61 = vld [vmem:[#allocation5 + $0xe8] sm:$0xf] }
  0x5d   :  { %1456 = vmatpush.bf16.msra.mxu2 %v2286_v26  ;;  %1406 = vmatmul.bf16.vlgmr.msrb.gmra.mxu0 %v3572_v40  ;;  %v3195_v2 = vld [vmem:[#allocation5 + $0x384] sm:$0xf]  ;;  %v2587_v4 = vld [vmem:[#allocation5 + $0x390] sm:$0xf0]  ;;  %v2462_v10 = vor.u32 %v3163_v0, %v2459_v1  ;;  %v3146_v0 = vld [vmem:[#allocation5 + $0x1f4] sm:$0xf0] }
  0x5e   :  { %1463 = vmatpush.bf16.msra.mxu0 %v2510_v31  ;;  %1419 = vmatmul.bf16.vlgmr.msrb.gmra.mxu1 %v3574_v41  ;;  %v3227_v6 = vld [vmem:[#allocation5 + $0x484] sm:$0xf]  ;;  %v2715_v7 = vld [vmem:[#allocation5 + $0x490] sm:$0xf0]  ;;  %v2590_v14 = vor.u32 %v3195_v2, %v2587_v4 }
  0x5f   :  { %1476 = vmatpush.bf16.msra.mxu1 %v2638_v35  ;;  %1489 = vmatpush.bf16.msra.mxu3 %v2766_v36  ;;  %v3259_v12 = vld [vmem:[#allocation5 + $0x584] sm:$0xf]  ;;  %v2843_v13 = vld [vmem:[#allocation5 + $0x590] sm:$0xf0]  ;;  %v2718_v15 = vor.u32 %v3227_v6, %v2715_v7 }
  0x60   :  { %1445 = vmatmul.bf16.vlgmr.msrb.gmra.mxu3 %v3558_v5  ;;  %v3159_v16 = vld [vmem:[#allocation5 + $0x264] sm:$0xf]  ;;  %v2443_v17 = vld [vmem:[#allocation5 + $0x270] sm:$0xf0]  ;;  %v2846_v23 = vor.u32 %v3259_v12, %v2843_v13  ;;  %v2513_v13 = vld [vmem:[#allocation5 + $0x2e8] sm:$0xf] }
  0x61   :  { %1457 = vmatpush.bf16.msra.mxu2 %v2270_v45  ;;  %v3191_v19 = vld [vmem:[#allocation5 + $0x364] sm:$0xf]  ;;  %v2571_v20 = vld [vmem:[#allocation5 + $0x370] sm:$0xf0]  ;;  %v2446_v24 = vor.u32 %v3159_v16, %v2443_v17  ;;  %v2641_v17 = vld [vmem:[#allocation5 + $0x3e8] sm:$0xf] }
  0x62   :  { %1464 = vmatpush.bf16.msra.mxu0 %v2494_v47  ;;  %v3223_v21 = vld [vmem:[#allocation5 + $0x464] sm:$0xf]  ;;  %v2699_v22 = vld [vmem:[#allocation5 + $0x470] sm:$0xf0]  ;;  %v2574_v27 = vor.u32 %v3191_v19, %v2571_v20  ;;  %v3210_v19 = vld [vmem:[#allocation5 + $0x3f4] sm:$0xf0] }
  0x63   :  { %1477 = vmatpush.bf16.msra.mxu1 %v2622_v50  ;;  %1490 = vmatpush.bf16.msra.mxu3 %v2750_v51  ;;  %v3255_v25 = vld [vmem:[#allocation5 + $0x564] sm:$0xf]  ;;  %v2827_v26 = vld [vmem:[#allocation5 + $0x570] sm:$0xf0]  ;;  %v2702_v28 = vor.u32 %v3223_v21, %v2699_v22  ;;  %v2241_v20 = vld [vmem:[#allocation5 + $0xc8] sm:$0xf] }
  0x64   :  { %v3155_v29 = vld [vmem:[#allocation5 + $0x244] sm:$0xf]  ;;  %v2427_v30 = vld [vmem:[#allocation5 + $0x250] sm:$0xf0]  ;;  %1458 = vmatmul.bf16.vlgmr.msra.gmra.mxu2 %v3562_v11  ;;  %v2830_v35 = vor.u32 %v3255_v25, %v2827_v26  ;;  %v3110_v21 = vld [vmem:[#allocation5 + $0xd4] sm:$0xf0] }
  0x65   :  { %1502 = vmatpush.bf16.msrb.mxu2 %v2894_v46  ;;  %v3187_v31 = vld [vmem:[#allocation5 + $0x344] sm:$0xf]  ;;  %v2555_v32 = vld [vmem:[#allocation5 + $0x350] sm:$0xf0]  ;;  %v2430_v36 = vor.u32 %v3155_v29, %v2427_v30  ;;  %v2369_v22 = vld [vmem:[#allocation5 + $0x1c8] sm:$0xf]  ;;  %v2242_v30 = vor.u32 %v3110_v21, %v2241_v20 }
  0x66   :  { %1465 = vmatpush.bf16.msra.mxu0 %v2478_v59  ;;  %v3219_v33 = vld [vmem:[#allocation5 + $0x444] sm:$0xf]  ;;  %v2683_v34 = vld [vmem:[#allocation5 + $0x450] sm:$0xf0]  ;;  %v2558_v39 = vor.u32 %v3187_v31, %v2555_v32  ;;  %v3174_v29 = vld [vmem:[#allocation5 + $0x2d4] sm:$0xf0] }
  0x67   :  { %1478 = vmatpush.bf16.msra.mxu1 %v2606_v62  ;;  %1491 = vmatpush.bf16.msra.mxu3 %v2734_v63  ;;  %v3251_v37 = vld [vmem:[#allocation5 + $0x544] sm:$0xf]  ;;  %v2811_v38 = vld [vmem:[#allocation5 + $0x550] sm:$0xf0]  ;;  %v2686_v42 = vor.u32 %v3219_v33, %v2683_v34  ;;  %v3114_v62 = vld [vmem:[#allocation5 + $0xf4] sm:$0xf0] }
  0x68   :  { %v3151_v43 = vld [vmem:[#allocation5 + $0x224] sm:$0xf]  ;;  %v2411_v44 = vld [vmem:[#allocation5 + $0x230] sm:$0xf0]  ;;  %v2814_v49 = vor.u32 %v3251_v37, %v2811_v38  ;;  %v2385_v63 = vld [vmem:[#allocation5 + $0x1e8] sm:$0xf] }
  0x69   :  { %1503 = vmatpush.bf16.msrb.mxu2 %v2878_v58  ;;  %v3183_v45 = vld [vmem:[#allocation5 + $0x324] sm:$0xf]  ;;  %v2539_v46 = vld [vmem:[#allocation5 + $0x330] sm:$0xf0]  ;;  %v2414_v50 = vor.u32 %v3151_v43, %v2411_v44  ;;  %v2386_v16 = vor.u32 %v3146_v0, %v2385_v63  ;;  %v2625_v32 = vld [vmem:[#allocation5 + $0x3c8] sm:$0xf] }
  0x6a   :  { %1466 = vmatpush.bf16.msra.mxu0 %v2462_v10  ;;  %v3215_v47 = vld [vmem:[#allocation5 + $0x424] sm:$0xf]  ;;  %v2667_v48 = vld [vmem:[#allocation5 + $0x430] sm:$0xf0]  ;;  %v2542_v54 = vor.u32 %v3183_v45, %v2539_v46  ;;  %v3206_v33 = vld [vmem:[#allocation5 + $0x3d4] sm:$0xf0] }
  0x6b   :  { %1479 = vmatpush.bf16.msra.mxu1 %v2590_v14  ;;  %1492 = vmatpush.bf16.msra.mxu3 %v2718_v15  ;;  %v3247_v51 = vld [vmem:[#allocation5 + $0x524] sm:$0xf]  ;;  %v2795_v52 = vld [vmem:[#allocation5 + $0x530] sm:$0xf0]  ;;  %v2670_v55 = vor.u32 %v3215_v47, %v2667_v48  ;;  %v3178_v14 = vld [vmem:[#allocation5 + $0x2f4] sm:$0xf0]  ;;  %v2258_v15 = vor.u32 %v3114_v62, %v2257_v61 }
  0x6c   :  { %v3147_v53 = vld [vmem:[#allocation5 + $0x204] sm:$0xf]  ;;  %v2395_v56 = vld [vmem:[#allocation5 + $0x210] sm:$0xf0]  ;;  %v2798_v1 = vor.u32 %v3247_v51, %v2795_v52  ;;  %v2514_v26 = vor.u32 %v3178_v14, %v2513_v13  ;;  %v2225_v34 = vld [vmem:[#allocation5 + $0xa8] sm:$0xf] }
  0x6d   :  { %1504 = vmatpush.bf16.msrb.mxu2 %v2862_v9  ;;  %v3179_v57 = vld [vmem:[#allocation5 + $0x304] sm:$0xf]  ;;  %v2523_v58 = vld [vmem:[#allocation5 + $0x310] sm:$0xf0]  ;;  %v2398_v2 = vor.u32 %v3147_v53, %v2395_v56  ;;  %v3138_v37 = vld [vmem:[#allocation5 + $0x1b4] sm:$0xf0] }
  0x6e   :  { %1467 = vmatpush.bf16.msra.mxu0 %v2446_v24  ;;  %v3211_v59 = vld [vmem:[#allocation5 + $0x404] sm:$0xf]  ;;  %v2651_v60 = vld [vmem:[#allocation5 + $0x410] sm:$0xf0]  ;;  %v2526_v9 = vor.u32 %v3179_v57, %v2523_v58  ;;  %v3170_v43 = vld [vmem:[#allocation5 + $0x2b4] sm:$0xf0] }
  0x6f   :  { %1480 = vmatpush.bf16.msra.mxu1 %v2574_v27  ;;  %1493 = vmatpush.bf16.msra.mxu3 %v2702_v28  ;;  %v3243_v4 = vld [vmem:[#allocation5 + $0x504] sm:$0xf]  ;;  %v2779_v6 = vld [vmem:[#allocation5 + $0x510] sm:$0xf0]  ;;  %v2654_v10 = vor.u32 %v3211_v59, %v2651_v60  ;;  %v2642_v27 = vor.u32 %v3210_v19, %v2641_v17  ;;  %v2497_v28 = vld [vmem:[#allocation5 + $0x2c8] sm:$0xf] }
  0x70   :  { %v3275_v7 = vld [vmem:[#allocation5 + $0x604] sm:$0xf]  ;;  %v2907_v12 = vld [vmem:[#allocation5 + $0x610] sm:$0xf0]  ;;  %v2782_v24 = vor.u32 %v3243_v4, %v2779_v6  ;;  %v2498_v38 = vor.u32 %v3174_v29, %v2497_v28  ;;  %v2609_v46 = vld [vmem:[#allocation5 + $0x3a8] sm:$0xf] }
  0x71   :  { %1505 = vmatpush.bf16.msrb.mxu2 %v2846_v23  ;;  %v3142_v23 = vld [vmem:[#allocation5 + $0x1d4] sm:$0xf0]  ;;  %v2910_v25 = vor.u32 %v3275_v7, %v2907_v12  ;;  %v2209_v48 = vld [vmem:[#allocation5 + $0x88] sm:$0xf] }
  0x72   :  { %1468 = vmatpush.bf16.msra.mxu0 %v2430_v36  ;;  %v2370_v31 = vor.u32 %v3142_v23, %v2369_v22  ;;  %v2353_v36 = vld [vmem:[#allocation5 + $0x1a8] sm:$0xf]  ;;  %v3202_v47 = vld [vmem:[#allocation5 + $0x3b4] sm:$0xf0] }
  0x73   :  { %1481 = vmatpush.bf16.msra.mxu1 %v2558_v39  ;;  %1494 = vmatpush.bf16.msra.mxu3 %v2686_v42  ;;  %v2626_v39 = vor.u32 %v3206_v33, %v2625_v32  ;;  %v2481_v42 = vld [vmem:[#allocation5 + $0x2a8] sm:$0xf]  ;;  %v2354_v45 = vor.u32 %v3138_v37, %v2353_v36  ;;  %v3134_v51 = vld [vmem:[#allocation5 + $0x194] sm:$0xf0]  ;;  %v2610_v53 = vor.u32 %v3202_v47, %v2609_v46 }
  0x74   :  { %v2482_v52 = vor.u32 %v3170_v43, %v2481_v42  ;;  %v2593_v58 = vld [vmem:[#allocation5 + $0x388] sm:$0xf]  ;;  %v3198_v59 = vld [vmem:[#allocation5 + $0x394] sm:$0xf0] }
  0x75   :  { %1506 = vmatpush.bf16.msrb.mxu2 %v2830_v35  ;;  %v3106_v35 = vld [vmem:[#allocation5 + $0xb4] sm:$0xf0]  ;;  %v2193_v60 = vld [vmem:[#allocation5 + $0x68] sm:$0xf] }
  0x76   :  { %1469 = vmatpush.bf16.msra.mxu0 %v2414_v50  ;;  %v2226_v44 = vor.u32 %v3106_v35, %v2225_v34  ;;  %v2337_v50 = vld [vmem:[#allocation5 + $0x188] sm:$0xf]  ;;  %v3098_v61 = vld [vmem:[#allocation5 + $0x74] sm:$0xf0] }
  0x77   :  { %1482 = vmatpush.bf16.msra.mxu1 %v2542_v54  ;;  %1495 = vmatpush.bf16.msra.mxu3 %v2670_v55  ;;  %v2465_v54 = vld [vmem:[#allocation5 + $0x288] sm:$0xf]  ;;  %v3166_v55 = vld [vmem:[#allocation5 + $0x294] sm:$0xf0]  ;;  %v2338_v57 = vor.u32 %v3134_v51, %v2337_v50  ;;  %v2194_v6 = vor.u32 %v3098_v61, %v2193_v60 }
  0x78   :  { %v2321_v62 = vld [vmem:[#allocation5 + $0x168] sm:$0xf]  ;;  %v3130_v63 = vld [vmem:[#allocation5 + $0x174] sm:$0xf0]  ;;  %v2466_v0 = vor.u32 %v3166_v55, %v2465_v54  ;;  %v3112_v55 = vld [vmem:[#allocation5 + $0xec] sm:$0xf] }
  0x79   :  { %1507 = vmatpush.bf16.msrb.mxu2 %v2814_v49  ;;  %v3102_v49 = vld [vmem:[#allocation5 + $0x94] sm:$0xf0]  ;;  %v2322_v7 = vor.u32 %v3130_v63, %v2321_v62  ;;  %v2177_v12 = vld [vmem:[#allocation5 + $0x48] sm:$0xf] }
  0x7a   :  { %1470 = vmatpush.bf16.msra.mxu0 %v2398_v2  ;;  %v2210_v56 = vor.u32 %v3102_v49, %v2209_v48  ;;  %v2449_v2 = vld [vmem:[#allocation5 + $0x268] sm:$0xf]  ;;  %v3162_v4 = vld [vmem:[#allocation5 + $0x274] sm:$0xf0] }
  0x7b   :  { %1483 = vmatpush.bf16.msra.mxu1 %v2526_v9  ;;  %1496 = vmatpush.bf16.msra.mxu3 %v2654_v10  ;;  %v2577_v9 = vld [vmem:[#allocation5 + $0x368] sm:$0xf]  ;;  %v3194_v10 = vld [vmem:[#allocation5 + $0x374] sm:$0xf0] }
  0x7c   :  { %v3094_v13 = vld [vmem:[#allocation5 + $0x54] sm:$0xf0]  ;;  %v2305_v14 = vld [vmem:[#allocation5 + $0x148] sm:$0xf]  ;;  %v2578_v17 = vor.u32 %v3194_v10, %v2577_v9  ;;  %v2387_v9 = vld [vmem:[#allocation5 + $0x1f8] sm:$0xf0] }
  0x7d   :  { %1508 = vmatpush.bf16.msrb.mxu2 %v2798_v1  ;;  %1471 = vmatmul.bf16.vlgmr.msra.gmra.mxu0 %v3556_v3  ;;  %v2594_v1 = vor.u32 %v3198_v59, %v2593_v58  ;;  %v2433_v19 = vld [vmem:[#allocation5 + $0x248] sm:$0xf]  ;;  %v3158_v20 = vld [vmem:[#allocation5 + $0x254] sm:$0xf0]  ;;  %v2178_v21 = vor.u32 %v3094_v13, %v2177_v12  ;;  %v3108_v13 = vld [vmem:[#allocation5 + $0xcc] sm:$0xf] }
  0x7e   :  { %1522 = vmatpush.bf16.msrb.mxu0 %v2910_v25  ;;  %1497 = vmatmul.bf16.vlgmr.msra.gmra.mxu3 %v3572_v40  ;;  %v2561_v23 = vld [vmem:[#allocation5 + $0x348] sm:$0xf]  ;;  %v3122_v28 = vld [vmem:[#allocation5 + $0x134] sm:$0xf0] }
  0x7f   :  { %1528 = vmatpush.bf16.msrb.mxu1 %v2258_v15  ;;  %1541 = vmatpush.bf16.msrb.mxu3 %v2386_v16  ;;  %v3126_v15 = vld [vmem:[#allocation5 + $0x154] sm:$0xf0]  ;;  %v2450_v16 = vor.u32 %v3162_v4, %v2449_v2  ;;  %v2161_v25 = vld [vmem:[#allocation5 + $0x28] sm:$0xf] }
  0x80   :  { %1484 = vmatmul.bf16.vlgmr.msra.gmra.mxu1 %v3560_v8  ;;  %v2306_v22 = vor.u32 %v3126_v15, %v2305_v14  ;;  %v2417_v29 = vld [vmem:[#allocation5 + $0x228] sm:$0xf]  ;;  %v3186_v34 = vld [vmem:[#allocation5 + $0x334] sm:$0xf0]  ;;  %v2243_v14 = vld [vmem:[#allocation5 + $0xd8] sm:$0xf0] }
  0x81   :  { %1509 = vmatpush.bf16.msrb.mxu2 %v2782_v24  ;;  %v3190_v24 = vld [vmem:[#allocation5 + $0x354] sm:$0xf0]  ;;  %v2545_v33 = vld [vmem:[#allocation5 + $0x328] sm:$0xf] }
  0x82   :  { %1554 = vmatpush.bf16.msra.mxu0 %v2514_v26  ;;  %v3090_v26 = vld [vmem:[#allocation5 + $0x34] sm:$0xf0]  ;;  %v2562_v32 = vor.u32 %v3190_v24, %v2561_v23  ;;  %v2145_v35 = vld [vmem:[#allocation5 + $0x8] sm:$0xf]  ;;  %v2546_v48 = vor.u32 %v3186_v34, %v2545_v33  ;;  %v2371_v23 = vld [vmem:[#allocation5 + $0x1d8] sm:$0xf0] }
  0x83   :  { %1529 = vmatpush.bf16.msrb.mxu1 %v2242_v30  ;;  %1542 = vmatpush.bf16.msrb.mxu3 %v2370_v31  ;;  %v3154_v30 = vld [vmem:[#allocation5 + $0x234] sm:$0xf0]  ;;  %v2434_v31 = vor.u32 %v3158_v20, %v2433_v19  ;;  %v2162_v36 = vor.u32 %v3090_v26, %v2161_v25  ;;  %v2769_v43 = vld [vmem:[#allocation5 + $0x4e8] sm:$0xf]  ;;  %v3104_v26 = vld [vmem:[#allocation5 + $0xac] sm:$0xf] }
  0x84   :  { %1510 = vmatmul.bf16.vlgmr.msrb.gmra.mxu2 %v3574_v41  ;;  %v3118_v42 = vld [vmem:[#allocation5 + $0x114] sm:$0xf0]  ;;  %v2418_v47 = vor.u32 %v3154_v30, %v2417_v29  ;;  %v2401_v49 = vld [vmem:[#allocation5 + $0x208] sm:$0xf]  ;;  %v3136_v34 = vld [vmem:[#allocation5 + $0x1ac] sm:$0xf] }
  0x85   :  { %1567 = vmatpush.bf16.msra.mxu2 %v2642_v27  ;;  %v2289_v27 = vld [vmem:[#allocation5 + $0x128] sm:$0xf]  ;;  %v3274_v46 = vld [vmem:[#allocation5 + $0x5f4] sm:$0xf0] }
  0x86   :  { %1555 = vmatpush.bf16.msra.mxu0 %v2498_v38  ;;  %v2290_v37 = vor.u32 %v3122_v28, %v2289_v27  ;;  %v3086_v38 = vld [vmem:[#allocation5 + $0x14] sm:$0xf0]  ;;  %v2529_v51 = vld [vmem:[#allocation5 + $0x308] sm:$0xf]  ;;  %v2227_v27 = vld [vmem:[#allocation5 + $0xb8] sm:$0xf0] }
  0x87   :  { %1530 = vmatpush.bf16.msrb.mxu1 %v2226_v44  ;;  %1543 = vmatpush.bf16.msrb.mxu3 %v2354_v45  ;;  %v3242_v44 = vld [vmem:[#allocation5 + $0x4f4] sm:$0xf0]  ;;  %v2897_v45 = vld [vmem:[#allocation5 + $0x5e8] sm:$0xf]  ;;  %v2230_v33 = vor.u32 %v3104_v26, %v2227_v27  ;;  %v3208_v26 = vld [vmem:[#allocation5 + $0x3ec] sm:$0xf] }
  0x88   :  { %v3150_v50 = vld [vmem:[#allocation5 + $0x214] sm:$0xf0]  ;;  %v2898_v58 = vor.u32 %v3274_v46, %v2897_v45  ;;  %v2753_v59 = vld [vmem:[#allocation5 + $0x4c8] sm:$0xf]  ;;  %v2643_v27 = vld [vmem:[#allocation5 + $0x3f8] sm:$0xf0] }
  0x89   :  { %1568 = vmatpush.bf16.msra.mxu2 %v2626_v39  ;;  %v2273_v39 = vld [vmem:[#allocation5 + $0x108] sm:$0xf]  ;;  %v3182_v54 = vld [vmem:[#allocation5 + $0x314] sm:$0xf0] }
  0x8a   :  { %1556 = vmatpush.bf16.msra.mxu0 %v2482_v52  ;;  %v2146_v52 = vor.u32 %v3086_v38, %v2145_v35  ;;  %v2913_v60 = vld [vmem:[#allocation5 + $0x608] sm:$0xf]  ;;  %v3278_v61 = vld [vmem:[#allocation5 + $0x614] sm:$0xf0]  ;;  %v2530_v2 = vor.u32 %v3182_v54, %v2529_v51  ;;  %v2355_v35 = vld [vmem:[#allocation5 + $0x1b8] sm:$0xf0] }
  0x8b   :  { %1531 = vmatpush.bf16.msrb.mxu1 %v2210_v56  ;;  %1544 = vmatpush.bf16.msrb.mxu3 %v2338_v57  ;;  %v2259_v56 = vld [vmem:[#allocation5 + $0xf8] sm:$0xf0]  ;;  %v2770_v57 = vor.u32 %v3242_v44, %v2769_v43  ;;  %v3238_v62 = vld [vmem:[#allocation5 + $0x4d4] sm:$0xf0]  ;;  %v2881_v63 = vld [vmem:[#allocation5 + $0x5c8] sm:$0xf]  ;;  %v2358_v46 = vor.u32 %v3136_v34, %v2355_v35  ;;  %v2646_v35 = vor.u32 %v3208_v26, %v2643_v27 }
  0x8c   :  { %v2262_v4 = vor.u32 %v3112_v55, %v2259_v56  ;;  %v2754_v10 = vor.u32 %v3238_v62, %v2753_v59  ;;  %v2737_v15 = vld [vmem:[#allocation5 + $0x4a8] sm:$0xf]  ;;  %v3266_v19 = vld [vmem:[#allocation5 + $0x5b4] sm:$0xf0]  ;;  %v3100_v38 = vld [vmem:[#allocation5 + $0x8c] sm:$0xf] }
  0x8d   :  { %1569 = vmatpush.bf16.msra.mxu2 %v2610_v53  ;;  %2920 = vmatmul.msk.bf16.vlgmr.msrb.gmra.mxu0 %vm1342_vm0, %v3568_v18  ;;  %v2274_v53 = vor.u32 %v3118_v42, %v2273_v39  ;;  %v2721_v28 = vld [vmem:[#allocation5 + $0x488] sm:$0xf]  ;;  %v3230_v29 = vld [vmem:[#allocation5 + $0x494] sm:$0xf0]  ;;  %v2211_v39 = vld [vmem:[#allocation5 + $0x98] sm:$0xf0] }
  0x8e   :  { %1557 = vmatpush.bf16.msra.mxu0 %v2466_v0  ;;  %v3270_v0 = vld [vmem:[#allocation5 + $0x5d4] sm:$0xf0]  ;;  %v2849_v30 = vld [vmem:[#allocation5 + $0x588] sm:$0xf]  ;;  %v2579_v26 = vld [vmem:[#allocation5 + $0x378] sm:$0xf0] }
  0x8f   :  { %1532 = vmatpush.bf16.msrb.mxu1 %v2194_v6  ;;  %1545 = vmatpush.bf16.msrb.mxu3 %v2322_v7  ;;  %v2914_v6 = vor.u32 %v3278_v61, %v2913_v60  ;;  %v3144_v7 = vld [vmem:[#allocation5 + $0x1ec] sm:$0xf]  ;;  %v2882_v12 = vor.u32 %v3270_v0, %v2881_v63  ;;  %v2705_v42 = vld [vmem:[#allocation5 + $0x468] sm:$0xf]  ;;  %v3226_v43 = vld [vmem:[#allocation5 + $0x474] sm:$0xf0] }
  0x90   :  { %v2390_v20 = vor.u32 %v3144_v7, %v2387_v9  ;;  %v2833_v44 = vld [vmem:[#allocation5 + $0x568] sm:$0xf]  ;;  %v3258_v45 = vld [vmem:[#allocation5 + $0x574] sm:$0xf0]  ;;  %v3128_v60 = vld [vmem:[#allocation5 + $0x16c] sm:$0xf] }
  0x91   :  { %1570 = vmatpush.bf16.msra.mxu2 %v2594_v1  ;;  %v2402_v1 = vor.u32 %v3150_v50, %v2401_v49  ;;  %v2339_v49 = vld [vmem:[#allocation5 + $0x198] sm:$0xf0]  ;;  %v2706_v50 = vor.u32 %v3226_v43, %v2705_v42  ;;  %v2834_v51 = vor.u32 %v3258_v45, %v2833_v44  ;;  %v2689_v54 = vld [vmem:[#allocation5 + $0x448] sm:$0xf]  ;;  %v3222_v55 = vld [vmem:[#allocation5 + $0x454] sm:$0xf0] }
  0x92   :  { %1558 = vmatpush.bf16.msra.mxu0 %v2450_v16  ;;  %v3234_v16 = vld [vmem:[#allocation5 + $0x4b4] sm:$0xf0]  ;;  %v2817_v56 = vld [vmem:[#allocation5 + $0x548] sm:$0xf]  ;;  %v2323_v61 = vld [vmem:[#allocation5 + $0x178] sm:$0xf0]  ;;  %v2690_v62 = vor.u32 %v3222_v55, %v2689_v54 }
  0x93   :  { %1533 = vmatpush.bf16.msrb.mxu1 %v2178_v21  ;;  %1546 = vmatpush.bf16.msrb.mxu3 %v2306_v22  ;;  %v2246_v21 = vor.u32 %v3108_v13, %v2243_v14  ;;  %v3140_v22 = vld [vmem:[#allocation5 + $0x1cc] sm:$0xf]  ;;  %v2738_v24 = vor.u32 %v3234_v16, %v2737_v15  ;;  %v3250_v7 = vld [vmem:[#allocation5 + $0x534] sm:$0xf0]  ;;  %v2326_v9 = vor.u32 %v3128_v60, %v2323_v61  ;;  %v2307_v13 = vld [vmem:[#allocation5 + $0x158] sm:$0xf0] }
  0x94   :  { %v3092_v0 = vld [vmem:[#allocation5 + $0x4c] sm:$0xf]  ;;  %v2499_v43 = vld [vmem:[#allocation5 + $0x2d8] sm:$0xf0] }
  0x95   :  { %1571 = vmatpush.bf16.msra.mxu2 %v2578_v17  ;;  %v2865_v17 = vld [vmem:[#allocation5 + $0x5a8] sm:$0xf]  ;;  %v3088_v14 = vld [vmem:[#allocation5 + $0x2c] sm:$0xf]  ;;  %v2627_v45 = vld [vmem:[#allocation5 + $0x3d8] sm:$0xf0] }
  0x96   :  { %1559 = vmatpush.bf16.msra.mxu0 %v2434_v31  ;;  %v2866_v25 = vor.u32 %v3266_v19, %v2865_v17  ;;  %v3262_v31 = vld [vmem:[#allocation5 + $0x594] sm:$0xf0]  ;;  %v2163_v17 = vld [vmem:[#allocation5 + $0x38] sm:$0xf0]  ;;  %v2657_v19 = vld [vmem:[#allocation5 + $0x408] sm:$0xf] }
  0x97   :  { %1534 = vmatpush.bf16.msrb.mxu1 %v2162_v36  ;;  %1547 = vmatpush.bf16.msrb.mxu3 %v2290_v37  ;;  %v2722_v36 = vor.u32 %v3230_v29, %v2721_v28  ;;  %v2850_v37 = vor.u32 %v3262_v31, %v2849_v30  ;;  %v2166_v28 = vor.u32 %v3088_v14, %v2163_v17  ;;  %v3120_v29 = vld [vmem:[#allocation5 + $0x12c] sm:$0xf]  ;;  %v2291_v30 = vld [vmem:[#allocation5 + $0x138] sm:$0xf0] }
  0x98   :  { %v3172_v42 = vld [vmem:[#allocation5 + $0x2cc] sm:$0xf]  ;;  %v2611_v61 = vld [vmem:[#allocation5 + $0x3b8] sm:$0xf0] }
  0x99   :  { %1572 = vmatpush.bf16.msra.mxu2 %v2562_v32  ;;  %v2374_v32 = vor.u32 %v3140_v22, %v2371_v23  ;;  %v3246_v22 = vld [vmem:[#allocation5 + $0x514] sm:$0xf0]  ;;  %v3176_v23 = vld [vmem:[#allocation5 + $0x2ec] sm:$0xf] }
  0x9a   :  { %1560 = vmatpush.bf16.msra.mxu0 %v2418_v47  ;;  %v2214_v47 = vor.u32 %v3100_v38, %v2211_v39  ;;  %v2771_v38 = vld [vmem:[#allocation5 + $0x4f8] sm:$0xf0]  ;;  %v2294_v39 = vor.u32 %v3120_v29, %v2291_v30  ;;  %v3204_v44 = vld [vmem:[#allocation5 + $0x3cc] sm:$0xf] }
  0x9b   :  { %1535 = vmatpush.bf16.msrb.mxu1 %v2146_v52  ;;  %1548 = vmatpush.bf16.msrb.mxu3 %v2274_v53  ;;  %v3096_v52 = vld [vmem:[#allocation5 + $0x6c] sm:$0xf]  ;;  %v2195_v53 = vld [vmem:[#allocation5 + $0x78] sm:$0xf0]  ;;  %v2630_v54 = vor.u32 %v3204_v44, %v2627_v45 }
  0x9c   :  { %v2198_v59 = vor.u32 %v3096_v52, %v2195_v53  ;;  %v2502_v52 = vor.u32 %v3172_v42, %v2499_v43  ;;  %v3236_v53 = vld [vmem:[#allocation5 + $0x4cc] sm:$0xf]  ;;  %v2835_v42 = vld [vmem:[#allocation5 + $0x578] sm:$0xf0] }
  0x9d   :  { %1573 = vmatpush.bf16.msra.mxu2 %v2546_v48  ;;  %v3132_v48 = vld [vmem:[#allocation5 + $0x18c] sm:$0xf] }
  0x9e   :  { %1561 = vmatpush.bf16.msra.mxu0 %v2402_v1  ;;  %1549 = vmatmul.bf16.vlgmr.msrb.gmra.mxu3 %v3562_v11  ;;  %v2179_v1 = vld [vmem:[#allocation5 + $0x58] sm:$0xf0]  ;;  %v3200_v60 = vld [vmem:[#allocation5 + $0x3ac] sm:$0xf] }
  0x9f   :  { %1580 = vmatpush.bf16.msra.mxu1 %v2770_v57  ;;  %1593 = vmatpush.bf16.msra.mxu3 %v2898_v58  ;;  %v3254_v57 = vld [vmem:[#allocation5 + $0x554] sm:$0xf0]  ;;  %v2342_v58 = vor.u32 %v3132_v48, %v2339_v49  ;;  %v3272_v49 = vld [vmem:[#allocation5 + $0x5ec] sm:$0xf] }
  0xa0   :  { %1536 = vmatmul.bf16.vlgmr.msrb.gmra.mxu1 %v3558_v5  ;;  %v2818_v63 = vor.u32 %v3254_v57, %v2817_v56  ;;  %v2755_v56 = vld [vmem:[#allocation5 + $0x4d8] sm:$0xf0]  ;;  %v3168_v57 = vld [vmem:[#allocation5 + $0x2ac] sm:$0xf] }
  0xa1   :  { %1574 = vmatpush.bf16.msra.mxu2 %v2530_v2  ;;  %1562 = vmatmul.bf16.vlgmr.msra.gmra.mxu0 %v3556_v3  ;;  %v2673_v2 = vld [vmem:[#allocation5 + $0x428] sm:$0xf]  ;;  %v3264_v14 = vld [vmem:[#allocation5 + $0x5ac] sm:$0xf] }
  0xa2   :  { %1613 = vmatpush.bf16.msrb.mxu0 %v2914_v6  ;;  %v2801_v6 = vld [vmem:[#allocation5 + $0x528] sm:$0xf]  ;;  %v3260_v27 = vld [vmem:[#allocation5 + $0x58c] sm:$0xf] }
  0xa3   :  { %1581 = vmatpush.bf16.msra.mxu1 %v2754_v10  ;;  %1594 = vmatpush.bf16.msra.mxu3 %v2882_v12  ;;  %v2182_v10 = vor.u32 %v3092_v0, %v2179_v1  ;;  %v3124_v12 = vld [vmem:[#allocation5 + $0x14c] sm:$0xf]  ;;  %v2802_v16 = vor.u32 %v3250_v7, %v2801_v6  ;;  %v2758_v0 = vor.u32 %v3236_v53, %v2755_v56  ;;  %v2739_v6 = vld [vmem:[#allocation5 + $0x4b8] sm:$0xf0]  ;;  %v3602_v56 = vld [vmem:[#allocation7] sm:$0xf] }
  0xa4   :  { %1575 = vmatmul.bf16.vlgmr.msra.gmra.mxu2 %v3560_v8  ;;  %v3164_v7 = vld [vmem:[#allocation5 + $0x28c] sm:$0xf]  ;;  %v2547_v53 = vld [vmem:[#allocation5 + $0x338] sm:$0xf0] }
  0xa5   :  { %1619 = vmatpush.bf16.msrb.mxu2 %v2262_v4  ;;  %v3218_v4 = vld [vmem:[#allocation5 + $0x434] sm:$0xf0]  ;;  %v3224_v30 = vld [vmem:[#allocation5 + $0x46c] sm:$0xf] }
  0xa6   :  { %1632 = vmatpush.bf16.msra.mxu0 %v2390_v20  ;;  %v2674_v15 = vor.u32 %v3218_v4, %v2673_v2  ;;  %v3214_v20 = vld [vmem:[#allocation5 + $0x414] sm:$0xf0]  ;;  %v3232_v2 = vld [vmem:[#allocation5 + $0x4ac] sm:$0xf]  ;;  %v2614_v4 = vor.u32 %v3200_v60, %v2611_v61  ;;  %v2675_v61 = vld [vmem:[#allocation5 + $0x438] sm:$0xf0] }
  0xa7   :  { %1582 = vmatpush.bf16.msra.mxu1 %v2738_v24  ;;  %1595 = vmatpush.bf16.msra.mxu3 %v2866_v25  ;;  %v2310_v24 = vor.u32 %v3124_v12, %v2307_v13  ;;  %v2515_v25 = vld [vmem:[#allocation5 + $0x2f8] sm:$0xf0]  ;;  %v2658_v31 = vor.u32 %v3214_v20, %v2657_v19  ;;  %v3196_v12 = vld [vmem:[#allocation5 + $0x38c] sm:$0xf] }
  0xa8   :  { %v2518_v34 = vor.u32 %v3176_v23, %v2515_v25  ;;  %v2595_v13 = vld [vmem:[#allocation5 + $0x398] sm:$0xf0]  ;;  %v3228_v19 = vld [vmem:[#allocation5 + $0x48c] sm:$0xf] }
  0xa9   :  { %1620 = vmatpush.bf16.msrb.mxu2 %v2246_v21  ;;  %v2785_v21 = vld [vmem:[#allocation5 + $0x508] sm:$0xf]  ;;  %v2598_v20 = vor.u32 %v3196_v12, %v2595_v13  ;;  %v2451_v23 = vld [vmem:[#allocation5 + $0x278] sm:$0xf0]  ;;  %v3192_v25 = vld [vmem:[#allocation5 + $0x36c] sm:$0xf] }
  0xaa   :  { %1633 = vmatpush.bf16.msra.mxu0 %v2374_v32  ;;  %v2786_v32 = vor.u32 %v3246_v22, %v2785_v21  ;;  %v2723_v21 = vld [vmem:[#allocation5 + $0x498] sm:$0xf0]  ;;  %v3160_v22 = vld [vmem:[#allocation5 + $0x26c] sm:$0xf] }
  0xab   :  { %1583 = vmatpush.bf16.msra.mxu1 %v2722_v36  ;;  %1596 = vmatpush.bf16.msra.mxu3 %v2850_v37  ;;  %v2147_v36 = vld [vmem:[#allocation5 + $0x18] sm:$0xf0]  ;;  %v3240_v37 = vld [vmem:[#allocation5 + $0x4ec] sm:$0xf]  ;;  %v2454_v29 = vor.u32 %v3160_v22, %v2451_v23 }
  0xac   :  { %v3220_v45 = vld [vmem:[#allocation5 + $0x44c] sm:$0xf]  ;;  %v2803_v13 = vld [vmem:[#allocation5 + $0x538] sm:$0xf0] }
  0xad   :  { %1621 = vmatpush.bf16.msrb.mxu2 %v2230_v33  ;;  %v3084_v33 = vld [vmem:[#allocation5 + $0xc] sm:$0xf]  ;;  %v3286_v23 = vld [vmem:[#allocation8 + $0x38] sm:$0xff] }
  0xae   :  { %1634 = vmatpush.bf16.msra.mxu0 %v2358_v46  ;;  %v3116_v46 = vld [vmem:[#allocation5 + $0x10c] sm:$0xf]  ;;  %v2150_v48 = vor.u32 %v3084_v33, %v2147_v36  ;;  %v2707_v33 = vld [vmem:[#allocation5 + $0x478] sm:$0xf0] }
  0xaf   :  { %1584 = vmatpush.bf16.msra.mxu1 %v2706_v50  ;;  %1597 = vmatpush.bf16.msra.mxu3 %v2834_v51  ;;  %v2899_v50 = vld [vmem:[#allocation5 + $0x5f8] sm:$0xf0]  ;;  %v2774_v51 = vor.u32 %v3240_v37, %v2771_v38  ;;  %v3188_v37 = vld [vmem:[#allocation5 + $0x34c] sm:$0xf]  ;;  %v2710_v43 = vor.u32 %v3224_v30, %v2707_v33  ;;  %v3285_v30 = vld [vmem:[#allocation8 + $0x30] sm:$0xff] }
  0xb0   :  { %v2563_v38 = vld [vmem:[#allocation5 + $0x358] sm:$0xf0]  ;;  %v3216_v60 = vld [vmem:[#allocation5 + $0x42c] sm:$0xf] }
  0xb1   :  { %1622 = vmatpush.bf16.msrb.mxu2 %v2214_v47  ;;  %2921 = vmatmul.msk.bf16.vlgmr.msrb.gmra.mxu0 %vm1342_vm0, %v3568_v18  ;;  %v2275_v47 = vld [vmem:[#allocation5 + $0x118] sm:$0xf0]  ;;  %v3248_v12 = vld [vmem:[#allocation5 + $0x52c] sm:$0xf] }
  0xb2   :  { %1635 = vmatpush.bf16.msra.mxu0 %v2342_v58  ;;  %v2278_v55 = vor.u32 %v3116_v46, %v2275_v47  ;;  %v2483_v58 = vld [vmem:[#allocation5 + $0x2b8] sm:$0xf0]  ;;  %v2566_v47 = vor.u32 %v3188_v37, %v2563_v38 }
  0xb3   :  { %1585 = vmatpush.bf16.msra.mxu1 %v2690_v62  ;;  %1598 = vmatpush.bf16.msra.mxu3 %v2818_v63  ;;  %v3268_v62 = vld [vmem:[#allocation5 + $0x5cc] sm:$0xf]  ;;  %v2883_v63 = vld [vmem:[#allocation5 + $0x5d8] sm:$0xf0]  ;;  %v2486_v1 = vor.u32 %v3168_v57, %v2483_v58 }
  0xb5   :  { %1623 = vmatpush.bf16.msrb.mxu2 %v2198_v59  ;;  %v2902_v59 = vor.u32 %v3272_v49, %v2899_v50  ;;  %v3152_v49 = vld [vmem:[#allocation5 + $0x22c] sm:$0xf]  ;;  %v2419_v50 = vld [vmem:[#allocation5 + $0x238] sm:$0xf0] }
  0xb6   :  { %1636 = vmatpush.bf16.msra.mxu0 %v2326_v9  ;;  %v2467_v9 = vld [vmem:[#allocation5 + $0x298] sm:$0xf0] }
  0xb7   :  { %1586 = vmatpush.bf16.msra.mxu1 %v2674_v15  ;;  %1599 = vmatpush.bf16.msra.mxu3 %v2802_v16  ;;  %v2867_v15 = vld [vmem:[#allocation5 + $0x5b8] sm:$0xf0]  ;;  %v2742_v16 = vor.u32 %v3232_v2, %v2739_v6  ;;  %v2470_v17 = vor.u32 %v3164_v7, %v2467_v9  ;;  %v3276_v7 = vld [vmem:[#allocation5 + $0x60c] sm:$0xf] }
  0xb8   :  { %v2531_v6 = vld [vmem:[#allocation5 + $0x318] sm:$0xf0] }
  0xb9   :  { %1624 = vmatpush.bf16.msrb.mxu2 %v2182_v10  ;;  %v2886_v10 = vor.u32 %v3268_v62, %v2883_v63  ;;  %v3148_v63 = vld [vmem:[#allocation5 + $0x20c] sm:$0xf]  ;;  %v2915_v9 = vld [vmem:[#allocation5 + $0x618] sm:$0xf0] }
  0xba   :  { %1637 = vmatpush.bf16.msra.mxu0 %v2310_v24  ;;  %v2870_v24 = vor.u32 %v3264_v14, %v2867_v15  ;;  %v2678_v14 = vor.u32 %v3216_v60, %v2675_v61  ;;  %v2918_v22 = vor.u32 %v3276_v7, %v2915_v9 }
  0xbb   :  { %1587 = vmatpush.bf16.msra.mxu1 %v2658_v31  ;;  %1600 = vmatpush.bf16.msra.mxu3 %v2786_v32  ;;  %v2582_v31 = vor.u32 %v3192_v25, %v2579_v26  ;;  %v3244_v25 = vld [vmem:[#allocation5 + $0x50c] sm:$0xf]  ;;  %v2787_v26 = vld [vmem:[#allocation5 + $0x518] sm:$0xf0] }
  0xbd   :  { %1625 = vmatpush.bf16.msrb.mxu2 %v2166_v28  ;;  %v2726_v28 = vor.u32 %v3228_v19, %v2723_v21  ;;  %v2659_v21 = vld [vmem:[#allocation5 + $0x418] sm:$0xf0] }
  0xbe   :  { %1638 = vmatpush.bf16.msra.mxu0 %v2294_v39  ;;  %1588 = vmatmul.bf16.vlgmr.msra.gmra.mxu1 %v3572_v40  ;;  %v3256_v39 = vld [vmem:[#allocation5 + $0x56c] sm:$0xf] }
  0xbf   :  { %1645 = vmatpush.bf16.msrb.mxu1 %v2518_v34  ;;  %1658 = vmatpush.bf16.msrb.mxu3 %v2646_v35  ;;  %v3156_v34 = vld [vmem:[#allocation5 + $0x24c] sm:$0xf]  ;;  %v2435_v35 = vld [vmem:[#allocation5 + $0x258] sm:$0xf0] }
  0xc0   :  { %1601 = vmatmul.bf16.vlgmr.msra.gmra.mxu3 %v3574_v41  ;;  %v2438_v44 = vor.u32 %v3156_v34, %v2435_v35  ;;  %v3293_v34 = vld [vmem:[#allocation8 + $0x70] sm:$0xff]  ;;  %v3284_v35 = vld [vmem:[#allocation8 + $0x28] sm:$0xff] }
  0xc1   :  { %1626 = vmatpush.bf16.msrb.mxu2 %v2150_v48  ;;  %v3596_v32 = vpop.f32.mrf.mxu0  ;;  %v2691_v48 = vld [vmem:[#allocation5 + $0x458] sm:$0xf0] }
  0xc2   :  { %1639 = vmatpush.bf16.msra.mxu0 %v2278_v55  ;;  %v2819_v55 = vld [vmem:[#allocation5 + $0x558] sm:$0xf0]  ;;  %v2694_v58 = vor.u32 %v3220_v45, %v2691_v48 }
  0xc3   :  { %1646 = vmatpush.bf16.msrb.mxu1 %v2502_v52  ;;  %1659 = vmatpush.bf16.msrb.mxu3 %v2630_v54  ;;  %v3598_v36 = vpop.f32.mrf.mxu1  ;;  %v3184_v52 = vld [vmem:[#allocation5 + $0x32c] sm:$0xf] }
  0xc4   :  { %1627 = vmatmul.bf16.vlgmr.msrb.gmra.mxu2 %v3558_v5  ;;  %v2851_v5 = vld [vmem:[#allocation5 + $0x598] sm:$0xf0]  ;;  %v3252_v54 = vld [vmem:[#allocation5 + $0x54c] sm:$0xf]  ;;  %v2550_v62 = vor.u32 %v3184_v52, %v2547_v53  ;;  %v3279_v53 = vld [vmem:[#allocation8] sm:$0xff] }
  0xc5   :  { %1671 = vmatpush.bf16.msra.mxu2 %v2774_v51  ;;  %1640 = vmatmul.bf16.vlgmr.msra.gmra.mxu0 %v3562_v11  ;;  %v2854_v11 = vor.u32 %v3260_v27, %v2851_v5  ;;  %v2838_v51 = vor.u32 %v3256_v39, %v2835_v42  ;;  %v3291_v39 = vld [vmem:[#allocation8 + $0x60] sm:$0xff]  ;;  %v3282_v42 = vld [vmem:[#allocation8 + $0x18] sm:$0xff]  ;;  %v3288_v52 = vld [vmem:[#allocation8 + $0x48] sm:$0xff] }
  0xc6   :  { %1684 = vmatpush.bf16.msrb.mxu0 %v2902_v59  ;;  %v2422_v59 = vor.u32 %v3152_v49, %v2419_v50  ;;  %v3289_v49 = vld [vmem:[#allocation8 + $0x50] sm:$0xff]  ;;  %v3280_v50 = vld [vmem:[#allocation8 + $0x8] sm:$0xff] }
  0xc7   :  { %1647 = vmatpush.bf16.msrb.mxu1 %v2486_v1  ;;  %1660 = vmatpush.bf16.msrb.mxu3 %v2614_v4  ;;  %v3600_v46 = vpop.f32.mrf.mxu2  ;;  %v3180_v1 = vld [vmem:[#allocation5 + $0x30c] sm:$0xf]  ;;  %v2822_v4 = vor.u32 %v3252_v54, %v2819_v55 }
  0xc8   :  { %v3604_v57 = vpop.f32.mrf.mxu3  ;;  %v2534_v19 = vor.u32 %v3180_v1, %v2531_v6  ;;  %v3302_v6 = vld [vmem:[#allocation8 + $0xb8] sm:$0xff] }
  0xc9   :  { %1672 = vmatpush.bf16.msra.mxu2 %v2758_v0  ;;  %v2403_v0 = vld [vmem:[#allocation5 + $0x218] sm:$0xf0]  ;;  %v1357_v2 = vpop.f32.mrf.mxu0 }
  0xca   :  { %1685 = vmatpush.bf16.msrb.mxu0 %v2886_v10  ;;  %v2406_v15 = vor.u32 %v3148_v63, %v2403_v0 }
  0xcb   :  { %1648 = vmatpush.bf16.msrb.mxu1 %v2470_v17  ;;  %1661 = vmatpush.bf16.msrb.mxu3 %v2598_v20  ;;  %v1370_v10 = vpop.f32.mrf.mxu1  ;;  %v3212_v20 = vld [vmem:[#allocation5 + $0x40c] sm:$0xf] }
  0xcc   :  { %v2662_v27 = vor.u32 %v3212_v20, %v2659_v21 }
  0xcd   :  { %1673 = vmatpush.bf16.msra.mxu2 %v2742_v16  ;;  %v354_v16 = vperm.slane %v3602_v56, 0 }
  0xce   :  { %1686 = vmatpush.bf16.msrb.mxu0 %v2870_v24  ;;  %v2806_v24 = vor.u32 %v3248_v12, %v2803_v13  ;;  %v3301_v12 = vld [vmem:[#allocation8 + $0xb0] sm:$0xff] }
  0xcf   :  { %1649 = vmatpush.bf16.msrb.mxu1 %v2454_v29  ;;  %1662 = vmatpush.bf16.msrb.mxu3 %v2582_v31  ;;  %v1383_v17 = vpop.f32.mrf.mxu2  ;;  %v3294_v29 = vld [vmem:[#allocation8 + $0x78] sm:$0xff]  ;;  %v2790_v31 = vor.u32 %v3244_v25, %v2787_v26  ;;  %v3297_v26 = vld [vmem:[#allocation8 + $0x90] sm:$0xff] }
  0xd0   :  { %v1396_v5 = vpop.f32.mrf.mxu3  ;;  %v3298_v25 = vld [vmem:[#allocation8 + $0x98] sm:$0xff] }
  0xd1   :  { %1674 = vmatpush.bf16.msra.mxu2 %v2726_v28  ;;  %v1356_v28 = vadd.f32 %v3596_v32, %v354_v16 }
  0xd2   :  { %1687 = vmatpush.bf16.msrb.mxu0 %v2854_v11  ;;  %v3292_v11 = vld [vmem:[#allocation8 + $0x68] sm:$0xff] }
  0xd3   :  { %1650 = vmatpush.bf16.msrb.mxu1 %v2438_v44  ;;  %1663 = vmatpush.bf16.msrb.mxu3 %v2566_v47  ;;  %v1369_v33 = vadd.f32 %v3598_v36, %v1356_v28  ;;  %v3281_v44 = vld [vmem:[#allocation8 + $0x10] sm:$0xff]  ;;  %v3296_v28 = vld [vmem:[#allocation8 + $0x88] sm:$0xff] }
  0xd5   :  { %1675 = vmatpush.bf16.msra.mxu2 %v2710_v43  ;;  %v1382_v32 = vadd.f32 %v3600_v46, %v1369_v33 }
  0xd6   :  { %1688 = vmatpush.bf16.msrb.mxu0 %v2838_v51 }
  0xd7   :  { %1651 = vmatpush.bf16.msrb.mxu1 %v2422_v59  ;;  %1664 = vmatpush.bf16.msrb.mxu3 %v2550_v62  ;;  %v1433_v38 = vpop.f32.mrf.mxu2  ;;  %v1395_v36 = vadd.f32 %v3604_v57, %v1382_v32  ;;  %v3309_v32 = vld [vmem:[#allocation8 + $0xf0] sm:$0xff] }
  0xd9   :  { %1676 = vmatpush.bf16.msra.mxu2 %v2694_v58  ;;  %v3287_v58 = vld [vmem:[#allocation8 + $0x40] sm:$0xff] }
  0xda   :  { %1689 = vmatpush.bf16.msrb.mxu0 %v2822_v4  ;;  %v1407_v37 = vpop.f32.mrf.mxu0 }
  0xdb   :  { %1652 = vmatpush.bf16.msrb.mxu1 %v2406_v15  ;;  %1665 = vmatpush.bf16.msrb.mxu3 %v2534_v19  ;;  %v1408_v43 = vadd.f32 %v1407_v37, %v1395_v36  ;;  %v3300_v15 = vld [vmem:[#allocation8 + $0xa8] sm:$0xff] }
  0xdd   :  { %1677 = vmatpush.bf16.msra.mxu2 %v2678_v14 }
  0xde   :  { %1690 = vmatpush.bf16.msrb.mxu0 %v2806_v24  ;;  %1653 = vmatmul.bf16.vlgmr.msrb.gmra.mxu1 %v3556_v3  ;;  %v3283_v3 = vld [vmem:[#allocation8 + $0x20] sm:$0xff] }
  0xdf   :  { %1704 = vmatpush.bf16.msra.mxu1 %v2918_v22  ;;  %1978 = vmatpush.bf16.msra.mxu3 %v3286_v23  ;;  %v1435_v48 = vpop.f32.mrf.mxu2  ;;  %v3299_v22 = vld [vmem:[#allocation8 + $0xa0] sm:$0xff] }
  0xe0   :  { %1666 = vmatmul.bf16.vlgmr.msrb.gmra.mxu3 %v3560_v8  ;;  %v1420_v8 = vpop.f32.mrf.mxu1 }
  0xe1   :  { %1678 = vmatpush.bf16.msra.mxu2 %v2662_v27 }
  0xe2   :  { %1691 = vmatpush.bf16.msrb.mxu0 %v2790_v31  ;;  %v1409_v46 = vpop.f32.mrf.mxu0 }
  0xe3   :  { %1991 = vmatpush.bf16.msrb.mxu1 %v3294_v29  ;;  %1979 = vmatpush.bf16.msra.mxu3 %v3285_v30  ;;  %v1446_v45 = vpop.f32.mrf.mxu3  ;;  %v3295_v29 = vld [vmem:[#allocation8 + $0x80] sm:$0xff] }
  0xe4   :  { %1679 = vmatmul.bf16.vlgmr.msra.gmra.mxu2 %v3572_v40  ;;  %v3290_v40 = vld [vmem:[#allocation8 + $0x58] sm:$0xff] }
  0xe5   :  { %1692 = vmatmul.bf16.vlgmr.msrb.gmra.mxu0 %v3574_v41  ;;  %v1421_v41 = vadd.f32 %v1420_v8, %v1408_v43  ;;  %2004 = vmatpush.bf16.msrb.mxu2 %v3302_v6  ;;  %v3307_v43 = vld [vmem:[#allocation8 + $0xe0] sm:$0xff] }
  0xe7   :  { %1992 = vmatpush.bf16.msrb.mxu1 %v3293_v34  ;;  %1980 = vmatpush.bf16.msra.mxu3 %v3284_v35  ;;  %v1434_v51 = vadd.f32 %v1433_v38, %v1421_v41  ;;  %v1459_v57 = vpop.f32.mrf.mxu2  ;;  %v3310_v34 = vld [vmem:[#allocation8 + $0xf8] sm:$0xff] }
  0xe8   :  { %v1422_v47 = vpop.f32.mrf.mxu1  ;;  %2017 = vmatpush.bf16.msra.mxu0 %v3310_v34  ;;  %v3306_v41 = vld [vmem:[#allocation8 + $0xd8] sm:$0xff]  ;;  %v3312_v34 = vld [vmem:[#allocation10 + $0x8] sm:$0xff] }
  0xe9   :  { %v1710_v55 = vmax.f32 %v1434_v51, 0.0  ;;  %2005 = vmatpush.bf16.msrb.mxu2 %v3301_v12  ;;  %v3305_v51 = vld [vmem:[#allocation8 + $0xd0] sm:$0xff] }
  0xeb   :  { %1993 = vmatpush.bf16.msrb.mxu1 %v3292_v11  ;;  %1981 = vmatpush.bf16.msra.mxu3 %v3283_v3  ;;  %v1448_v54 = vpop.f32.mrf.mxu3  ;;  %v1714_v59 = vpack.c.bf16 %v1710_v55, %v1710_v55  ;;  %v356_v11 = vperm.slane %v3602_v56, 2  ;;  %v3304_v55 = vld [vmem:[#allocation8 + $0xc8] sm:$0xff] }
  0xec   :  { %2018 = vmatpush.bf16.msra.mxu0 %v3309_v32  ;;  %v3311_v32 = vld [vmem:[#allocation10] sm:$0xff] }
  0xed   :  { %2006 = vmatpush.bf16.msrb.mxu2 %v3300_v15 }
  0xee   :  { %2922 = vmatmul.msk.bf16.vlgmr.msra.gmra.mxu1 %vm1342_vm0, %v3568_v18  ;;  %v355_v18 = vperm.slane %v3602_v56, 1 }
  0xef   :  { %1994 = vmatpush.bf16.msrb.mxu1 %v3291_v39  ;;  %1982 = vmatpush.bf16.msra.mxu3 %v3282_v42  ;;  %v1461_v61 = vpop.f32.mrf.mxu2  ;;  %v3308_v39 = vld [vmem:[#allocation8 + $0xe8] sm:$0xff] }
  0xf0   :  { %v1447_v60 = vadd.f32 %v1446_v45, %v355_v18  ;;  %2019 = vmatpush.bf16.msra.mxu0 %v3308_v39  ;;  %v3303_v18 = vld [vmem:[#allocation8 + $0xc0] sm:$0xff]  ;;  %v357_v61 = vperm.slane %v3602_v56, 3 }
  0xf1   :  { %2007 = vmatpush.bf16.msrb.mxu2 %v3299_v22 }
  0xf2   :  { %v1460_v62 = vadd.f32 %v1459_v57, %v1447_v60 }
  0xf3   :  { %1995 = vmatpush.bf16.msrb.mxu1 %v3290_v40  ;;  %1983 = vmatpush.bf16.msra.mxu3 %v3281_v44 }
  0xf4   :  { %2020 = vmatpush.bf16.msra.mxu0 %v3307_v43 }
  0xf5   :  { %2008 = vmatpush.bf16.msrb.mxu2 %v3298_v25 }
  0xf7   :  { %1996 = vmatpush.bf16.msrb.mxu1 %v3289_v49  ;;  %1984 = vmatpush.bf16.msra.mxu3 %v3280_v50 }
  0xf8   :  { %2021 = vmatpush.bf16.msra.mxu0 %v3306_v41 }
  0xf9   :  { %2009 = vmatpush.bf16.msrb.mxu2 %v3297_v26 }
  0xfa   :  { %v1472_v63 = vpop.f32.mrf.mxu0 }
  0xfb   :  { %1997 = vmatpush.bf16.msrb.mxu1 %v3288_v52  ;;  %1985 = vmatpush.bf16.msra.mxu3 %v3279_v53  ;;  %v1473_v0 = vadd.f32 %v1472_v63, %v1460_v62 }
  0xfc   :  { %2022 = vmatpush.bf16.msra.mxu0 %v3305_v51 }
  0xfd   :  { %v1485_v1 = vpop.f32.mrf.mxu1  ;;  %2010 = vmatpush.bf16.msrb.mxu2 %v3296_v28  ;;  %v3317_v28 = vld [vmem:[#allocation10 + $0x30] sm:$0xff] }
  0xfe   :  { %1986 = vmatmul.bf16.vlgmr.msra.gmra.mxu3 %v1714_v59  ;;  %v1486_v2 = vadd.f32 %v1485_v1, %v1473_v0 }
  0xff   :  { %1998 = vmatpush.bf16.msrb.mxu1 %v3287_v58 }
 0x100   :  { %2023 = vmatpush.bf16.msra.mxu0 %v3304_v55 }
 0x101   :  { %v1498_v7 = vpop.f32.mrf.mxu3  ;;  %2011 = vmatpush.bf16.msrb.mxu2 %v3295_v29  ;;  %v3316_v29 = vld [vmem:[#allocation10 + $0x28] sm:$0xff] }
 0x102   :  { %v1474_v4 = vpop.f32.mrf.mxu0  ;;  %v1499_v10 = vadd.f32 %v1498_v7, %v1486_v2 }
 0x104   :  { %2024 = vmatpush.bf16.msra.mxu0 %v3303_v18 }
 0x105   :  { %v1487_v14 = vpop.f32.mrf.mxu1 }
 0x107   :  { %v1511_v9 = vpop.f32.mrf.mxu2 }
 0x108   :  { %v1512_v13 = vadd.f32 %v1511_v9, %v1499_v10 }
 0x109   :  { %v1500_v19 = vpop.f32.mrf.mxu3 }
 0x10a   :  { %v1524_v16 = vpop.f32.mrf.mxu0 }
 0x10b   :  { %v1525_v17 = vadd.f32 %v1524_v16, %v1512_v13 }
 0x10d   :  { %v1711_v21 = vmax.f32 %v1525_v17, 0.0 }
 0x10f   :  { %v1513_v20 = vpop.f32.mrf.mxu2  ;;  %v1715_v23 = vpack.c.bf16 %v1711_v21, %v1711_v21 }
 0x111   :  { %1999 = vmatmul.bf16.vlgmr.msrb.gmra.mxu1 %v1715_v23  ;;  %v3333_v23 = vld [vmem:[%s3633_s4] ss:$0 sm:$0xff] }
 0x112   :  { %v1526_v24 = vpop.f32.mrf.mxu0 }
 0x11d   :  { %v1537_v5 = vpop.f32.mrf.mxu1 }
 0x11e   :  { %v1563_v27 = vpop.f32.mrf.mxu0  ;;  %v1538_v8 = vadd.f32 %v1537_v5, %v356_v11  ;;  %v3318_v5 = vld [vmem:[#allocation10 + $0x38] sm:$0xff] }
 0x11f   :  { %2100 = vmatpush.bf16.msrb.mxu3 %v3318_v5 }
 0x121   :  { %v1550_v30 = vpop.f32.mrf.mxu3 }
 0x122   :  { %v1551_v36 = vadd.f32 %v1550_v30, %v1538_v8  ;;  %v3315_v30 = vld [vmem:[#allocation10 + $0x20] sm:$0xff] }
 0x123   :  { %2101 = vmatpush.bf16.msrb.mxu3 %v3317_v28 }
 0x124   :  { %v1564_v40 = vadd.f32 %v1563_v27, %v1551_v36 }
 0x125   :  { %v1539_v33 = vpop.f32.mrf.mxu1 }
 0x126   :  { %v1565_v31 = vpop.f32.mrf.mxu0  ;;  %v3313_v33 = vld [vmem:[#allocation10 + $0x10] sm:$0xff] }
 0x127   :  { %v1576_v35 = vpop.f32.mrf.mxu2  ;;  %2102 = vmatpush.bf16.msrb.mxu3 %v3316_v29  ;;  %v3314_v31 = vld [vmem:[#allocation10 + $0x18] sm:$0xff] }
 0x128   :  { %v1577_v45 = vadd.f32 %v1576_v35, %v1564_v40 }
 0x129   :  { %v1552_v3 = vpop.f32.mrf.mxu3 }
 0x12b   :  { %2103 = vmatpush.bf16.msrb.mxu3 %v3315_v30 }
 0x12e   :  { %v1615_v37 = vpop.f32.mrf.mxu0 }
 0x12f   :  { %v1578_v38 = vpop.f32.mrf.mxu2  ;;  %2104 = vmatpush.bf16.msrb.mxu3 %v3314_v31 }
 0x133   :  { %2105 = vmatpush.bf16.msrb.mxu3 %v3313_v33 }
 0x136   :  { %v1617_v42 = vpop.f32.mrf.mxu0 }
 0x137   :  { %2106 = vmatpush.bf16.msrb.mxu3 %v3312_v34  ;;  %v3334_v42 = vld [vmem:[%s3635_s6] ss:$0 sm:$0xff] }
 0x13b   :  { %v1589_v44 = vpop.f32.mrf.mxu1  ;;  %2107 = vmatpush.bf16.msrb.mxu3 %v3311_v32 }
 0x13c   :  { %v1590_v46 = vadd.f32 %v1589_v44, %v1577_v45 }
 0x142   :  { %v1641_v49 = vpop.f32.mrf.mxu0 }
 0x143   :  { %v1602_v47 = vpop.f32.mrf.mxu3  ;;  %v1591_v50 = vpop.f32.mrf.mxu1 }
 0x144   :  { %v1603_v48 = vadd.f32 %v1602_v47, %v1590_v46 }
 0x146   :  { %v1616_v52 = vadd.f32 %v1615_v37, %v1603_v48 }
 0x147   :  { %v1628_v53 = vpop.f32.mrf.mxu2 }
 0x148   :  { %v1712_v54 = vmax.f32 %v1616_v52, 0.0  ;;  %v1629_v62 = vadd.f32 %v1628_v53, %v357_v61 }
 0x14a   :  { %v1716_v57 = vpack.c.bf16 %v1712_v54, %v1712_v54  ;;  %v1643_v59 = vpop.f32.mrf.mxu0  ;;  %v1642_v0 = vadd.f32 %v1641_v49, %v1629_v62 }
 0x14b   :  { %v1604_v58 = vpop.f32.mrf.mxu3 }
 0x14c   :  { %2012 = vmatmul.bf16.vlgmr.msrb.gmra.mxu2 %v1716_v57 }
 0x14f   :  { %v1630_v60 = vpop.f32.mrf.mxu2 }
 0x15b   :  { %v1654_v63 = vpop.f32.mrf.mxu1 }
 0x15c   :  { %v1655_v1 = vadd.f32 %v1654_v63, %v1642_v0 }
 0x162   :  { %v1693_v2 = vpop.f32.mrf.mxu0 }
 0x163   :  { %v1667_v4 = vpop.f32.mrf.mxu3  ;;  %v1656_v7 = vpop.f32.mrf.mxu1 }
 0x164   :  { %v1668_v6 = vadd.f32 %v1667_v4, %v1655_v1 }
 0x167   :  { %v1680_v9 = vpop.f32.mrf.mxu2 }
 0x168   :  { %v1681_v10 = vadd.f32 %v1680_v9, %v1668_v6 }
 0x16a   :  { %v1695_v12 = vpop.f32.mrf.mxu0  ;;  %v1694_v14 = vadd.f32 %v1693_v2, %v1681_v10 }
 0x16b   :  { %v1669_v13 = vpop.f32.mrf.mxu3  ;;  %v1706_v15 = vpop.f32.mrf.mxu1 }
 0x16c   :  { %v1707_v16 = vadd.f32 %v1706_v15, %v1694_v14 }
 0x16e   :  { %v1713_v19 = vmax.f32 %v1707_v16, 0.0 }
 0x16f   :  { %v1682_v17 = vpop.f32.mrf.mxu2 }
 0x170   :  { %v1717_v20 = vpack.c.bf16 %v1713_v19, %v1713_v19 }
 0x172   :  { %2025 = vmatmul.bf16.vlgmr.msra.gmra.mxu0 %v1717_v20 }
 0x173   :  { %v1708_v56 = vpop.f32.mrf.mxu1 }
 0x181   :  { %v1987_v21 = vpop.f32.mrf.mxu3 }
 0x182   :  { %v1988_v24 = vadd.f32 %v3333_v23, %v1987_v21 }
 0x189   :  { %v1989_v22 = vpop.f32.mrf.mxu3 }
 0x18e   :  { %v2000_v25 = vpop.f32.mrf.mxu1 }
 0x18f   :  { %v2001_v26 = vadd.f32 %v2000_v25, %v1988_v24 }
 0x196   :  { %v2002_v27 = vpop.f32.mrf.mxu1 }
 0x1cf   :  { %v2013_v35 = vpop.f32.mrf.mxu2 }
 0x1d0   :  { %v2014_v3 = vadd.f32 %v2013_v35, %v2001_v26 }
 0x1d7   :  { %v2015_v11 = vpop.f32.mrf.mxu2 }
 0x1ef   :  { %v2026_v37 = vpop.f32.mrf.mxu0 }
 0x1f0   :  { %v2027_v8 = vadd.f32 %v2026_v37, %v2014_v3 }
 0x1f2   :  { %v2030_v38 = vmax.f32 %v2027_v8, 0.0 }
 0x1f4   :  { %v2031_v36 = vpack.c.bf16 %v2030_v38, %v2030_v38 }
 0x1f6   :  { %2108 = vmatmul.bf16.vlgmr.msrb.gmra.mxu3 %v2031_v36 }
 0x1f7   :  { %v2028_v39 = vpop.f32.mrf.mxu0 }
 0x279   :  { %v2109_v43 = vpop.f32.mrf.mxu3 }
 0x27a   :  { %v2110_v40 = vadd.f32 %v3334_v42, %v2109_v43 }
 0x27c   :  { %2113 = vst [vmem:[#allocation11] sm:$0xff] %v2110_v40 }
 0x281   :  { %v2111_v44 = vpop.f32.mrf.mxu3 }
 0x282   :  { %2117 = vsyncadd [#allocation4], 96  ;;  %s2120_s9 = sshll.u32 %s3636_s7, 4  ;;  %s3498_s10 = smov [#allocation11]   ;;  %s2121_s9 = int_to_ptr.hbm [resolvable:$true] %s2120_s9 }
 0x283   :  { %s2118_s11 = sshll.u32 %s3498_s10, 4  ;;  %s3499_s12 = smov 32   ;;  %s2119_s11 = int_to_ptr.vmem [resolvable:$true] %s2118_s11 }
 0x284   :  { %s3500_s13 = smov 2  }
 0x285   :  { %2126 = dma.vmem_to_hbm [thread:$0]  %s2119_s11, 32, %s2121_s9, [#allocation4], %s3499_s12, %s3499_s12, %s3500_s13  }
 0x286   :  { %3485 = dma.done.wait [#allocation4], 128  }
 0x287   :  { %3486 = vsyncadd [#allocation4], 4294967168 }
 0x288   :  { %2131 = vsyncpa [#allocation3], 1 }
 0x289   :  { %2132 = vsyncpa [#allocation6], 1 }
 0x28a   :  { %2133 = vsyncpa [#allocation9], 1 }
 0x28b   :  { %2134 = vsyncpa [#allocation4], 1 }

// kernel: tpu_custom_call.1
= control target key start
LH: loop header
LB: loop body
LE: loop exit
PB: predicated region body
PF: predicated region fallthrough
CT: control target
= control target key end

     0   :  { %12 = vsyncpa [#allocation3], 0  ;;  %s3629_s0 = inlined_call_operand.hbm [shape: f32[2,784], index: 0, kind: input, shape index: {}]   ;;  %s3630_s1 = inlined_call_operand.hbm [shape: bf16[784,512], index: 1, kind: input, shape index: {}]   ;;  %s3631_s2 = inlined_call_operand.hbm [shape: f32[1,512], index: 2, kind: input, shape index: {}]   ;;  %s3632_s3 = inlined_call_operand.hbm [shape: bf16[512,128], index: 3, kind: input, shape index: {}]   ;;  %s3633_s4 = inlined_call_operand.vmem [shape: f32[1,128], index: 4, kind: input, shape index: {}]   ;;  %s3634_s5 = inlined_call_operand.hbm [shape: bf16[128,128], index: 5, kind: input, shape index: {}]   ;;  %s3635_s6 = inlined_call_operand.vmem [shape: f32[1,128], index: 6, kind: input, shape index: {}]   ;;  %s3636_s7 = inlined_call_operand.hbm [shape: f32[2,128], index: 7, kind: output, shape index: {}]  }
   0x1   :  { %13 = vsyncpa [#allocation6], 0 }
   0x2   :  { %14 = vsyncpa [#allocation9], 0 }
   0x3   :  { %15 = vsyncpa [#allocation4], 0  ;;  %s33_s26 = sshll.u32 %s3630_s1, 4  ;;  %s34_s26 = int_to_ptr.hbm [resolvable:$true] %s33_s26 }
   0x4   :  { %19 = vsyncadd [#allocation3], 672  ;;  %s3487_s27 = smov [#allocation5]   ;;  %s57_s8 = sshll.u32 %s3632_s3, 4  ;;  %s58_s8 = int_to_ptr.hbm [resolvable:$true] %s57_s8 }
   0x5   :  { %s35_s28 = sshll.u32 %s3487_s27, 4  ;;  %s3488_s9 = smov 256   ;;  %s36_s28 = int_to_ptr.vmem [resolvable:$true] %s35_s28 }
   0x6   :  { %s3489_s10 = smov 16   ;;  %s3490_s11 = smov [#allocation8]  }
   0x7   :  { %41 = dma.hbm_to_vmem [thread:$0]  %s34_s26, 25088, %s36_s28, [#allocation6], %s3488_s9, %s3488_s9, %s3489_s10  }
   0x8   :  { %s59_s12 = sshll.u32 %s3490_s11, 4  ;;  %s3491_s13 = smov 64   ;;  %s60_s12 = int_to_ptr.vmem [resolvable:$true] %s59_s12 }
   0x9   :  { %s3492_s14 = smov 4   ;;  %s20_s16 = sshll.u32 %s3629_s0, 4  ;;  %s21_s16 = int_to_ptr.hbm [resolvable:$true] %s20_s16 }
   0xa   :  { %65 = dma.hbm_to_vmem [thread:$0]  %s58_s8, 4096, %s60_s12, [#allocation9], %s3491_s13, %s3491_s13, %s3492_s14  }
   0xb   :  { %s3493_s17 = smov [#allocation2]   ;;  %s47_s20 = sshll.u32 %s3631_s2, 4  ;;  %s48_s20 = int_to_ptr.hbm [resolvable:$true] %s47_s20 }
   0xc   :  { %s22_s18 = sshll.u32 %s3493_s17, 4  ;;  %s3494_s21 = smov 224   ;;  %s23_s18 = int_to_ptr.vmem [resolvable:$true] %s22_s18 }
   0xd   :  { %s3495_s22 = smov 14   ;;  %s3496_s23 = smov [#allocation7]  }
   0xe   :  { %28 = dma.hbm_to_vmem [thread:$0]  %s21_s16, 224, %s23_s18, [#allocation3], %s3494_s21, %s3494_s21, %s3495_s22  }
   0xf   :  { %s49_s24 = sshll.u32 %s3496_s23, 4  ;;  %s72_s27 = sshll.u32 %s3634_s5, 4  ;;  %s50_s24 = int_to_ptr.vmem [resolvable:$true] %s49_s24  ;;  %s73_s27 = int_to_ptr.hbm [resolvable:$true] %s72_s27 }
  0x10   :  { %52 = dma.hbm_to_vmem [thread:$0]  %s48_s20, 64, %s50_s24, [#allocation6]  }
  0x11   :  { %s3497_s0 = smov [#allocation10]  }
  0x12   :  { %s74_s28 = sshll.u32 %s3497_s0, 4  ;;  %s75_s28 = int_to_ptr.vmem [resolvable:$true] %s74_s28 }
  0x13   :  { %80 = dma.hbm_to_vmem [thread:$0]  %s73_s27, 1024, %s75_s28, [#allocation9], %s3491_s13, %s3491_s13, %s3492_s14  }
  0x14   :  { %3479 = dma.done.wait [#allocation3], 896  }
  0x15   :  { %3480 = vsyncadd [#allocation3], 4294966400 }
  0x16   :  { %3481 = dma.done.wait [#allocation6], 25152  }
  0x17   :  { %3482 = vsyncadd [#allocation6], 4294942144 }
  0x18   :  { %3483 = dma.done.wait [#allocation9], 5120  }
  0x19   :  { %3484 = vsyncadd [#allocation9], 4294962176  ;;  %v2249_v0 = vld [vmem:[#allocation5 + $0xe0] sm:$0xf]  ;;  %v3113_v1 = vld [vmem:[#allocation5 + $0xec] sm:$0xf0] }
  0x1a   :  { %v2377_v2 = vld [vmem:[#allocation5 + $0x1e0] sm:$0xf]  ;;  %v2250_v3 = vor.u32 %v3113_v1, %v2249_v0  ;;  %v3145_v4 = vld [vmem:[#allocation5 + $0x1ec] sm:$0xf0]  ;;  %vm1342_vm0 = vcmask 130048  }
  0x1b   :  { %v2505_v5 = vld [vmem:[#allocation5 + $0x2e0] sm:$0xf]  ;;  %v3177_v6 = vld [vmem:[#allocation5 + $0x2ec] sm:$0xf0]  ;;  %v2378_v7 = vor.u32 %v3145_v4, %v2377_v2 }
  0x1c   :  { %v2506_v8 = vor.u32 %v3177_v6, %v2505_v5  ;;  %v2633_v9 = vld [vmem:[#allocation5 + $0x3e0] sm:$0xf]  ;;  %v3209_v10 = vld [vmem:[#allocation5 + $0x3ec] sm:$0xf0]  ;;  %1346 = vmatpush.bf16.msra.mxu0 %v2250_v3 }
  0x1d   :  { %v2233_v11 = vld [vmem:[#allocation5 + $0xc0] sm:$0xf]  ;;  %v2634_v12 = vor.u32 %v3209_v10, %v2633_v9  ;;  %v3109_v13 = vld [vmem:[#allocation5 + $0xcc] sm:$0xf0]  ;;  %1359 = vmatpush.bf16.msra.mxu1 %v2378_v7 }
  0x1e   :  { %v2361_v14 = vld [vmem:[#allocation5 + $0x1c0] sm:$0xf]  ;;  %v3141_v15 = vld [vmem:[#allocation5 + $0x1cc] sm:$0xf0]  ;;  %1372 = vmatpush.bf16.msra.mxu2 %v2506_v8  ;;  %v2234_v16 = vor.u32 %v3109_v13, %v2233_v11 }
  0x1f   :  { %v2362_v17 = vor.u32 %v3141_v15, %v2361_v14  ;;  %v2489_v18 = vld [vmem:[#allocation5 + $0x2c0] sm:$0xf]  ;;  %v3173_v19 = vld [vmem:[#allocation5 + $0x2cc] sm:$0xf0]  ;;  %1385 = vmatpush.bf16.msra.mxu3 %v2634_v12 }
  0x20   :  { %v2617_v20 = vld [vmem:[#allocation5 + $0x3c0] sm:$0xf]  ;;  %v2490_v21 = vor.u32 %v3173_v19, %v2489_v18  ;;  %v3205_v22 = vld [vmem:[#allocation5 + $0x3cc] sm:$0xf0]  ;;  %1347 = vmatpush.bf16.msra.mxu0 %v2234_v16 }
  0x21   :  { %v2217_v23 = vld [vmem:[#allocation5 + $0xa0] sm:$0xf]  ;;  %v3105_v24 = vld [vmem:[#allocation5 + $0xac] sm:$0xf0]  ;;  %v2618_v25 = vor.u32 %v3205_v22, %v2617_v20  ;;  %1360 = vmatpush.bf16.msra.mxu1 %v2362_v17 }
  0x22   :  { %v2345_v26 = vld [vmem:[#allocation5 + $0x1a0] sm:$0xf]  ;;  %v3137_v27 = vld [vmem:[#allocation5 + $0x1ac] sm:$0xf0]  ;;  %v2218_v29 = vor.u32 %v3105_v24, %v2217_v23  ;;  %1373 = vmatpush.bf16.msra.mxu2 %v2490_v21  ;;  %v104_v23 = vld [vmem:[#allocation2] sm:$0xff] }
  0x23   :  { %v2473_v28 = vld [vmem:[#allocation5 + $0x2a0] sm:$0xf]  ;;  %v3169_v30 = vld [vmem:[#allocation5 + $0x2ac] sm:$0xf0]  ;;  %v2346_v33 = vor.u32 %v3137_v27, %v2345_v26  ;;  %1386 = vmatpush.bf16.msra.mxu3 %v2618_v25  ;;  %v106_v24 = vld [vmem:[#allocation2 + $0xe] sm:$0xff] }
  0x24   :  { %v2601_v31 = vld [vmem:[#allocation5 + $0x3a0] sm:$0xf]  ;;  %v3201_v32 = vld [vmem:[#allocation5 + $0x3ac] sm:$0xf0]  ;;  %v2474_v34 = vor.u32 %v3169_v30, %v2473_v28  ;;  %1348 = vmatpush.bf16.msra.mxu0 %v2218_v29  ;;  %v108_v29 = vld [vmem:[#allocation2 + $0x1c] sm:$0xff] }
  0x25   :  { %v2201_v35 = vld [vmem:[#allocation5 + $0x80] sm:$0xf]  ;;  %v3101_v36 = vld [vmem:[#allocation5 + $0x8c] sm:$0xf0]  ;;  %v2602_v38 = vor.u32 %v3201_v32, %v2601_v31  ;;  %1361 = vmatpush.bf16.msra.mxu1 %v2346_v33  ;;  %120 = vst [vmem:[#allocation1] ss:$4 sm:$0xff] %v104_v23 }
  0x26   :  { %v2329_v37 = vld [vmem:[#allocation5 + $0x180] sm:$0xf]  ;;  %v3133_v39 = vld [vmem:[#allocation5 + $0x18c] sm:$0xf0]  ;;  %v2202_v44 = vor.u32 %v3101_v36, %v2201_v35  ;;  %1374 = vmatpush.bf16.msra.mxu2 %v2474_v34  ;;  %122 = vst [vmem:[#allocation1 + $0x1] ss:$4 sm:$0xff] %v106_v24 }
  0x27   :  { %v2457_v40 = vld [vmem:[#allocation5 + $0x280] sm:$0xf]  ;;  %v3165_v41 = vld [vmem:[#allocation5 + $0x28c] sm:$0xf0]  ;;  %v2330_v45 = vor.u32 %v3133_v39, %v2329_v37  ;;  %1387 = vmatpush.bf16.msra.mxu3 %v2602_v38  ;;  %124 = vst [vmem:[#allocation1 + $0x2] ss:$4 sm:$0xff] %v108_v29 }
  0x28   :  { %v2585_v42 = vld [vmem:[#allocation5 + $0x380] sm:$0xf]  ;;  %v3197_v43 = vld [vmem:[#allocation5 + $0x38c] sm:$0xf0]  ;;  %v2458_v46 = vor.u32 %v3165_v41, %v2457_v40  ;;  %1349 = vmatpush.bf16.msra.mxu0 %v2202_v44  ;;  %v3111_v37 = vld [vmem:[#allocation5 + $0xe4] sm:$0xf] }
  0x29   :  { %v2185_v47 = vld [vmem:[#allocation5 + $0x60] sm:$0xf]  ;;  %v3097_v48 = vld [vmem:[#allocation5 + $0x6c] sm:$0xf0]  ;;  %v2586_v50 = vor.u32 %v3197_v43, %v2585_v42  ;;  %1362 = vmatpush.bf16.msra.mxu1 %v2330_v45  ;;  %v2251_v38 = vld [vmem:[#allocation5 + $0xf0] sm:$0xf0] }
  0x2a   :  { %v2313_v49 = vld [vmem:[#allocation5 + $0x160] sm:$0xf]  ;;  %v3129_v51 = vld [vmem:[#allocation5 + $0x16c] sm:$0xf0]  ;;  %v2186_v56 = vor.u32 %v3097_v48, %v2185_v47  ;;  %1375 = vmatpush.bf16.msra.mxu2 %v2458_v46  ;;  %v2254_v46 = vor.u32 %v3111_v37, %v2251_v38  ;;  %v3143_v47 = vld [vmem:[#allocation5 + $0x1e4] sm:$0xf] }
  0x2b   :  { %v2441_v52 = vld [vmem:[#allocation5 + $0x260] sm:$0xf]  ;;  %v3161_v53 = vld [vmem:[#allocation5 + $0x26c] sm:$0xf0]  ;;  %v2314_v57 = vor.u32 %v3129_v51, %v2313_v49  ;;  %1388 = vmatpush.bf16.msra.mxu3 %v2586_v50  ;;  %v2379_v51 = vld [vmem:[#allocation5 + $0x1f0] sm:$0xf0] }
  0x2c   :  { %v2569_v54 = vld [vmem:[#allocation5 + $0x360] sm:$0xf]  ;;  %v3193_v55 = vld [vmem:[#allocation5 + $0x36c] sm:$0xf0]  ;;  %v2442_v58 = vor.u32 %v3161_v53, %v2441_v52  ;;  %1350 = vmatpush.bf16.msra.mxu0 %v2186_v56  ;;  %v2203_v23 = vld [vmem:[#allocation5 + $0x90] sm:$0xf0] }
  0x2d   :  { %v2169_v59 = vld [vmem:[#allocation5 + $0x40] sm:$0xf]  ;;  %v3093_v60 = vld [vmem:[#allocation5 + $0x4c] sm:$0xf0]  ;;  %v2570_v62 = vor.u32 %v3193_v55, %v2569_v54  ;;  %1363 = vmatpush.bf16.msra.mxu1 %v2314_v57  ;;  %v3107_v54 = vld [vmem:[#allocation5 + $0xc4] sm:$0xf] }
  0x2e   :  { %v2297_v61 = vld [vmem:[#allocation5 + $0x140] sm:$0xf]  ;;  %v3125_v63 = vld [vmem:[#allocation5 + $0x14c] sm:$0xf0]  ;;  %v2170_v4 = vor.u32 %v3093_v60, %v2169_v59  ;;  %1376 = vmatpush.bf16.msra.mxu2 %v2442_v58  ;;  %v2235_v55 = vld [vmem:[#allocation5 + $0xd0] sm:$0xf0] }
  0x2f   :  { %v2425_v0 = vld [vmem:[#allocation5 + $0x240] sm:$0xf]  ;;  %v3157_v1 = vld [vmem:[#allocation5 + $0x24c] sm:$0xf0]  ;;  %v2298_v6 = vor.u32 %v3125_v63, %v2297_v61  ;;  %1389 = vmatpush.bf16.msra.mxu3 %v2570_v62  ;;  %v3139_v58 = vld [vmem:[#allocation5 + $0x1c4] sm:$0xf] }
  0x30   :  { %v2553_v2 = vld [vmem:[#allocation5 + $0x340] sm:$0xf]  ;;  %v3189_v3 = vld [vmem:[#allocation5 + $0x34c] sm:$0xf0]  ;;  %v2426_v7 = vor.u32 %v3157_v1, %v2425_v0  ;;  %1351 = vmatpush.bf16.msra.mxu0 %v2170_v4  ;;  %v2363_v59 = vld [vmem:[#allocation5 + $0x1d0] sm:$0xf0]  ;;  %v2382_v0 = vor.u32 %v3143_v47, %v2379_v51  ;;  %v2238_v4 = vor.u32 %v3107_v54, %v2235_v55 }
  0x31   :  { %v2153_v5 = vld [vmem:[#allocation5 + $0x20] sm:$0xf]  ;;  %v3089_v8 = vld [vmem:[#allocation5 + $0x2c] sm:$0xf0]  ;;  %v2554_v11 = vor.u32 %v3189_v3, %v2553_v2  ;;  %1364 = vmatpush.bf16.msra.mxu1 %v2298_v6  ;;  %v2171_v51 = vld [vmem:[#allocation5 + $0x50] sm:$0xf0] }
  0x32   :  { %v2281_v9 = vld [vmem:[#allocation5 + $0x120] sm:$0xf]  ;;  %v3121_v10 = vld [vmem:[#allocation5 + $0x12c] sm:$0xf0]  ;;  %v2154_v18 = vor.u32 %v3089_v8, %v2153_v5  ;;  %1377 = vmatpush.bf16.msra.mxu2 %v2426_v7  ;;  %v3123_v55 = vld [vmem:[#allocation5 + $0x144] sm:$0xf] }
  0x33   :  { %v2409_v12 = vld [vmem:[#allocation5 + $0x220] sm:$0xf]  ;;  %v3153_v13 = vld [vmem:[#allocation5 + $0x22c] sm:$0xf0]  ;;  %v2282_v25 = vor.u32 %v3121_v10, %v2281_v9  ;;  %1390 = vmatpush.bf16.msra.mxu3 %v2554_v11  ;;  %v3103_v9 = vld [vmem:[#allocation5 + $0xa4] sm:$0xf] }
  0x34   :  { %v2537_v14 = vld [vmem:[#allocation5 + $0x320] sm:$0xf]  ;;  %v3185_v15 = vld [vmem:[#allocation5 + $0x32c] sm:$0xf0]  ;;  %v2410_v26 = vor.u32 %v3153_v13, %v2409_v12  ;;  %1352 = vmatpush.bf16.msra.mxu0 %v2154_v18  ;;  %v2219_v10 = vld [vmem:[#allocation5 + $0xb0] sm:$0xf0]  ;;  %v2366_v13 = vor.u32 %v3139_v58, %v2363_v59 }
  0x35   :  { %v2137_v16 = vld [vmem:[#allocation5] sm:$0xf]  ;;  %v3085_v17 = vld [vmem:[#allocation5 + $0xc] sm:$0xf0]  ;;  %v2538_v31 = vor.u32 %v3185_v15, %v2537_v14  ;;  %1365 = vmatpush.bf16.msra.mxu1 %v2282_v25  ;;  %v3135_v15 = vld [vmem:[#allocation5 + $0x1a4] sm:$0xf]  ;;  %v2222_v18 = vor.u32 %v3103_v9, %v2219_v10 }
  0x36   :  { %v2265_v19 = vld [vmem:[#allocation5 + $0x100] sm:$0xf]  ;;  %v3117_v20 = vld [vmem:[#allocation5 + $0x10c] sm:$0xf0]  ;;  %v2138_v36 = vor.u32 %v3085_v17, %v2137_v16  ;;  %1378 = vmatpush.bf16.msra.mxu2 %v2410_v26  ;;  %v3131_v25 = vld [vmem:[#allocation5 + $0x184] sm:$0xf] }
  0x37   :  { %v2393_v21 = vld [vmem:[#allocation5 + $0x200] sm:$0xf]  ;;  %v3149_v22 = vld [vmem:[#allocation5 + $0x20c] sm:$0xf0]  ;;  %v2266_v39 = vor.u32 %v3117_v20, %v2265_v19  ;;  %1391 = vmatpush.bf16.msra.mxu3 %v2538_v31  ;;  %v2347_v19 = vld [vmem:[#allocation5 + $0x1b0] sm:$0xf0] }
  0x38   :  { %v2521_v27 = vld [vmem:[#allocation5 + $0x300] sm:$0xf]  ;;  %v3181_v28 = vld [vmem:[#allocation5 + $0x30c] sm:$0xf0]  ;;  %v2394_v40 = vor.u32 %v3149_v22, %v2393_v21  ;;  %1353 = vmatpush.bf16.msra.mxu0 %v2138_v36  ;;  %v3099_v22 = vld [vmem:[#allocation5 + $0x84] sm:$0xf]  ;;  %v2350_v26 = vor.u32 %v3135_v15, %v2347_v19 }
  0x39   :  { %v110_v30 = vld [vmem:[#allocation2 + $0x2a] sm:$0xff]  ;;  %v2761_v32 = vld [vmem:[#allocation5 + $0x4e0] sm:$0xf]  ;;  %v2522_v43 = vor.u32 %v3181_v28, %v2521_v27  ;;  %1366 = vmatpush.bf16.msra.mxu1 %v2266_v39  ;;  %v2206_v31 = vor.u32 %v3099_v22, %v2203_v23  ;;  %v3127_v39 = vld [vmem:[#allocation5 + $0x164] sm:$0xf] }
  0x3a   :  { %v3241_v33 = vld [vmem:[#allocation5 + $0x4ec] sm:$0xf0]  ;;  %v2889_v34 = vld [vmem:[#allocation5 + $0x5e0] sm:$0xf]  ;;  %126 = vst [vmem:[#allocation1 + $0x3] ss:$4 sm:$0xff] %v110_v30  ;;  %1379 = vmatpush.bf16.msra.mxu2 %v2394_v40 }
  0x3b   :  { %v3273_v35 = vld [vmem:[#allocation5 + $0x5ec] sm:$0xf0]  ;;  %v2905_v41 = vld [vmem:[#allocation5 + $0x600] sm:$0xf]  ;;  %v2762_v44 = vor.u32 %v3241_v33, %v2761_v32  ;;  %1392 = vmatpush.bf16.msra.mxu3 %v2522_v43  ;;  %v2331_v28 = vld [vmem:[#allocation5 + $0x190] sm:$0xf0] }
  0x3c   :  { %v3277_v42 = vld [vmem:[#allocation5 + $0x60c] sm:$0xf0]  ;;  %v2890_v45 = vor.u32 %v3273_v35, %v2889_v34  ;;  %v2745_v48 = vld [vmem:[#allocation5 + $0x4c0] sm:$0xf]  ;;  %v3095_v34 = vld [vmem:[#allocation5 + $0x64] sm:$0xf]  ;;  %v2334_v43 = vor.u32 %v3131_v25, %v2331_v28 }
  0x3d   :  { %v3237_v49 = vld [vmem:[#allocation5 + $0x4cc] sm:$0xf0]  ;;  %v2906_v50 = vor.u32 %v3277_v42, %v2905_v41  ;;  %v2873_v52 = vld [vmem:[#allocation5 + $0x5c0] sm:$0xf]  ;;  %1398 = vmatpush.bf16.msrb.mxu0 %v2762_v44  ;;  %v2187_v35 = vld [vmem:[#allocation5 + $0x70] sm:$0xf0] }
  0x3e   :  { %v3269_v53 = vld [vmem:[#allocation5 + $0x5cc] sm:$0xf0]  ;;  %v2729_v56 = vld [vmem:[#allocation5 + $0x4a0] sm:$0xf]  ;;  %v2746_v57 = vor.u32 %v3237_v49, %v2745_v48  ;;  %1411 = vmatpush.bf16.msrb.mxu1 %v2890_v45  ;;  %v2315_v40 = vld [vmem:[#allocation5 + $0x170] sm:$0xf0]  ;;  %v2190_v47 = vor.u32 %v3095_v34, %v2187_v35 }
  0x3f   :  { %v3233_v60 = vld [vmem:[#allocation5 + $0x4ac] sm:$0xf0]  ;;  %v2857_v61 = vld [vmem:[#allocation5 + $0x5a0] sm:$0xf]  ;;  %1437 = vmatpush.bf16.msrb.mxu3 %v2254_v46  ;;  %v2874_v1 = vor.u32 %v3269_v53, %v2873_v52  ;;  %1431 = vmatpush.bf16.msrb.mxu2 %v2906_v50  ;;  %v111_v42 = vld [vmem:[#allocation2 + $0x32] sm:$0x3f]  ;;  %v2318_v53 = vor.u32 %v3127_v39, %v2315_v40 }
  0x40   :  { %v3265_v62 = vld [vmem:[#allocation5 + $0x5ac] sm:$0xf0]  ;;  %v2730_v12 = vor.u32 %v3233_v60, %v2729_v56  ;;  %v2713_v16 = vld [vmem:[#allocation5 + $0x480] sm:$0xf]  ;;  %v3091_v50 = vld [vmem:[#allocation5 + $0x44] sm:$0xf] }
  0x41   :  { %v137_v63 = vld.sshfl [vmem:[#allocation1 + $0x10] sm:$0xff pattern:$0x73625140]  ;;  %v135_v2 = vld.sshfl [vmem:[#allocation1] sm:$0xff pattern:$0x73625140]  ;;  %1399 = vmatpush.bf16.msrb.mxu0 %v2746_v57  ;;  %v2858_v14 = vor.u32 %v3265_v62, %v2857_v61  ;;  %v2174_v58 = vor.u32 %v3091_v50, %v2171_v51 }
  0x42   :  { %v3556_v3 = vpack.c.bf16 %v137_v63, %v137_v63  ;;  %v3558_v5 = vpack.c.bf16 %v135_v2, %v135_v2  ;;  %v138_v6 = vld.sshfl [vmem:[#allocation1 + $0x18] sm:$0xff pattern:$0x73625140]  ;;  %v136_v7 = vld.sshfl [vmem:[#allocation1 + $0x8] sm:$0xff pattern:$0x73625140]  ;;  %1412 = vmatpush.bf16.msrb.mxu1 %v2874_v1 }
  0x43   :  { %v3560_v8 = vpack.c.bf16 %v138_v6, %v138_v6  ;;  %v3562_v11 = vpack.c.bf16 %v136_v7, %v136_v7  ;;  %v3229_v17 = vld [vmem:[#allocation5 + $0x48c] sm:$0xf0]  ;;  %1438 = vmatpush.bf16.msrb.mxu3 %v2238_v4  ;;  %v2841_v20 = vld [vmem:[#allocation5 + $0x580] sm:$0xf]  ;;  %134 = vst [vmem:[#allocation1 + $0x23] ss:$4 sm:$0xff] %v111_v42 }
  0x44   :  { %1380 = vmatmul.bf16.vlgmr.msra.gmra.mxu2 %v3556_v3  ;;  %1354 = vmatmul.bf16.vlgmr.msra.gmra.mxu0 %v3558_v5  ;;  %v3261_v21 = vld [vmem:[#allocation5 + $0x58c] sm:$0xf0]  ;;  %v2714_v24 = vor.u32 %v3229_v17, %v2713_v16  ;;  %v2697_v29 = vld [vmem:[#allocation5 + $0x460] sm:$0xf]  ;;  %v2299_v59 = vld [vmem:[#allocation5 + $0x150] sm:$0xf0] }
  0x45   :  { %1450 = vmatpush.bf16.msra.mxu2 %v2382_v0  ;;  %1393 = vmatmul.bf16.vlgmr.msra.gmra.mxu3 %v3560_v8  ;;  %v2842_v27 = vor.u32 %v3261_v21, %v2841_v20  ;;  %v3225_v30 = vld [vmem:[#allocation5 + $0x46c] sm:$0xf0]  ;;  %v2825_v32 = vld [vmem:[#allocation5 + $0x560] sm:$0xf]  ;;  %v3087_v62 = vld [vmem:[#allocation5 + $0x24] sm:$0xf]  ;;  %v2302_v9 = vor.u32 %v3123_v55, %v2299_v59 }
  0x46   :  { %1367 = vmatmul.bf16.vlgmr.msra.gmra.mxu1 %v3562_v11  ;;  %1400 = vmatpush.bf16.msrb.mxu0 %v2730_v12  ;;  %v3257_v33 = vld [vmem:[#allocation5 + $0x56c] sm:$0xf0]  ;;  %v107_v37 = vld [vmem:[#allocation2 + $0x16] sm:$0x3f]  ;;  %v2698_v38 = vor.u32 %v3225_v30, %v2697_v29  ;;  %v2155_v63 = vld [vmem:[#allocation5 + $0x30] sm:$0xf0] }
  0x47   :  { %1413 = vmatpush.bf16.msrb.mxu1 %v2858_v14  ;;  %1439 = vmatpush.bf16.msrb.mxu3 %v2222_v18  ;;  %v105_v36 = vld [vmem:[#allocation2 + $0x8] sm:$0x3f]  ;;  %v2826_v44 = vor.u32 %v3257_v33, %v2825_v32  ;;  %v2681_v45 = vld [vmem:[#allocation5 + $0x440] sm:$0xf]  ;;  %130 = vst [vmem:[#allocation1 + $0x21] ss:$4 sm:$0xff] %v107_v37  ;;  %v2158_v15 = vor.u32 %v3087_v62, %v2155_v63 }
  0x48   :  { %v109_v41 = vld [vmem:[#allocation2 + $0x24] sm:$0x3f]  ;;  %128 = vst [vmem:[#allocation1 + $0x20] ss:$4 sm:$0xff] %v105_v36  ;;  %v2809_v48 = vld [vmem:[#allocation5 + $0x540] sm:$0xf] }
  0x49   :  { %1451 = vmatpush.bf16.msra.mxu2 %v2366_v13  ;;  %v3221_v46 = vld [vmem:[#allocation5 + $0x44c] sm:$0xf0]  ;;  %132 = vst [vmem:[#allocation1 + $0x22] ss:$4 sm:$0xff] %v109_v41  ;;  %v2665_v56 = vld [vmem:[#allocation5 + $0x420] sm:$0xf] }
  0x4a   :  { %1401 = vmatpush.bf16.msrb.mxu0 %v2714_v24  ;;  %v3253_v49 = vld [vmem:[#allocation5 + $0x54c] sm:$0xf0]  ;;  %v2682_v52 = vor.u32 %v3221_v46, %v2681_v45  ;;  %v2793_v60 = vld [vmem:[#allocation5 + $0x520] sm:$0xf]  ;;  %v3119_v1 = vld [vmem:[#allocation5 + $0x124] sm:$0xf] }
  0x4b   :  { %1414 = vmatpush.bf16.msrb.mxu1 %v2842_v27  ;;  %1440 = vmatpush.bf16.msrb.mxu3 %v2206_v31  ;;  %v2810_v54 = vor.u32 %v3253_v49, %v2809_v48  ;;  %v3217_v57 = vld [vmem:[#allocation5 + $0x42c] sm:$0xf0]  ;;  %v2283_v2 = vld [vmem:[#allocation5 + $0x130] sm:$0xf0]  ;;  %v2649_v4 = vld [vmem:[#allocation5 + $0x400] sm:$0xf] }
  0x4c   :  { %v3249_v61 = vld [vmem:[#allocation5 + $0x52c] sm:$0xf0]  ;;  %v2666_v0 = vor.u32 %v3217_v57, %v2665_v56  ;;  %v2777_v7 = vld [vmem:[#allocation5 + $0x500] sm:$0xf]  ;;  %v3083_v13 = vld [vmem:[#allocation5 + $0x4] sm:$0xf] }
  0x4d   :  { %1452 = vmatpush.bf16.msra.mxu2 %v2350_v26  ;;  %v3213_v6 = vld [vmem:[#allocation5 + $0x40c] sm:$0xf0]  ;;  %v2794_v10 = vor.u32 %v3249_v61, %v2793_v60  ;;  %v2139_v14 = vld [vmem:[#allocation5 + $0x10] sm:$0xf0]  ;;  %v3175_v17 = vld [vmem:[#allocation5 + $0x2e4] sm:$0xf]  ;;  %v2286_v26 = vor.u32 %v3119_v1, %v2283_v2 }
  0x4e   :  { %1402 = vmatpush.bf16.msrb.mxu0 %v2698_v38  ;;  %v3245_v12 = vld [vmem:[#allocation5 + $0x50c] sm:$0xf0]  ;;  %v2507_v19 = vld [vmem:[#allocation5 + $0x2f0] sm:$0xf0]  ;;  %v3207_v20 = vld [vmem:[#allocation5 + $0x3e4] sm:$0xf]  ;;  %v2650_v22 = vor.u32 %v3213_v6, %v2649_v4  ;;  %v2142_v30 = vor.u32 %v3083_v13, %v2139_v14 }
  0x4f   :  { %1415 = vmatpush.bf16.msrb.mxu1 %v2826_v44  ;;  %1441 = vmatpush.bf16.msrb.mxu3 %v2190_v47  ;;  %v2635_v21 = vld [vmem:[#allocation5 + $0x3f0] sm:$0xf0]  ;;  %v3239_v23 = vld [vmem:[#allocation5 + $0x4e4] sm:$0xf]  ;;  %v2778_v27 = vor.u32 %v3245_v12, %v2777_v7  ;;  %v2510_v31 = vor.u32 %v3175_v17, %v2507_v19 }
  0x50   :  { %v141_v16 = vld.sshfl [vmem:[#allocation1 + $0x30] sm:$0xff pattern:$0x73625140]  ;;  %v3115_v25 = vld [vmem:[#allocation5 + $0x104] sm:$0xf]  ;;  %v2638_v35 = vor.u32 %v3207_v20, %v2635_v21 }
  0x51   :  { %1453 = vmatpush.bf16.msra.mxu2 %v2334_v43  ;;  %v3568_v18 = vpack.c.bf16 %v141_v16, %v141_v16  ;;  %v2763_v24 = vld [vmem:[#allocation5 + $0x4f0] sm:$0xf0]  ;;  %v139_v28 = vld.sshfl [vmem:[#allocation1 + $0x20] sm:$0xff pattern:$0x73625140] }
  0x52   :  { %1403 = vmatpush.bf16.msrb.mxu0 %v2682_v52  ;;  %v140_v29 = vld.sshfl [vmem:[#allocation1 + $0x28] sm:$0xff pattern:$0x73625140]  ;;  %v2267_v32 = vld [vmem:[#allocation5 + $0x110] sm:$0xf0]  ;;  %v2766_v36 = vor.u32 %v3239_v23, %v2763_v24  ;;  %v3572_v40 = vpack.c.bf16 %v139_v28, %v139_v28 }
  0x53   :  { %1416 = vmatpush.bf16.msrb.mxu1 %v2810_v54  ;;  %1442 = vmatpush.bf16.msrb.mxu3 %v2174_v58  ;;  %v3271_v33 = vld [vmem:[#allocation5 + $0x5e4] sm:$0xf]  ;;  %v2891_v34 = vld [vmem:[#allocation5 + $0x5f0] sm:$0xf0]  ;;  %v3574_v41 = vpack.c.bf16 %v140_v29, %v140_v29  ;;  %v2270_v45 = vor.u32 %v3115_v25, %v2267_v32 }
  0x54   :  { %2919 = vmatmul.msk.bf16.vlgmr.msrb.gmra.mxu2 %vm1342_vm0, %v3568_v18  ;;  %v3171_v37 = vld [vmem:[#allocation5 + $0x2c4] sm:$0xf]  ;;  %v2491_v38 = vld [vmem:[#allocation5 + $0x2d0] sm:$0xf0]  ;;  %v2894_v46 = vor.u32 %v3271_v33, %v2891_v34 }
  0x55   :  { %1454 = vmatpush.bf16.msra.mxu2 %v2318_v53  ;;  %v3203_v39 = vld [vmem:[#allocation5 + $0x3c4] sm:$0xf]  ;;  %v2619_v42 = vld [vmem:[#allocation5 + $0x3d0] sm:$0xf0]  ;;  %v2494_v47 = vor.u32 %v3171_v37, %v2491_v38 }
  0x56   :  { %1404 = vmatpush.bf16.msrb.mxu0 %v2666_v0  ;;  %v3235_v43 = vld [vmem:[#allocation5 + $0x4c4] sm:$0xf]  ;;  %v2747_v44 = vld [vmem:[#allocation5 + $0x4d0] sm:$0xf0]  ;;  %v2622_v50 = vor.u32 %v3203_v39, %v2619_v42 }
  0x57   :  { %1417 = vmatpush.bf16.msrb.mxu1 %v2794_v10  ;;  %1443 = vmatpush.bf16.msrb.mxu3 %v2158_v15  ;;  %v3267_v48 = vld [vmem:[#allocation5 + $0x5c4] sm:$0xf]  ;;  %v2875_v49 = vld [vmem:[#allocation5 + $0x5d0] sm:$0xf0]  ;;  %v2750_v51 = vor.u32 %v3235_v43, %v2747_v44 }
  0x58   :  { %v3167_v52 = vld [vmem:[#allocation5 + $0x2a4] sm:$0xf]  ;;  %v2475_v53 = vld [vmem:[#allocation5 + $0x2b0] sm:$0xf0]  ;;  %v2878_v58 = vor.u32 %v3267_v48, %v2875_v49 }
  0x59   :  { %1455 = vmatpush.bf16.msra.mxu2 %v2302_v9  ;;  %v3199_v54 = vld [vmem:[#allocation5 + $0x3a4] sm:$0xf]  ;;  %v2603_v55 = vld [vmem:[#allocation5 + $0x3b0] sm:$0xf0]  ;;  %v2478_v59 = vor.u32 %v3167_v52, %v2475_v53 }
  0x5a   :  { %1405 = vmatpush.bf16.msrb.mxu0 %v2650_v22  ;;  %v3231_v56 = vld [vmem:[#allocation5 + $0x4a4] sm:$0xf]  ;;  %v2731_v57 = vld [vmem:[#allocation5 + $0x4b0] sm:$0xf0]  ;;  %v2606_v62 = vor.u32 %v3199_v54, %v2603_v55 }
  0x5b   :  { %1418 = vmatpush.bf16.msrb.mxu1 %v2778_v27  ;;  %1444 = vmatpush.bf16.msrb.mxu3 %v2142_v30  ;;  %v3263_v60 = vld [vmem:[#allocation5 + $0x5a4] sm:$0xf]  ;;  %v2859_v61 = vld [vmem:[#allocation5 + $0x5b0] sm:$0xf0]  ;;  %v2734_v63 = vor.u32 %v3231_v56, %v2731_v57 }
  0x5c   :  { %v3163_v0 = vld [vmem:[#allocation5 + $0x284] sm:$0xf]  ;;  %v2459_v1 = vld [vmem:[#allocation5 + $0x290] sm:$0xf0]  ;;  %v2862_v9 = vor.u32 %v3263_v60, %v2859_v61  ;;  %v2257_v61 = vld [vmem:[#allocation5 + $0xe8] sm:$0xf] }
  0x5d   :  { %1456 = vmatpush.bf16.msra.mxu2 %v2286_v26  ;;  %1406 = vmatmul.bf16.vlgmr.msrb.gmra.mxu0 %v3572_v40  ;;  %v3195_v2 = vld [vmem:[#allocation5 + $0x384] sm:$0xf]  ;;  %v2587_v4 = vld [vmem:[#allocation5 + $0x390] sm:$0xf0]  ;;  %v2462_v10 = vor.u32 %v3163_v0, %v2459_v1  ;;  %v3146_v0 = vld [vmem:[#allocation5 + $0x1f4] sm:$0xf0] }
  0x5e   :  { %1463 = vmatpush.bf16.msra.mxu0 %v2510_v31  ;;  %1419 = vmatmul.bf16.vlgmr.msrb.gmra.mxu1 %v3574_v41  ;;  %v3227_v6 = vld [vmem:[#allocation5 + $0x484] sm:$0xf]  ;;  %v2715_v7 = vld [vmem:[#allocation5 + $0x490] sm:$0xf0]  ;;  %v2590_v14 = vor.u32 %v3195_v2, %v2587_v4 }
  0x5f   :  { %1476 = vmatpush.bf16.msra.mxu1 %v2638_v35  ;;  %1489 = vmatpush.bf16.msra.mxu3 %v2766_v36  ;;  %v3259_v12 = vld [vmem:[#allocation5 + $0x584] sm:$0xf]  ;;  %v2843_v13 = vld [vmem:[#allocation5 + $0x590] sm:$0xf0]  ;;  %v2718_v15 = vor.u32 %v3227_v6, %v2715_v7 }
  0x60   :  { %1445 = vmatmul.bf16.vlgmr.msrb.gmra.mxu3 %v3558_v5  ;;  %v3159_v16 = vld [vmem:[#allocation5 + $0x264] sm:$0xf]  ;;  %v2443_v17 = vld [vmem:[#allocation5 + $0x270] sm:$0xf0]  ;;  %v2846_v23 = vor.u32 %v3259_v12, %v2843_v13  ;;  %v2513_v13 = vld [vmem:[#allocation5 + $0x2e8] sm:$0xf] }
  0x61   :  { %1457 = vmatpush.bf16.msra.mxu2 %v2270_v45  ;;  %v3191_v19 = vld [vmem:[#allocation5 + $0x364] sm:$0xf]  ;;  %v2571_v20 = vld [vmem:[#allocation5 + $0x370] sm:$0xf0]  ;;  %v2446_v24 = vor.u32 %v3159_v16, %v2443_v17  ;;  %v2641_v17 = vld [vmem:[#allocation5 + $0x3e8] sm:$0xf] }
  0x62   :  { %1464 = vmatpush.bf16.msra.mxu0 %v2494_v47  ;;  %v3223_v21 = vld [vmem:[#allocation5 + $0x464] sm:$0xf]  ;;  %v2699_v22 = vld [vmem:[#allocation5 + $0x470] sm:$0xf0]  ;;  %v2574_v27 = vor.u32 %v3191_v19, %v2571_v20  ;;  %v3210_v19 = vld [vmem:[#allocation5 + $0x3f4] sm:$0xf0] }
  0x63   :  { %1477 = vmatpush.bf16.msra.mxu1 %v2622_v50  ;;  %1490 = vmatpush.bf16.msra.mxu3 %v2750_v51  ;;  %v3255_v25 = vld [vmem:[#allocation5 + $0x564] sm:$0xf]  ;;  %v2827_v26 = vld [vmem:[#allocation5 + $0x570] sm:$0xf0]  ;;  %v2702_v28 = vor.u32 %v3223_v21, %v2699_v22  ;;  %v2241_v20 = vld [vmem:[#allocation5 + $0xc8] sm:$0xf] }
  0x64   :  { %v3155_v29 = vld [vmem:[#allocation5 + $0x244] sm:$0xf]  ;;  %v2427_v30 = vld [vmem:[#allocation5 + $0x250] sm:$0xf0]  ;;  %1458 = vmatmul.bf16.vlgmr.msra.gmra.mxu2 %v3562_v11  ;;  %v2830_v35 = vor.u32 %v3255_v25, %v2827_v26  ;;  %v3110_v21 = vld [vmem:[#allocation5 + $0xd4] sm:$0xf0] }
  0x65   :  { %1502 = vmatpush.bf16.msrb.mxu2 %v2894_v46  ;;  %v3187_v31 = vld [vmem:[#allocation5 + $0x344] sm:$0xf]  ;;  %v2555_v32 = vld [vmem:[#allocation5 + $0x350] sm:$0xf0]  ;;  %v2430_v36 = vor.u32 %v3155_v29, %v2427_v30  ;;  %v2369_v22 = vld [vmem:[#allocation5 + $0x1c8] sm:$0xf]  ;;  %v2242_v30 = vor.u32 %v3110_v21, %v2241_v20 }
  0x66   :  { %1465 = vmatpush.bf16.msra.mxu0 %v2478_v59  ;;  %v3219_v33 = vld [vmem:[#allocation5 + $0x444] sm:$0xf]  ;;  %v2683_v34 = vld [vmem:[#allocation5 + $0x450] sm:$0xf0]  ;;  %v2558_v39 = vor.u32 %v3187_v31, %v2555_v32  ;;  %v3174_v29 = vld [vmem:[#allocation5 + $0x2d4] sm:$0xf0] }
  0x67   :  { %1478 = vmatpush.bf16.msra.mxu1 %v2606_v62  ;;  %1491 = vmatpush.bf16.msra.mxu3 %v2734_v63  ;;  %v3251_v37 = vld [vmem:[#allocation5 + $0x544] sm:$0xf]  ;;  %v2811_v38 = vld [vmem:[#allocation5 + $0x550] sm:$0xf0]  ;;  %v2686_v42 = vor.u32 %v3219_v33, %v2683_v34  ;;  %v3114_v62 = vld [vmem:[#allocation5 + $0xf4] sm:$0xf0] }
  0x68   :  { %v3151_v43 = vld [vmem:[#allocation5 + $0x224] sm:$0xf]  ;;  %v2411_v44 = vld [vmem:[#allocation5 + $0x230] sm:$0xf0]  ;;  %v2814_v49 = vor.u32 %v3251_v37, %v2811_v38  ;;  %v2385_v63 = vld [vmem:[#allocation5 + $0x1e8] sm:$0xf] }
  0x69   :  { %1503 = vmatpush.bf16.msrb.mxu2 %v2878_v58  ;;  %v3183_v45 = vld [vmem:[#allocation5 + $0x324] sm:$0xf]  ;;  %v2539_v46 = vld [vmem:[#allocation5 + $0x330] sm:$0xf0]  ;;  %v2414_v50 = vor.u32 %v3151_v43, %v2411_v44  ;;  %v2386_v16 = vor.u32 %v3146_v0, %v2385_v63  ;;  %v2625_v32 = vld [vmem:[#allocation5 + $0x3c8] sm:$0xf] }
  0x6a   :  { %1466 = vmatpush.bf16.msra.mxu0 %v2462_v10  ;;  %v3215_v47 = vld [vmem:[#allocation5 + $0x424] sm:$0xf]  ;;  %v2667_v48 = vld [vmem:[#allocation5 + $0x430] sm:$0xf0]  ;;  %v2542_v54 = vor.u32 %v3183_v45, %v2539_v46  ;;  %v3206_v33 = vld [vmem:[#allocation5 + $0x3d4] sm:$0xf0] }
  0x6b   :  { %1479 = vmatpush.bf16.msra.mxu1 %v2590_v14  ;;  %1492 = vmatpush.bf16.msra.mxu3 %v2718_v15  ;;  %v3247_v51 = vld [vmem:[#allocation5 + $0x524] sm:$0xf]  ;;  %v2795_v52 = vld [vmem:[#allocation5 + $0x530] sm:$0xf0]  ;;  %v2670_v55 = vor.u32 %v3215_v47, %v2667_v48  ;;  %v3178_v14 = vld [vmem:[#allocation5 + $0x2f4] sm:$0xf0]  ;;  %v2258_v15 = vor.u32 %v3114_v62, %v2257_v61 }
  0x6c   :  { %v3147_v53 = vld [vmem:[#allocation5 + $0x204] sm:$0xf]  ;;  %v2395_v56 = vld [vmem:[#allocation5 + $0x210] sm:$0xf0]  ;;  %v2798_v1 = vor.u32 %v3247_v51, %v2795_v52  ;;  %v2514_v26 = vor.u32 %v3178_v14, %v2513_v13  ;;  %v2225_v34 = vld [vmem:[#allocation5 + $0xa8] sm:$0xf] }
  0x6d   :  { %1504 = vmatpush.bf16.msrb.mxu2 %v2862_v9  ;;  %v3179_v57 = vld [vmem:[#allocation5 + $0x304] sm:$0xf]  ;;  %v2523_v58 = vld [vmem:[#allocation5 + $0x310] sm:$0xf0]  ;;  %v2398_v2 = vor.u32 %v3147_v53, %v2395_v56  ;;  %v3138_v37 = vld [vmem:[#allocation5 + $0x1b4] sm:$0xf0] }
  0x6e   :  { %1467 = vmatpush.bf16.msra.mxu0 %v2446_v24  ;;  %v3211_v59 = vld [vmem:[#allocation5 + $0x404] sm:$0xf]  ;;  %v2651_v60 = vld [vmem:[#allocation5 + $0x410] sm:$0xf0]  ;;  %v2526_v9 = vor.u32 %v3179_v57, %v2523_v58  ;;  %v3170_v43 = vld [vmem:[#allocation5 + $0x2b4] sm:$0xf0] }
  0x6f   :  { %1480 = vmatpush.bf16.msra.mxu1 %v2574_v27  ;;  %1493 = vmatpush.bf16.msra.mxu3 %v2702_v28  ;;  %v3243_v4 = vld [vmem:[#allocation5 + $0x504] sm:$0xf]  ;;  %v2779_v6 = vld [vmem:[#allocation5 + $0x510] sm:$0xf0]  ;;  %v2654_v10 = vor.u32 %v3211_v59, %v2651_v60  ;;  %v2642_v27 = vor.u32 %v3210_v19, %v2641_v17  ;;  %v2497_v28 = vld [vmem:[#allocation5 + $0x2c8] sm:$0xf] }
  0x70   :  { %v3275_v7 = vld [vmem:[#allocation5 + $0x604] sm:$0xf]  ;;  %v2907_v12 = vld [vmem:[#allocation5 + $0x610] sm:$0xf0]  ;;  %v2782_v24 = vor.u32 %v3243_v4, %v2779_v6  ;;  %v2498_v38 = vor.u32 %v3174_v29, %v2497_v28  ;;  %v2609_v46 = vld [vmem:[#allocation5 + $0x3a8] sm:$0xf] }
  0x71   :  { %1505 = vmatpush.bf16.msrb.mxu2 %v2846_v23  ;;  %v3142_v23 = vld [vmem:[#allocation5 + $0x1d4] sm:$0xf0]  ;;  %v2910_v25 = vor.u32 %v3275_v7, %v2907_v12  ;;  %v2209_v48 = vld [vmem:[#allocation5 + $0x88] sm:$0xf] }
  0x72   :  { %1468 = vmatpush.bf16.msra.mxu0 %v2430_v36  ;;  %v2370_v31 = vor.u32 %v3142_v23, %v2369_v22  ;;  %v2353_v36 = vld [vmem:[#allocation5 + $0x1a8] sm:$0xf]  ;;  %v3202_v47 = vld [vmem:[#allocation5 + $0x3b4] sm:$0xf0] }
  0x73   :  { %1481 = vmatpush.bf16.msra.mxu1 %v2558_v39  ;;  %1494 = vmatpush.bf16.msra.mxu3 %v2686_v42  ;;  %v2626_v39 = vor.u32 %v3206_v33, %v2625_v32  ;;  %v2481_v42 = vld [vmem:[#allocation5 + $0x2a8] sm:$0xf]  ;;  %v2354_v45 = vor.u32 %v3138_v37, %v2353_v36  ;;  %v3134_v51 = vld [vmem:[#allocation5 + $0x194] sm:$0xf0]  ;;  %v2610_v53 = vor.u32 %v3202_v47, %v2609_v46 }
  0x74   :  { %v2482_v52 = vor.u32 %v3170_v43, %v2481_v42  ;;  %v2593_v58 = vld [vmem:[#allocation5 + $0x388] sm:$0xf]  ;;  %v3198_v59 = vld [vmem:[#allocation5 + $0x394] sm:$0xf0] }
  0x75   :  { %1506 = vmatpush.bf16.msrb.mxu2 %v2830_v35  ;;  %v3106_v35 = vld [vmem:[#allocation5 + $0xb4] sm:$0xf0]  ;;  %v2193_v60 = vld [vmem:[#allocation5 + $0x68] sm:$0xf] }
  0x76   :  { %1469 = vmatpush.bf16.msra.mxu0 %v2414_v50  ;;  %v2226_v44 = vor.u32 %v3106_v35, %v2225_v34  ;;  %v2337_v50 = vld [vmem:[#allocation5 + $0x188] sm:$0xf]  ;;  %v3098_v61 = vld [vmem:[#allocation5 + $0x74] sm:$0xf0] }
  0x77   :  { %1482 = vmatpush.bf16.msra.mxu1 %v2542_v54  ;;  %1495 = vmatpush.bf16.msra.mxu3 %v2670_v55  ;;  %v2465_v54 = vld [vmem:[#allocation5 + $0x288] sm:$0xf]  ;;  %v3166_v55 = vld [vmem:[#allocation5 + $0x294] sm:$0xf0]  ;;  %v2338_v57 = vor.u32 %v3134_v51, %v2337_v50  ;;  %v2194_v6 = vor.u32 %v3098_v61, %v2193_v60 }
  0x78   :  { %v2321_v62 = vld [vmem:[#allocation5 + $0x168] sm:$0xf]  ;;  %v3130_v63 = vld [vmem:[#allocation5 + $0x174] sm:$0xf0]  ;;  %v2466_v0 = vor.u32 %v3166_v55, %v2465_v54  ;;  %v3112_v55 = vld [vmem:[#allocation5 + $0xec] sm:$0xf] }
  0x79   :  { %1507 = vmatpush.bf16.msrb.mxu2 %v2814_v49  ;;  %v3102_v49 = vld [vmem:[#allocation5 + $0x94] sm:$0xf0]  ;;  %v2322_v7 = vor.u32 %v3130_v63, %v2321_v62  ;;  %v2177_v12 = vld [vmem:[#allocation5 + $0x48] sm:$0xf] }
  0x7a   :  { %1470 = vmatpush.bf16.msra.mxu0 %v2398_v2  ;;  %v2210_v56 = vor.u32 %v3102_v49, %v2209_v48  ;;  %v2449_v2 = vld [vmem:[#allocation5 + $0x268] sm:$0xf]  ;;  %v3162_v4 = vld [vmem:[#allocation5 + $0x274] sm:$0xf0] }
  0x7b   :  { %1483 = vmatpush.bf16.msra.mxu1 %v2526_v9  ;;  %1496 = vmatpush.bf16.msra.mxu3 %v2654_v10  ;;  %v2577_v9 = vld [vmem:[#allocation5 + $0x368] sm:$0xf]  ;;  %v3194_v10 = vld [vmem:[#allocation5 + $0x374] sm:$0xf0] }
  0x7c   :  { %v3094_v13 = vld [vmem:[#allocation5 + $0x54] sm:$0xf0]  ;;  %v2305_v14 = vld [vmem:[#allocation5 + $0x148] sm:$0xf]  ;;  %v2578_v17 = vor.u32 %v3194_v10, %v2577_v9  ;;  %v2387_v9 = vld [vmem:[#allocation5 + $0x1f8] sm:$0xf0] }
  0x7d   :  { %1508 = vmatpush.bf16.msrb.mxu2 %v2798_v1  ;;  %1471 = vmatmul.bf16.vlgmr.msra.gmra.mxu0 %v3556_v3  ;;  %v2594_v1 = vor.u32 %v3198_v59, %v2593_v58  ;;  %v2433_v19 = vld [vmem:[#allocation5 + $0x248] sm:$0xf]  ;;  %v3158_v20 = vld [vmem:[#allocation5 + $0x254] sm:$0xf0]  ;;  %v2178_v21 = vor.u32 %v3094_v13, %v2177_v12  ;;  %v3108_v13 = vld [vmem:[#allocation5 + $0xcc] sm:$0xf] }
  0x7e   :  { %1522 = vmatpush.bf16.msrb.mxu0 %v2910_v25  ;;  %1497 = vmatmul.bf16.vlgmr.msra.gmra.mxu3 %v3572_v40  ;;  %v2561_v23 = vld [vmem:[#allocation5 + $0x348] sm:$0xf]  ;;  %v3122_v28 = vld [vmem:[#allocation5 + $0x134] sm:$0xf0] }
  0x7f   :  { %1528 = vmatpush.bf16.msrb.mxu1 %v2258_v15  ;;  %1541 = vmatpush.bf16.msrb.mxu3 %v2386_v16  ;;  %v3126_v15 = vld [vmem:[#allocation5 + $0x154] sm:$0xf0]  ;;  %v2450_v16 = vor.u32 %v3162_v4, %v2449_v2  ;;  %v2161_v25 = vld [vmem:[#allocation5 + $0x28] sm:$0xf] }
  0x80   :  { %1484 = vmatmul.bf16.vlgmr.msra.gmra.mxu1 %v3560_v8  ;;  %v2306_v22 = vor.u32 %v3126_v15, %v2305_v14  ;;  %v2417_v29 = vld [vmem:[#allocation5 + $0x228] sm:$0xf]  ;;  %v3186_v34 = vld [vmem:[#allocation5 + $0x334] sm:$0xf0]  ;;  %v2243_v14 = vld [vmem:[#allocation5 + $0xd8] sm:$0xf0] }
  0x81   :  { %1509 = vmatpush.bf16.msrb.mxu2 %v2782_v24  ;;  %v3190_v24 = vld [vmem:[#allocation5 + $0x354] sm:$0xf0]  ;;  %v2545_v33 = vld [vmem:[#allocation5 + $0x328] sm:$0xf] }
  0x82   :  { %1554 = vmatpush.bf16.msra.mxu0 %v2514_v26  ;;  %v3090_v26 = vld [vmem:[#allocation5 + $0x34] sm:$0xf0]  ;;  %v2562_v32 = vor.u32 %v3190_v24, %v2561_v23  ;;  %v2145_v35 = vld [vmem:[#allocation5 + $0x8] sm:$0xf]  ;;  %v2546_v48 = vor.u32 %v3186_v34, %v2545_v33  ;;  %v2371_v23 = vld [vmem:[#allocation5 + $0x1d8] sm:$0xf0] }
  0x83   :  { %1529 = vmatpush.bf16.msrb.mxu1 %v2242_v30  ;;  %1542 = vmatpush.bf16.msrb.mxu3 %v2370_v31  ;;  %v3154_v30 = vld [vmem:[#allocation5 + $0x234] sm:$0xf0]  ;;  %v2434_v31 = vor.u32 %v3158_v20, %v2433_v19  ;;  %v2162_v36 = vor.u32 %v3090_v26, %v2161_v25  ;;  %v2769_v43 = vld [vmem:[#allocation5 + $0x4e8] sm:$0xf]  ;;  %v3104_v26 = vld [vmem:[#allocation5 + $0xac] sm:$0xf] }
  0x84   :  { %1510 = vmatmul.bf16.vlgmr.msrb.gmra.mxu2 %v3574_v41  ;;  %v3118_v42 = vld [vmem:[#allocation5 + $0x114] sm:$0xf0]  ;;  %v2418_v47 = vor.u32 %v3154_v30, %v2417_v29  ;;  %v2401_v49 = vld [vmem:[#allocation5 + $0x208] sm:$0xf]  ;;  %v3136_v34 = vld [vmem:[#allocation5 + $0x1ac] sm:$0xf] }
  0x85   :  { %1567 = vmatpush.bf16.msra.mxu2 %v2642_v27  ;;  %v2289_v27 = vld [vmem:[#allocation5 + $0x128] sm:$0xf]  ;;  %v3274_v46 = vld [vmem:[#allocation5 + $0x5f4] sm:$0xf0] }
  0x86   :  { %1555 = vmatpush.bf16.msra.mxu0 %v2498_v38  ;;  %v2290_v37 = vor.u32 %v3122_v28, %v2289_v27  ;;  %v3086_v38 = vld [vmem:[#allocation5 + $0x14] sm:$0xf0]  ;;  %v2529_v51 = vld [vmem:[#allocation5 + $0x308] sm:$0xf]  ;;  %v2227_v27 = vld [vmem:[#allocation5 + $0xb8] sm:$0xf0] }
  0x87   :  { %1530 = vmatpush.bf16.msrb.mxu1 %v2226_v44  ;;  %1543 = vmatpush.bf16.msrb.mxu3 %v2354_v45  ;;  %v3242_v44 = vld [vmem:[#allocation5 + $0x4f4] sm:$0xf0]  ;;  %v2897_v45 = vld [vmem:[#allocation5 + $0x5e8] sm:$0xf]  ;;  %v2230_v33 = vor.u32 %v3104_v26, %v2227_v27  ;;  %v3208_v26 = vld [vmem:[#allocation5 + $0x3ec] sm:$0xf] }
  0x88   :  { %v3150_v50 = vld [vmem:[#allocation5 + $0x214] sm:$0xf0]  ;;  %v2898_v58 = vor.u32 %v3274_v46, %v2897_v45  ;;  %v2753_v59 = vld [vmem:[#allocation5 + $0x4c8] sm:$0xf]  ;;  %v2643_v27 = vld [vmem:[#allocation5 + $0x3f8] sm:$0xf0] }
  0x89   :  { %1568 = vmatpush.bf16.msra.mxu2 %v2626_v39  ;;  %v2273_v39 = vld [vmem:[#allocation5 + $0x108] sm:$0xf]  ;;  %v3182_v54 = vld [vmem:[#allocation5 + $0x314] sm:$0xf0] }
  0x8a   :  { %1556 = vmatpush.bf16.msra.mxu0 %v2482_v52  ;;  %v2146_v52 = vor.u32 %v3086_v38, %v2145_v35  ;;  %v2913_v60 = vld [vmem:[#allocation5 + $0x608] sm:$0xf]  ;;  %v3278_v61 = vld [vmem:[#allocation5 + $0x614] sm:$0xf0]  ;;  %v2530_v2 = vor.u32 %v3182_v54, %v2529_v51  ;;  %v2355_v35 = vld [vmem:[#allocation5 + $0x1b8] sm:$0xf0] }
  0x8b   :  { %1531 = vmatpush.bf16.msrb.mxu1 %v2210_v56  ;;  %1544 = vmatpush.bf16.msrb.mxu3 %v2338_v57  ;;  %v2259_v56 = vld [vmem:[#allocation5 + $0xf8] sm:$0xf0]  ;;  %v2770_v57 = vor.u32 %v3242_v44, %v2769_v43  ;;  %v3238_v62 = vld [vmem:[#allocation5 + $0x4d4] sm:$0xf0]  ;;  %v2881_v63 = vld [vmem:[#allocation5 + $0x5c8] sm:$0xf]  ;;  %v2358_v46 = vor.u32 %v3136_v34, %v2355_v35  ;;  %v2646_v35 = vor.u32 %v3208_v26, %v2643_v27 }
  0x8c   :  { %v2262_v4 = vor.u32 %v3112_v55, %v2259_v56  ;;  %v2754_v10 = vor.u32 %v3238_v62, %v2753_v59  ;;  %v2737_v15 = vld [vmem:[#allocation5 + $0x4a8] sm:$0xf]  ;;  %v3266_v19 = vld [vmem:[#allocation5 + $0x5b4] sm:$0xf0]  ;;  %v3100_v38 = vld [vmem:[#allocation5 + $0x8c] sm:$0xf] }
  0x8d   :  { %1569 = vmatpush.bf16.msra.mxu2 %v2610_v53  ;;  %2920 = vmatmul.msk.bf16.vlgmr.msrb.gmra.mxu0 %vm1342_vm0, %v3568_v18  ;;  %v2274_v53 = vor.u32 %v3118_v42, %v2273_v39  ;;  %v2721_v28 = vld [vmem:[#allocation5 + $0x488] sm:$0xf]  ;;  %v3230_v29 = vld [vmem:[#allocation5 + $0x494] sm:$0xf0]  ;;  %v2211_v39 = vld [vmem:[#allocation5 + $0x98] sm:$0xf0] }
  0x8e   :  { %1557 = vmatpush.bf16.msra.mxu0 %v2466_v0  ;;  %v3270_v0 = vld [vmem:[#allocation5 + $0x5d4] sm:$0xf0]  ;;  %v2849_v30 = vld [vmem:[#allocation5 + $0x588] sm:$0xf]  ;;  %v2579_v26 = vld [vmem:[#allocation5 + $0x378] sm:$0xf0] }
  0x8f   :  { %1532 = vmatpush.bf16.msrb.mxu1 %v2194_v6  ;;  %1545 = vmatpush.bf16.msrb.mxu3 %v2322_v7  ;;  %v2914_v6 = vor.u32 %v3278_v61, %v2913_v60  ;;  %v3144_v7 = vld [vmem:[#allocation5 + $0x1ec] sm:$0xf]  ;;  %v2882_v12 = vor.u32 %v3270_v0, %v2881_v63  ;;  %v2705_v42 = vld [vmem:[#allocation5 + $0x468] sm:$0xf]  ;;  %v3226_v43 = vld [vmem:[#allocation5 + $0x474] sm:$0xf0] }
  0x90   :  { %v2390_v20 = vor.u32 %v3144_v7, %v2387_v9  ;;  %v2833_v44 = vld [vmem:[#allocation5 + $0x568] sm:$0xf]  ;;  %v3258_v45 = vld [vmem:[#allocation5 + $0x574] sm:$0xf0]  ;;  %v3128_v60 = vld [vmem:[#allocation5 + $0x16c] sm:$0xf] }
  0x91   :  { %1570 = vmatpush.bf16.msra.mxu2 %v2594_v1  ;;  %v2402_v1 = vor.u32 %v3150_v50, %v2401_v49  ;;  %v2339_v49 = vld [vmem:[#allocation5 + $0x198] sm:$0xf0]  ;;  %v2706_v50 = vor.u32 %v3226_v43, %v2705_v42  ;;  %v2834_v51 = vor.u32 %v3258_v45, %v2833_v44  ;;  %v2689_v54 = vld [vmem:[#allocation5 + $0x448] sm:$0xf]  ;;  %v3222_v55 = vld [vmem:[#allocation5 + $0x454] sm:$0xf0] }
  0x92   :  { %1558 = vmatpush.bf16.msra.mxu0 %v2450_v16  ;;  %v3234_v16 = vld [vmem:[#allocation5 + $0x4b4] sm:$0xf0]  ;;  %v2817_v56 = vld [vmem:[#allocation5 + $0x548] sm:$0xf]  ;;  %v2323_v61 = vld [vmem:[#allocation5 + $0x178] sm:$0xf0]  ;;  %v2690_v62 = vor.u32 %v3222_v55, %v2689_v54 }
  0x93   :  { %1533 = vmatpush.bf16.msrb.mxu1 %v2178_v21  ;;  %1546 = vmatpush.bf16.msrb.mxu3 %v2306_v22  ;;  %v2246_v21 = vor.u32 %v3108_v13, %v2243_v14  ;;  %v3140_v22 = vld [vmem:[#allocation5 + $0x1cc] sm:$0xf]  ;;  %v2738_v24 = vor.u32 %v3234_v16, %v2737_v15  ;;  %v3250_v7 = vld [vmem:[#allocation5 + $0x534] sm:$0xf0]  ;;  %v2326_v9 = vor.u32 %v3128_v60, %v2323_v61  ;;  %v2307_v13 = vld [vmem:[#allocation5 + $0x158] sm:$0xf0] }
  0x94   :  { %v3092_v0 = vld [vmem:[#allocation5 + $0x4c] sm:$0xf]  ;;  %v2499_v43 = vld [vmem:[#allocation5 + $0x2d8] sm:$0xf0] }
  0x95   :  { %1571 = vmatpush.bf16.msra.mxu2 %v2578_v17  ;;  %v2865_v17 = vld [vmem:[#allocation5 + $0x5a8] sm:$0xf]  ;;  %v3088_v14 = vld [vmem:[#allocation5 + $0x2c] sm:$0xf]  ;;  %v2627_v45 = vld [vmem:[#allocation5 + $0x3d8] sm:$0xf0] }
  0x96   :  { %1559 = vmatpush.bf16.msra.mxu0 %v2434_v31  ;;  %v2866_v25 = vor.u32 %v3266_v19, %v2865_v17  ;;  %v3262_v31 = vld [vmem:[#allocation5 + $0x594] sm:$0xf0]  ;;  %v2163_v17 = vld [vmem:[#allocation5 + $0x38] sm:$0xf0]  ;;  %v2657_v19 = vld [vmem:[#allocation5 + $0x408] sm:$0xf] }
  0x97   :  { %1534 = vmatpush.bf16.msrb.mxu1 %v2162_v36  ;;  %1547 = vmatpush.bf16.msrb.mxu3 %v2290_v37  ;;  %v2722_v36 = vor.u32 %v3230_v29, %v2721_v28  ;;  %v2850_v37 = vor.u32 %v3262_v31, %v2849_v30  ;;  %v2166_v28 = vor.u32 %v3088_v14, %v2163_v17  ;;  %v3120_v29 = vld [vmem:[#allocation5 + $0x12c] sm:$0xf]  ;;  %v2291_v30 = vld [vmem:[#allocation5 + $0x138] sm:$0xf0] }
  0x98   :  { %v3172_v42 = vld [vmem:[#allocation5 + $0x2cc] sm:$0xf]  ;;  %v2611_v61 = vld [vmem:[#allocation5 + $0x3b8] sm:$0xf0] }
  0x99   :  { %1572 = vmatpush.bf16.msra.mxu2 %v2562_v32  ;;  %v2374_v32 = vor.u32 %v3140_v22, %v2371_v23  ;;  %v3246_v22 = vld [vmem:[#allocation5 + $0x514] sm:$0xf0]  ;;  %v3176_v23 = vld [vmem:[#allocation5 + $0x2ec] sm:$0xf] }
  0x9a   :  { %1560 = vmatpush.bf16.msra.mxu0 %v2418_v47  ;;  %v2214_v47 = vor.u32 %v3100_v38, %v2211_v39  ;;  %v2771_v38 = vld [vmem:[#allocation5 + $0x4f8] sm:$0xf0]  ;;  %v2294_v39 = vor.u32 %v3120_v29, %v2291_v30  ;;  %v3204_v44 = vld [vmem:[#allocation5 + $0x3cc] sm:$0xf] }
  0x9b   :  { %1535 = vmatpush.bf16.msrb.mxu1 %v2146_v52  ;;  %1548 = vmatpush.bf16.msrb.mxu3 %v2274_v53  ;;  %v3096_v52 = vld [vmem:[#allocation5 + $0x6c] sm:$0xf]  ;;  %v2195_v53 = vld [vmem:[#allocation5 + $0x78] sm:$0xf0]  ;;  %v2630_v54 = vor.u32 %v3204_v44, %v2627_v45 }
  0x9c   :  { %v2198_v59 = vor.u32 %v3096_v52, %v2195_v53  ;;  %v2502_v52 = vor.u32 %v3172_v42, %v2499_v43  ;;  %v3236_v53 = vld [vmem:[#allocation5 + $0x4cc] sm:$0xf]  ;;  %v2835_v42 = vld [vmem:[#allocation5 + $0x578] sm:$0xf0] }
  0x9d   :  { %1573 = vmatpush.bf16.msra.mxu2 %v2546_v48  ;;  %v3132_v48 = vld [vmem:[#allocation5 + $0x18c] sm:$0xf] }
  0x9e   :  { %1561 = vmatpush.bf16.msra.mxu0 %v2402_v1  ;;  %1549 = vmatmul.bf16.vlgmr.msrb.gmra.mxu3 %v3562_v11  ;;  %v2179_v1 = vld [vmem:[#allocation5 + $0x58] sm:$0xf0]  ;;  %v3200_v60 = vld [vmem:[#allocation5 + $0x3ac] sm:$0xf] }
  0x9f   :  { %1580 = vmatpush.bf16.msra.mxu1 %v2770_v57  ;;  %1593 = vmatpush.bf16.msra.mxu3 %v2898_v58  ;;  %v3254_v57 = vld [vmem:[#allocation5 + $0x554] sm:$0xf0]  ;;  %v2342_v58 = vor.u32 %v3132_v48, %v2339_v49  ;;  %v3272_v49 = vld [vmem:[#allocation5 + $0x5ec] sm:$0xf] }
  0xa0   :  { %1536 = vmatmul.bf16.vlgmr.msrb.gmra.mxu1 %v3558_v5  ;;  %v2818_v63 = vor.u32 %v3254_v57, %v2817_v56  ;;  %v2755_v56 = vld [vmem:[#allocation5 + $0x4d8] sm:$0xf0]  ;;  %v3168_v57 = vld [vmem:[#allocation5 + $0x2ac] sm:$0xf] }
  0xa1   :  { %1574 = vmatpush.bf16.msra.mxu2 %v2530_v2  ;;  %1562 = vmatmul.bf16.vlgmr.msra.gmra.mxu0 %v3556_v3  ;;  %v2673_v2 = vld [vmem:[#allocation5 + $0x428] sm:$0xf]  ;;  %v3264_v14 = vld [vmem:[#allocation5 + $0x5ac] sm:$0xf] }
  0xa2   :  { %1613 = vmatpush.bf16.msrb.mxu0 %v2914_v6  ;;  %v2801_v6 = vld [vmem:[#allocation5 + $0x528] sm:$0xf]  ;;  %v3260_v27 = vld [vmem:[#allocation5 + $0x58c] sm:$0xf] }
  0xa3   :  { %1581 = vmatpush.bf16.msra.mxu1 %v2754_v10  ;;  %1594 = vmatpush.bf16.msra.mxu3 %v2882_v12  ;;  %v2182_v10 = vor.u32 %v3092_v0, %v2179_v1  ;;  %v3124_v12 = vld [vmem:[#allocation5 + $0x14c] sm:$0xf]  ;;  %v2802_v16 = vor.u32 %v3250_v7, %v2801_v6  ;;  %v2758_v0 = vor.u32 %v3236_v53, %v2755_v56  ;;  %v2739_v6 = vld [vmem:[#allocation5 + $0x4b8] sm:$0xf0]  ;;  %v3602_v56 = vld [vmem:[#allocation7] sm:$0xf] }
  0xa4   :  { %1575 = vmatmul.bf16.vlgmr.msra.gmra.mxu2 %v3560_v8  ;;  %v3164_v7 = vld [vmem:[#allocation5 + $0x28c] sm:$0xf]  ;;  %v2547_v53 = vld [vmem:[#allocation5 + $0x338] sm:$0xf0] }
  0xa5   :  { %1619 = vmatpush.bf16.msrb.mxu2 %v2262_v4  ;;  %v3218_v4 = vld [vmem:[#allocation5 + $0x434] sm:$0xf0]  ;;  %v3224_v30 = vld [vmem:[#allocation5 + $0x46c] sm:$0xf] }
  0xa6   :  { %1632 = vmatpush.bf16.msra.mxu0 %v2390_v20  ;;  %v2674_v15 = vor.u32 %v3218_v4, %v2673_v2  ;;  %v3214_v20 = vld [vmem:[#allocation5 + $0x414] sm:$0xf0]  ;;  %v3232_v2 = vld [vmem:[#allocation5 + $0x4ac] sm:$0xf]  ;;  %v2614_v4 = vor.u32 %v3200_v60, %v2611_v61  ;;  %v2675_v61 = vld [vmem:[#allocation5 + $0x438] sm:$0xf0] }
  0xa7   :  { %1582 = vmatpush.bf16.msra.mxu1 %v2738_v24  ;;  %1595 = vmatpush.bf16.msra.mxu3 %v2866_v25  ;;  %v2310_v24 = vor.u32 %v3124_v12, %v2307_v13  ;;  %v2515_v25 = vld [vmem:[#allocation5 + $0x2f8] sm:$0xf0]  ;;  %v2658_v31 = vor.u32 %v3214_v20, %v2657_v19  ;;  %v3196_v12 = vld [vmem:[#allocation5 + $0x38c] sm:$0xf] }
  0xa8   :  { %v2518_v34 = vor.u32 %v3176_v23, %v2515_v25  ;;  %v2595_v13 = vld [vmem:[#allocation5 + $0x398] sm:$0xf0]  ;;  %v3228_v19 = vld [vmem:[#allocation5 + $0x48c] sm:$0xf] }
  0xa9   :  { %1620 = vmatpush.bf16.msrb.mxu2 %v2246_v21  ;;  %v2785_v21 = vld [vmem:[#allocation5 + $0x508] sm:$0xf]  ;;  %v2598_v20 = vor.u32 %v3196_v12, %v2595_v13  ;;  %v2451_v23 = vld [vmem:[#allocation5 + $0x278] sm:$0xf0]  ;;  %v3192_v25 = vld [vmem:[#allocation5 + $0x36c] sm:$0xf] }
  0xaa   :  { %1633 = vmatpush.bf16.msra.mxu0 %v2374_v32  ;;  %v2786_v32 = vor.u32 %v3246_v22, %v2785_v21  ;;  %v2723_v21 = vld [vmem:[#allocation5 + $0x498] sm:$0xf0]  ;;  %v3160_v22 = vld [vmem:[#allocation5 + $0x26c] sm:$0xf] }
  0xab   :  { %1583 = vmatpush.bf16.msra.mxu1 %v2722_v36  ;;  %1596 = vmatpush.bf16.msra.mxu3 %v2850_v37  ;;  %v2147_v36 = vld [vmem:[#allocation5 + $0x18] sm:$0xf0]  ;;  %v3240_v37 = vld [vmem:[#allocation5 + $0x4ec] sm:$0xf]  ;;  %v2454_v29 = vor.u32 %v3160_v22, %v2451_v23 }
  0xac   :  { %v3220_v45 = vld [vmem:[#allocation5 + $0x44c] sm:$0xf]  ;;  %v2803_v13 = vld [vmem:[#allocation5 + $0x538] sm:$0xf0] }
  0xad   :  { %1621 = vmatpush.bf16.msrb.mxu2 %v2230_v33  ;;  %v3084_v33 = vld [vmem:[#allocation5 + $0xc] sm:$0xf]  ;;  %v3286_v23 = vld [vmem:[#allocation8 + $0x38] sm:$0xff] }
  0xae   :  { %1634 = vmatpush.bf16.msra.mxu0 %v2358_v46  ;;  %v3116_v46 = vld [vmem:[#allocation5 + $0x10c] sm:$0xf]  ;;  %v2150_v48 = vor.u32 %v3084_v33, %v2147_v36  ;;  %v2707_v33 = vld [vmem:[#allocation5 + $0x478] sm:$0xf0] }
  0xaf   :  { %1584 = vmatpush.bf16.msra.mxu1 %v2706_v50  ;;  %1597 = vmatpush.bf16.msra.mxu3 %v2834_v51  ;;  %v2899_v50 = vld [vmem:[#allocation5 + $0x5f8] sm:$0xf0]  ;;  %v2774_v51 = vor.u32 %v3240_v37, %v2771_v38  ;;  %v3188_v37 = vld [vmem:[#allocation5 + $0x34c] sm:$0xf]  ;;  %v2710_v43 = vor.u32 %v3224_v30, %v2707_v33  ;;  %v3285_v30 = vld [vmem:[#allocation8 + $0x30] sm:$0xff] }
  0xb0   :  { %v2563_v38 = vld [vmem:[#allocation5 + $0x358] sm:$0xf0]  ;;  %v3216_v60 = vld [vmem:[#allocation5 + $0x42c] sm:$0xf] }
  0xb1   :  { %1622 = vmatpush.bf16.msrb.mxu2 %v2214_v47  ;;  %2921 = vmatmul.msk.bf16.vlgmr.msrb.gmra.mxu0 %vm1342_vm0, %v3568_v18  ;;  %v2275_v47 = vld [vmem:[#allocation5 + $0x118] sm:$0xf0]  ;;  %v3248_v12 = vld [vmem:[#allocation5 + $0x52c] sm:$0xf] }
  0xb2   :  { %1635 = vmatpush.bf16.msra.mxu0 %v2342_v58  ;;  %v2278_v55 = vor.u32 %v3116_v46, %v2275_v47  ;;  %v2483_v58 = vld [vmem:[#allocation5 + $0x2b8] sm:$0xf0]  ;;  %v2566_v47 = vor.u32 %v3188_v37, %v2563_v38 }
  0xb3   :  { %1585 = vmatpush.bf16.msra.mxu1 %v2690_v62  ;;  %1598 = vmatpush.bf16.msra.mxu3 %v2818_v63  ;;  %v3268_v62 = vld [vmem:[#allocation5 + $0x5cc] sm:$0xf]  ;;  %v2883_v63 = vld [vmem:[#allocation5 + $0x5d8] sm:$0xf0]  ;;  %v2486_v1 = vor.u32 %v3168_v57, %v2483_v58 }
  0xb5   :  { %1623 = vmatpush.bf16.msrb.mxu2 %v2198_v59  ;;  %v2902_v59 = vor.u32 %v3272_v49, %v2899_v50  ;;  %v3152_v49 = vld [vmem:[#allocation5 + $0x22c] sm:$0xf]  ;;  %v2419_v50 = vld [vmem:[#allocation5 + $0x238] sm:$0xf0] }
  0xb6   :  { %1636 = vmatpush.bf16.msra.mxu0 %v2326_v9  ;;  %v2467_v9 = vld [vmem:[#allocation5 + $0x298] sm:$0xf0] }
  0xb7   :  { %1586 = vmatpush.bf16.msra.mxu1 %v2674_v15  ;;  %1599 = vmatpush.bf16.msra.mxu3 %v2802_v16  ;;  %v2867_v15 = vld [vmem:[#allocation5 + $0x5b8] sm:$0xf0]  ;;  %v2742_v16 = vor.u32 %v3232_v2, %v2739_v6  ;;  %v2470_v17 = vor.u32 %v3164_v7, %v2467_v9  ;;  %v3276_v7 = vld [vmem:[#allocation5 + $0x60c] sm:$0xf] }
  0xb8   :  { %v2531_v6 = vld [vmem:[#allocation5 + $0x318] sm:$0xf0] }
  0xb9   :  { %1624 = vmatpush.bf16.msrb.mxu2 %v2182_v10  ;;  %v2886_v10 = vor.u32 %v3268_v62, %v2883_v63  ;;  %v3148_v63 = vld [vmem:[#allocation5 + $0x20c] sm:$0xf]  ;;  %v2915_v9 = vld [vmem:[#allocation5 + $0x618] sm:$0xf0] }
  0xba   :  { %1637 = vmatpush.bf16.msra.mxu0 %v2310_v24  ;;  %v2870_v24 = vor.u32 %v3264_v14, %v2867_v15  ;;  %v2678_v14 = vor.u32 %v3216_v60, %v2675_v61  ;;  %v2918_v22 = vor.u32 %v3276_v7, %v2915_v9 }
  0xbb   :  { %1587 = vmatpush.bf16.msra.mxu1 %v2658_v31  ;;  %1600 = vmatpush.bf16.msra.mxu3 %v2786_v32  ;;  %v2582_v31 = vor.u32 %v3192_v25, %v2579_v26  ;;  %v3244_v25 = vld [vmem:[#allocation5 + $0x50c] sm:$0xf]  ;;  %v2787_v26 = vld [vmem:[#allocation5 + $0x518] sm:$0xf0] }
  0xbd   :  { %1625 = vmatpush.bf16.msrb.mxu2 %v2166_v28  ;;  %v2726_v28 = vor.u32 %v3228_v19, %v2723_v21  ;;  %v2659_v21 = vld [vmem:[#allocation5 + $0x418] sm:$0xf0] }
  0xbe   :  { %1638 = vmatpush.bf16.msra.mxu0 %v2294_v39  ;;  %1588 = vmatmul.bf16.vlgmr.msra.gmra.mxu1 %v3572_v40  ;;  %v3256_v39 = vld [vmem:[#allocation5 + $0x56c] sm:$0xf] }
  0xbf   :  { %1645 = vmatpush.bf16.msrb.mxu1 %v2518_v34  ;;  %1658 = vmatpush.bf16.msrb.mxu3 %v2646_v35  ;;  %v3156_v34 = vld [vmem:[#allocation5 + $0x24c] sm:$0xf]  ;;  %v2435_v35 = vld [vmem:[#allocation5 + $0x258] sm:$0xf0] }
  0xc0   :  { %1601 = vmatmul.bf16.vlgmr.msra.gmra.mxu3 %v3574_v41  ;;  %v2438_v44 = vor.u32 %v3156_v34, %v2435_v35  ;;  %v3293_v34 = vld [vmem:[#allocation8 + $0x70] sm:$0xff]  ;;  %v3284_v35 = vld [vmem:[#allocation8 + $0x28] sm:$0xff] }
  0xc1   :  { %1626 = vmatpush.bf16.msrb.mxu2 %v2150_v48  ;;  %v3596_v32 = vpop.f32.mrf.mxu0  ;;  %v2691_v48 = vld [vmem:[#allocation5 + $0x458] sm:$0xf0] }
  0xc2   :  { %1639 = vmatpush.bf16.msra.mxu0 %v2278_v55  ;;  %v2819_v55 = vld [vmem:[#allocation5 + $0x558] sm:$0xf0]  ;;  %v2694_v58 = vor.u32 %v3220_v45, %v2691_v48 }
  0xc3   :  { %1646 = vmatpush.bf16.msrb.mxu1 %v2502_v52  ;;  %1659 = vmatpush.bf16.msrb.mxu3 %v2630_v54  ;;  %v3598_v36 = vpop.f32.mrf.mxu1  ;;  %v3184_v52 = vld [vmem:[#allocation5 + $0x32c] sm:$0xf] }
  0xc4   :  { %1627 = vmatmul.bf16.vlgmr.msrb.gmra.mxu2 %v3558_v5  ;;  %v2851_v5 = vld [vmem:[#allocation5 + $0x598] sm:$0xf0]  ;;  %v3252_v54 = vld [vmem:[#allocation5 + $0x54c] sm:$0xf]  ;;  %v2550_v62 = vor.u32 %v3184_v52, %v2547_v53  ;;  %v3279_v53 = vld [vmem:[#allocation8] sm:$0xff] }
  0xc5   :  { %1671 = vmatpush.bf16.msra.mxu2 %v2774_v51  ;;  %1640 = vmatmul.bf16.vlgmr.msra.gmra.mxu0 %v3562_v11  ;;  %v2854_v11 = vor.u32 %v3260_v27, %v2851_v5  ;;  %v2838_v51 = vor.u32 %v3256_v39, %v2835_v42  ;;  %v3291_v39 = vld [vmem:[#allocation8 + $0x60] sm:$0xff]  ;;  %v3282_v42 = vld [vmem:[#allocation8 + $0x18] sm:$0xff]  ;;  %v3288_v52 = vld [vmem:[#allocation8 + $0x48] sm:$0xff] }
  0xc6   :  { %1684 = vmatpush.bf16.msrb.mxu0 %v2902_v59  ;;  %v2422_v59 = vor.u32 %v3152_v49, %v2419_v50  ;;  %v3289_v49 = vld [vmem:[#allocation8 + $0x50] sm:$0xff]  ;;  %v3280_v50 = vld [vmem:[#allocation8 + $0x8] sm:$0xff] }
  0xc7   :  { %1647 = vmatpush.bf16.msrb.mxu1 %v2486_v1  ;;  %1660 = vmatpush.bf16.msrb.mxu3 %v2614_v4  ;;  %v3600_v46 = vpop.f32.mrf.mxu2  ;;  %v3180_v1 = vld [vmem:[#allocation5 + $0x30c] sm:$0xf]  ;;  %v2822_v4 = vor.u32 %v3252_v54, %v2819_v55 }
  0xc8   :  { %v3604_v57 = vpop.f32.mrf.mxu3  ;;  %v2534_v19 = vor.u32 %v3180_v1, %v2531_v6  ;;  %v3302_v6 = vld [vmem:[#allocation8 + $0xb8] sm:$0xff] }
  0xc9   :  { %1672 = vmatpush.bf16.msra.mxu2 %v2758_v0  ;;  %v2403_v0 = vld [vmem:[#allocation5 + $0x218] sm:$0xf0]  ;;  %v1357_v2 = vpop.f32.mrf.mxu0 }
  0xca   :  { %1685 = vmatpush.bf16.msrb.mxu0 %v2886_v10  ;;  %v2406_v15 = vor.u32 %v3148_v63, %v2403_v0 }
  0xcb   :  { %1648 = vmatpush.bf16.msrb.mxu1 %v2470_v17  ;;  %1661 = vmatpush.bf16.msrb.mxu3 %v2598_v20  ;;  %v1370_v10 = vpop.f32.mrf.mxu1  ;;  %v3212_v20 = vld [vmem:[#allocation5 + $0x40c] sm:$0xf] }
  0xcc   :  { %v2662_v27 = vor.u32 %v3212_v20, %v2659_v21 }
  0xcd   :  { %1673 = vmatpush.bf16.msra.mxu2 %v2742_v16  ;;  %v354_v16 = vperm.slane %v3602_v56, 0 }
  0xce   :  { %1686 = vmatpush.bf16.msrb.mxu0 %v2870_v24  ;;  %v2806_v24 = vor.u32 %v3248_v12, %v2803_v13  ;;  %v3301_v12 = vld [vmem:[#allocation8 + $0xb0] sm:$0xff] }
  0xcf   :  { %1649 = vmatpush.bf16.msrb.mxu1 %v2454_v29  ;;  %1662 = vmatpush.bf16.msrb.mxu3 %v2582_v31  ;;  %v1383_v17 = vpop.f32.mrf.mxu2  ;;  %v3294_v29 = vld [vmem:[#allocation8 + $0x78] sm:$0xff]  ;;  %v2790_v31 = vor.u32 %v3244_v25, %v2787_v26  ;;  %v3297_v26 = vld [vmem:[#allocation8 + $0x90] sm:$0xff] }
  0xd0   :  { %v1396_v5 = vpop.f32.mrf.mxu3  ;;  %v3298_v25 = vld [vmem:[#allocation8 + $0x98] sm:$0xff] }
  0xd1   :  { %1674 = vmatpush.bf16.msra.mxu2 %v2726_v28  ;;  %v1356_v28 = vadd.f32 %v3596_v32, %v354_v16 }
  0xd2   :  { %1687 = vmatpush.bf16.msrb.mxu0 %v2854_v11  ;;  %v3292_v11 = vld [vmem:[#allocation8 + $0x68] sm:$0xff] }
  0xd3   :  { %1650 = vmatpush.bf16.msrb.mxu1 %v2438_v44  ;;  %1663 = vmatpush.bf16.msrb.mxu3 %v2566_v47  ;;  %v1369_v33 = vadd.f32 %v3598_v36, %v1356_v28  ;;  %v3281_v44 = vld [vmem:[#allocation8 + $0x10] sm:$0xff]  ;;  %v3296_v28 = vld [vmem:[#allocation8 + $0x88] sm:$0xff] }
  0xd5   :  { %1675 = vmatpush.bf16.msra.mxu2 %v2710_v43  ;;  %v1382_v32 = vadd.f32 %v3600_v46, %v1369_v33 }
  0xd6   :  { %1688 = vmatpush.bf16.msrb.mxu0 %v2838_v51 }
  0xd7   :  { %1651 = vmatpush.bf16.msrb.mxu1 %v2422_v59  ;;  %1664 = vmatpush.bf16.msrb.mxu3 %v2550_v62  ;;  %v1433_v38 = vpop.f32.mrf.mxu2  ;;  %v1395_v36 = vadd.f32 %v3604_v57, %v1382_v32  ;;  %v3309_v32 = vld [vmem:[#allocation8 + $0xf0] sm:$0xff] }
  0xd9   :  { %1676 = vmatpush.bf16.msra.mxu2 %v2694_v58  ;;  %v3287_v58 = vld [vmem:[#allocation8 + $0x40] sm:$0xff] }
  0xda   :  { %1689 = vmatpush.bf16.msrb.mxu0 %v2822_v4  ;;  %v1407_v37 = vpop.f32.mrf.mxu0 }
  0xdb   :  { %1652 = vmatpush.bf16.msrb.mxu1 %v2406_v15  ;;  %1665 = vmatpush.bf16.msrb.mxu3 %v2534_v19  ;;  %v1408_v43 = vadd.f32 %v1407_v37, %v1395_v36  ;;  %v3300_v15 = vld [vmem:[#allocation8 + $0xa8] sm:$0xff] }
  0xdd   :  { %1677 = vmatpush.bf16.msra.mxu2 %v2678_v14 }
  0xde   :  { %1690 = vmatpush.bf16.msrb.mxu0 %v2806_v24  ;;  %1653 = vmatmul.bf16.vlgmr.msrb.gmra.mxu1 %v3556_v3  ;;  %v3283_v3 = vld [vmem:[#allocation8 + $0x20] sm:$0xff] }
  0xdf   :  { %1704 = vmatpush.bf16.msra.mxu1 %v2918_v22  ;;  %1978 = vmatpush.bf16.msra.mxu3 %v3286_v23  ;;  %v1435_v48 = vpop.f32.mrf.mxu2  ;;  %v3299_v22 = vld [vmem:[#allocation8 + $0xa0] sm:$0xff] }
  0xe0   :  { %1666 = vmatmul.bf16.vlgmr.msrb.gmra.mxu3 %v3560_v8  ;;  %v1420_v8 = vpop.f32.mrf.mxu1 }
  0xe1   :  { %1678 = vmatpush.bf16.msra.mxu2 %v2662_v27 }
  0xe2   :  { %1691 = vmatpush.bf16.msrb.mxu0 %v2790_v31  ;;  %v1409_v46 = vpop.f32.mrf.mxu0 }
  0xe3   :  { %1991 = vmatpush.bf16.msrb.mxu1 %v3294_v29  ;;  %1979 = vmatpush.bf16.msra.mxu3 %v3285_v30  ;;  %v1446_v45 = vpop.f32.mrf.mxu3  ;;  %v3295_v29 = vld [vmem:[#allocation8 + $0x80] sm:$0xff] }
  0xe4   :  { %1679 = vmatmul.bf16.vlgmr.msra.gmra.mxu2 %v3572_v40  ;;  %v3290_v40 = vld [vmem:[#allocation8 + $0x58] sm:$0xff] }
  0xe5   :  { %1692 = vmatmul.bf16.vlgmr.msrb.gmra.mxu0 %v3574_v41  ;;  %v1421_v41 = vadd.f32 %v1420_v8, %v1408_v43  ;;  %2004 = vmatpush.bf16.msrb.mxu2 %v3302_v6  ;;  %v3307_v43 = vld [vmem:[#allocation8 + $0xe0] sm:$0xff] }
  0xe7   :  { %1992 = vmatpush.bf16.msrb.mxu1 %v3293_v34  ;;  %1980 = vmatpush.bf16.msra.mxu3 %v3284_v35  ;;  %v1434_v51 = vadd.f32 %v1433_v38, %v1421_v41  ;;  %v1459_v57 = vpop.f32.mrf.mxu2  ;;  %v3310_v34 = vld [vmem:[#allocation8 + $0xf8] sm:$0xff] }
  0xe8   :  { %v1422_v47 = vpop.f32.mrf.mxu1  ;;  %2017 = vmatpush.bf16.msra.mxu0 %v3310_v34  ;;  %v3306_v41 = vld [vmem:[#allocation8 + $0xd8] sm:$0xff]  ;;  %v3312_v34 = vld [vmem:[#allocation10 + $0x8] sm:$0xff] }
  0xe9   :  { %v1710_v55 = vmax.f32 %v1434_v51, 0.0  ;;  %2005 = vmatpush.bf16.msrb.mxu2 %v3301_v12  ;;  %v3305_v51 = vld [vmem:[#allocation8 + $0xd0] sm:$0xff] }
  0xeb   :  { %1993 = vmatpush.bf16.msrb.mxu1 %v3292_v11  ;;  %1981 = vmatpush.bf16.msra.mxu3 %v3283_v3  ;;  %v1448_v54 = vpop.f32.mrf.mxu3  ;;  %v1714_v59 = vpack.c.bf16 %v1710_v55, %v1710_v55  ;;  %v356_v11 = vperm.slane %v3602_v56, 2  ;;  %v3304_v55 = vld [vmem:[#allocation8 + $0xc8] sm:$0xff] }
  0xec   :  { %2018 = vmatpush.bf16.msra.mxu0 %v3309_v32  ;;  %v3311_v32 = vld [vmem:[#allocation10] sm:$0xff] }
  0xed   :  { %2006 = vmatpush.bf16.msrb.mxu2 %v3300_v15 }
  0xee   :  { %2922 = vmatmul.msk.bf16.vlgmr.msra.gmra.mxu1 %vm1342_vm0, %v3568_v18  ;;  %v355_v18 = vperm.slane %v3602_v56, 1 }
  0xef   :  { %1994 = vmatpush.bf16.msrb.mxu1 %v3291_v39  ;;  %1982 = vmatpush.bf16.msra.mxu3 %v3282_v42  ;;  %v1461_v61 = vpop.f32.mrf.mxu2  ;;  %v3308_v39 = vld [vmem:[#allocation8 + $0xe8] sm:$0xff] }
  0xf0   :  { %v1447_v60 = vadd.f32 %v1446_v45, %v355_v18  ;;  %2019 = vmatpush.bf16.msra.mxu0 %v3308_v39  ;;  %v3303_v18 = vld [vmem:[#allocation8 + $0xc0] sm:$0xff]  ;;  %v357_v61 = vperm.slane %v3602_v56, 3 }
  0xf1   :  { %2007 = vmatpush.bf16.msrb.mxu2 %v3299_v22 }
  0xf2   :  { %v1460_v62 = vadd.f32 %v1459_v57, %v1447_v60 }
  0xf3   :  { %1995 = vmatpush.bf16.msrb.mxu1 %v3290_v40  ;;  %1983 = vmatpush.bf16.msra.mxu3 %v3281_v44 }
  0xf4   :  { %2020 = vmatpush.bf16.msra.mxu0 %v3307_v43 }
  0xf5   :  { %2008 = vmatpush.bf16.msrb.mxu2 %v3298_v25 }
  0xf7   :  { %1996 = vmatpush.bf16.msrb.mxu1 %v3289_v49  ;;  %1984 = vmatpush.bf16.msra.mxu3 %v3280_v50 }
  0xf8   :  { %2021 = vmatpush.bf16.msra.mxu0 %v3306_v41 }
  0xf9   :  { %2009 = vmatpush.bf16.msrb.mxu2 %v3297_v26 }
  0xfa   :  { %v1472_v63 = vpop.f32.mrf.mxu0 }
  0xfb   :  { %1997 = vmatpush.bf16.msrb.mxu1 %v3288_v52  ;;  %1985 = vmatpush.bf16.msra.mxu3 %v3279_v53  ;;  %v1473_v0 = vadd.f32 %v1472_v63, %v1460_v62 }
  0xfc   :  { %2022 = vmatpush.bf16.msra.mxu0 %v3305_v51 }
  0xfd   :  { %v1485_v1 = vpop.f32.mrf.mxu1  ;;  %2010 = vmatpush.bf16.msrb.mxu2 %v3296_v28  ;;  %v3317_v28 = vld [vmem:[#allocation10 + $0x30] sm:$0xff] }
  0xfe   :  { %1986 = vmatmul.bf16.vlgmr.msra.gmra.mxu3 %v1714_v59  ;;  %v1486_v2 = vadd.f32 %v1485_v1, %v1473_v0 }
  0xff   :  { %1998 = vmatpush.bf16.msrb.mxu1 %v3287_v58 }
 0x100   :  { %2023 = vmatpush.bf16.msra.mxu0 %v3304_v55 }
 0x101   :  { %v1498_v7 = vpop.f32.mrf.mxu3  ;;  %2011 = vmatpush.bf16.msrb.mxu2 %v3295_v29  ;;  %v3316_v29 = vld [vmem:[#allocation10 + $0x28] sm:$0xff] }
 0x102   :  { %v1474_v4 = vpop.f32.mrf.mxu0  ;;  %v1499_v10 = vadd.f32 %v1498_v7, %v1486_v2 }
 0x104   :  { %2024 = vmatpush.bf16.msra.mxu0 %v3303_v18 }
 0x105   :  { %v1487_v14 = vpop.f32.mrf.mxu1 }
 0x107   :  { %v1511_v9 = vpop.f32.mrf.mxu2 }
 0x108   :  { %v1512_v13 = vadd.f32 %v1511_v9, %v1499_v10 }
 0x109   :  { %v1500_v19 = vpop.f32.mrf.mxu3 }
 0x10a   :  { %v1524_v16 = vpop.f32.mrf.mxu0 }
 0x10b   :  { %v1525_v17 = vadd.f32 %v1524_v16, %v1512_v13 }
 0x10d   :  { %v1711_v21 = vmax.f32 %v1525_v17, 0.0 }
 0x10f   :  { %v1513_v20 = vpop.f32.mrf.mxu2  ;;  %v1715_v23 = vpack.c.bf16 %v1711_v21, %v1711_v21 }
 0x111   :  { %1999 = vmatmul.bf16.vlgmr.msrb.gmra.mxu1 %v1715_v23  ;;  %v3333_v23 = vld [vmem:[%s3633_s4] ss:$0 sm:$0xff] }
 0x112   :  { %v1526_v24 = vpop.f32.mrf.mxu0 }
 0x11d   :  { %v1537_v5 = vpop.f32.mrf.mxu1 }
 0x11e   :  { %v1563_v27 = vpop.f32.mrf.mxu0  ;;  %v1538_v8 = vadd.f32 %v1537_v5, %v356_v11  ;;  %v3318_v5 = vld [vmem:[#allocation10 + $0x38] sm:$0xff] }
 0x11f   :  { %2100 = vmatpush.bf16.msrb.mxu3 %v3318_v5 }
 0x121   :  { %v1550_v30 = vpop.f32.mrf.mxu3 }
 0x122   :  { %v1551_v36 = vadd.f32 %v1550_v30, %v1538_v8  ;;  %v3315_v30 = vld [vmem:[#allocation10 + $0x20] sm:$0xff] }
 0x123   :  { %2101 = vmatpush.bf16.msrb.mxu3 %v3317_v28 }
 0x124   :  { %v1564_v40 = vadd.f32 %v1563_v27, %v1551_v36 }
 0x125   :  { %v1539_v33 = vpop.f32.mrf.mxu1 }
 0x126   :  { %v1565_v31 = vpop.f32.mrf.mxu0  ;;  %v3313_v33 = vld [vmem:[#allocation10 + $0x10] sm:$0xff] }
 0x127   :  { %v1576_v35 = vpop.f32.mrf.mxu2  ;;  %2102 = vmatpush.bf16.msrb.mxu3 %v3316_v29  ;;  %v3314_v31 = vld [vmem:[#allocation10 + $0x18] sm:$0xff] }
 0x128   :  { %v1577_v45 = vadd.f32 %v1576_v35, %v1564_v40 }
 0x129   :  { %v1552_v3 = vpop.f32.mrf.mxu3 }
 0x12b   :  { %2103 = vmatpush.bf16.msrb.mxu3 %v3315_v30 }
 0x12e   :  { %v1615_v37 = vpop.f32.mrf.mxu0 }
 0x12f   :  { %v1578_v38 = vpop.f32.mrf.mxu2  ;;  %2104 = vmatpush.bf16.msrb.mxu3 %v3314_v31 }
 0x133   :  { %2105 = vmatpush.bf16.msrb.mxu3 %v3313_v33 }
 0x136   :  { %v1617_v42 = vpop.f32.mrf.mxu0 }
 0x137   :  { %2106 = vmatpush.bf16.msrb.mxu3 %v3312_v34  ;;  %v3334_v42 = vld [vmem:[%s3635_s6] ss:$0 sm:$0xff] }
 0x13b   :  { %v1589_v44 = vpop.f32.mrf.mxu1  ;;  %2107 = vmatpush.bf16.msrb.mxu3 %v3311_v32 }
 0x13c   :  { %v1590_v46 = vadd.f32 %v1589_v44, %v1577_v45 }
 0x142   :  { %v1641_v49 = vpop.f32.mrf.mxu0 }
 0x143   :  { %v1602_v47 = vpop.f32.mrf.mxu3  ;;  %v1591_v50 = vpop.f32.mrf.mxu1 }
 0x144   :  { %v1603_v48 = vadd.f32 %v1602_v47, %v1590_v46 }
 0x146   :  { %v1616_v52 = vadd.f32 %v1615_v37, %v1603_v48 }
 0x147   :  { %v1628_v53 = vpop.f32.mrf.mxu2 }
 0x148   :  { %v1712_v54 = vmax.f32 %v1616_v52, 0.0  ;;  %v1629_v62 = vadd.f32 %v1628_v53, %v357_v61 }
 0x14a   :  { %v1716_v57 = vpack.c.bf16 %v1712_v54, %v1712_v54  ;;  %v1643_v59 = vpop.f32.mrf.mxu0  ;;  %v1642_v0 = vadd.f32 %v1641_v49, %v1629_v62 }
 0x14b   :  { %v1604_v58 = vpop.f32.mrf.mxu3 }
 0x14c   :  { %2012 = vmatmul.bf16.vlgmr.msrb.gmra.mxu2 %v1716_v57 }
 0x14f   :  { %v1630_v60 = vpop.f32.mrf.mxu2 }
 0x15b   :  { %v1654_v63 = vpop.f32.mrf.mxu1 }
 0x15c   :  { %v1655_v1 = vadd.f32 %v1654_v63, %v1642_v0 }
 0x162   :  { %v1693_v2 = vpop.f32.mrf.mxu0 }
 0x163   :  { %v1667_v4 = vpop.f32.mrf.mxu3  ;;  %v1656_v7 = vpop.f32.mrf.mxu1 }
 0x164   :  { %v1668_v6 = vadd.f32 %v1667_v4, %v1655_v1 }
 0x167   :  { %v1680_v9 = vpop.f32.mrf.mxu2 }
 0x168   :  { %v1681_v10 = vadd.f32 %v1680_v9, %v1668_v6 }
 0x16a   :  { %v1695_v12 = vpop.f32.mrf.mxu0  ;;  %v1694_v14 = vadd.f32 %v1693_v2, %v1681_v10 }
 0x16b   :  { %v1669_v13 = vpop.f32.mrf.mxu3  ;;  %v1706_v15 = vpop.f32.mrf.mxu1 }
 0x16c   :  { %v1707_v16 = vadd.f32 %v1706_v15, %v1694_v14 }
 0x16e   :  { %v1713_v19 = vmax.f32 %v1707_v16, 0.0 }
 0x16f   :  { %v1682_v17 = vpop.f32.mrf.mxu2 }
 0x170   :  { %v1717_v20 = vpack.c.bf16 %v1713_v19, %v1713_v19 }
 0x172   :  { %2025 = vmatmul.bf16.vlgmr.msra.gmra.mxu0 %v1717_v20 }
 0x173   :  { %v1708_v56 = vpop.f32.mrf.mxu1 }
 0x181   :  { %v1987_v21 = vpop.f32.mrf.mxu3 }
 0x182   :  { %v1988_v24 = vadd.f32 %v3333_v23, %v1987_v21 }
 0x189   :  { %v1989_v22 = vpop.f32.mrf.mxu3 }
 0x18e   :  { %v2000_v25 = vpop.f32.mrf.mxu1 }
 0x18f   :  { %v2001_v26 = vadd.f32 %v2000_v25, %v1988_v24 }
 0x196   :  { %v2002_v27 = vpop.f32.mrf.mxu1 }
 0x1cf   :  { %v2013_v35 = vpop.f32.mrf.mxu2 }
 0x1d0   :  { %v2014_v3 = vadd.f32 %v2013_v35, %v2001_v26 }
 0x1d7   :  { %v2015_v11 = vpop.f32.mrf.mxu2 }
 0x1ef   :  { %v2026_v37 = vpop.f32.mrf.mxu0 }
 0x1f0   :  { %v2027_v8 = vadd.f32 %v2026_v37, %v2014_v3 }
 0x1f2   :  { %v2030_v38 = vmax.f32 %v2027_v8, 0.0 }
 0x1f4   :  { %v2031_v36 = vpack.c.bf16 %v2030_v38, %v2030_v38 }
 0x1f6   :  { %2108 = vmatmul.bf16.vlgmr.msrb.gmra.mxu3 %v2031_v36 }
 0x1f7   :  { %v2028_v39 = vpop.f32.mrf.mxu0 }
 0x279   :  { %v2109_v43 = vpop.f32.mrf.mxu3 }
 0x27a   :  { %v2110_v40 = vadd.f32 %v3334_v42, %v2109_v43 }
 0x27c   :  { %2113 = vst [vmem:[#allocation11] sm:$0xff] %v2110_v40 }
 0x281   :  { %v2111_v44 = vpop.f32.mrf.mxu3 }
 0x282   :  { %2117 = vsyncadd [#allocation4], 96  ;;  %s2120_s9 = sshll.u32 %s3636_s7, 4  ;;  %s3498_s10 = smov [#allocation11]   ;;  %s2121_s9 = int_to_ptr.hbm [resolvable:$true] %s2120_s9 }
 0x283   :  { %s2118_s11 = sshll.u32 %s3498_s10, 4  ;;  %s3499_s12 = smov 32   ;;  %s2119_s11 = int_to_ptr.vmem [resolvable:$true] %s2118_s11 }
 0x284   :  { %s3500_s13 = smov 2  }
 0x285   :  { %2126 = dma.vmem_to_hbm [thread:$0]  %s2119_s11, 32, %s2121_s9, [#allocation4], %s3499_s12, %s3499_s12, %s3500_s13  }
 0x286   :  { %3485 = dma.done.wait [#allocation4], 128  }
 0x287   :  { %3486 = vsyncadd [#allocation4], 4294967168 }
 0x288   :  { %2131 = vsyncpa [#allocation3], 1 }
 0x289   :  { %2132 = vsyncpa [#allocation6], 1 }
 0x28a   :  { %2133 = vsyncpa [#allocation9], 1 }
 0x28b   :  { %2134 = vsyncpa [#allocation4], 1 }

</bundles_post_ra>
